<compile_context>
chip_gen: v7x
topology: tpu7x:2x2x1
jax: 0.10.0
libtpu: 0.0.40
codegen_flags: <defaults>
</compile_context>

<pallas_src>
import numpy as np
import jax
import jax.numpy as jnp
from jax.experimental import pallas as pl
from jax.experimental.pallas import tpu as pltpu

LANE = 128


def _round_up(x, m):
    return (x + m - 1) // m * m


# --------------------------- fused Pallas kernel -----------------------------
def _make_fused_kernel(H, W, CP, pad, dilation, compute_dtype):
    """One grid step = one batch element: conv1+BN+ReLU, conv2+BN, +residual."""
    Hp, Wp = H + 2 * pad, W + 2 * pad
    HW = H * W
    taps = [(kh, kw) for kh in range(3) for kw in range(3)]

    def im2col(buf):
        # buf: (Hp, Wp, CP) -> (H*W, 9*CP) tap-major patch matrix (stride=1).
        cols = []
        for kh, kw in taps:
            h0, w0 = kh * dilation, kw * dilation
            cols.append(buf[h0:h0 + H, w0:w0 + W, :].reshape(HW, CP))
        return jnp.concatenate(cols, axis=-1)

    def kernel(x_ref, w1_ref, w2_ref, s1_ref, b1_ref, s2_ref, b2_ref,
               o_ref, xpad_ref, midpad_ref):
        # Zero the halo scratches each step (cheap VMEM stores; a step-0-only
        # init would be unsafe if the parallel grid is sharded across cores).
        xpad_ref[...] = jnp.zeros_like(xpad_ref)
        midpad_ref[...] = jnp.zeros_like(midpad_ref)

        x = x_ref[...]                                        # (H, W, CP) f32
        xpad_ref[pad:pad + H, pad:pad + W, :] = x.astype(compute_dtype)

        # conv1 + BN + ReLU : single block-diagonal im2col matmul (K = 9*CP).
        p1 = im2col(xpad_ref[...])                            # (HW, 9*CP)
        acc1 = jnp.dot(p1, w1_ref[...], preferred_element_type=jnp.float32)
        y1 = jnp.maximum(acc1 * s1_ref[...] + b1_ref[...], 0.0)
        midpad_ref[pad:pad + H, pad:pad + W, :] = (
            y1.reshape(H, W, CP).astype(compute_dtype))

        # conv2 + BN + residual add (no trailing ReLU: matches module forward).
        p2 = im2col(midpad_ref[...])
        acc2 = jnp.dot(p2, w2_ref[...], preferred_element_type=jnp.float32)
        y2 = acc2 * s2_ref[...] + b2_ref[...]
        o_ref[...] = (y2.reshape(H, W, CP)
                      + x.astype(jnp.float32)).astype(o_ref.dtype)

    return kernel


# ------------------------------ wrapper / glue --------------------------------
def basic_block_groups_forward(x_nchw, params):
    """Fused Pallas implementation of BasicBlock_groups.forward (downsample=None).

    x_nchw: (N, C, H, W) float32.  Returns (N, C, H, W) float32."""
    stride = params["stride"]
    pad = params["pad"]
    dilation = params["dilation"]
    CP = params["CP"]
    cdt = params["compute_dtype"]

    # downsample=None => residual is x itself, so stride must be 1 and the
    # convs must preserve spatial size (pad_amt == dilation).
    assert stride == 1, "downsample=None requires stride=1 (residual shape match)"
    pad_amt = dilation if dilation > 1 else pad
    assert pad_amt == dilation, "fused residual path assumes spatial-preserving convs"
    # TODO(synk): stride>1 (with a downsample branch) would need the stride
    # folded into the DMA/index_map rather than in-kernel strided slicing.

    N, C, H, W = x_nchw.shape
    # NCHW -> lane-dense (N, H, W, CP): groups folded into (zero-padded) lanes.
    x = jnp.transpose(x_nchw, (0, 2, 3, 1))
    if CP != C:
        x = jnp.pad(x, ((0, 0), (0, 0), (0, 0), (0, CP - C)))

    Hp, Wp = H + 2 * pad_amt, W + 2 * pad_amt
    kernel = _make_fused_kernel(H, W, CP, pad_amt, dilation, cdt)

    # TODO(synk): for large H, W, C that exceed v7x's 64 MiB VMEM, H-tile the
    # plane (rows of H plus a 2*dilation halo) instead of full-plane blocks.
    full_plane = pl.BlockSpec((None, H, W, CP), lambda n: (n, 0, 0, 0))
    w_spec = pl.BlockSpec((9 * CP, CP), lambda n: (0, 0))   # resident across batch
    v_spec = pl.BlockSpec((1, CP), lambda n: (0, 0))

    out = pl.pallas_call(
        kernel,
        out_shape=jax.ShapeDtypeStruct((N, H, W, CP), jnp.float32),
        grid=(N,),
        in_specs=[full_plane, w_spec, w_spec, v_spec, v_spec, v_spec, v_spec],
        out_specs=full_plane,
        scratch_shapes=[pltpu.VMEM((Hp, Wp, CP), cdt),
                        pltpu.VMEM((Hp, Wp, CP), cdt)],
        compiler_params=pltpu.CompilerParams(
            dimension_semantics=("parallel",),   # v7x: shard batch over 2 TCs
            vmem_limit_bytes=32 * 1024 * 1024),
    )(x, params["w1"], params["w2"],
      params["s1"], params["b1"], params["s2"], params["b2"])

    # Back to NCHW, dropping padded lanes.
    return jnp.transpose(out[..., :C], (0, 3, 1, 2))


# ------------------------- parameter preparation ------------------------------
def fold_bn(gamma, beta, mean, var, eps=1e-5):
    scale = gamma / jnp.sqrt(var + eps)
    bias = beta - mean * scale
    return scale, bias


def pack_blockdiag_weight(w_oihw, groups, CP, dtype):
    """(Cout, Cin_g, 3, 3) torch layout -> (9*CP, CP) block-diagonal matrix so
    the grouped conv becomes one im2col matmul over the full (padded) lane dim."""
    w = np.asarray(w_oihw, np.float32)
    Cout, Cin_g, KH, KW = w.shape
    Cg_out = Cout // groups
    wf = np.zeros((KH, KW, CP, CP), np.float32)
    for g in range(groups):
        o0, i0 = g * Cg_out, g * Cin_g
        # (Cg_out, Cin_g, 3, 3) -> (3, 3, Cin_g, Cg_out)
        wf[:, :, i0:i0 + Cin_g, o0:o0 + Cg_out] = np.transpose(
            w[o0:o0 + Cg_out], (2, 3, 1, 0))
    return jnp.asarray(wf.reshape(KH * KW * CP, CP), dtype=dtype)


def prepare_params(w1_oihw, w2_oihw, bn1, bn2, *, groups, stride, pad, dilation,
                   channels, compute_dtype=jnp.bfloat16):
    CP = _round_up(max(channels, LANE), LANE)
    s1, b1 = fold_bn(*bn1)
    s2, b2 = fold_bn(*bn2)

    def pad_vec(v):
        return jnp.pad(jnp.asarray(v, jnp.float32),
                       (0, CP - channels)).reshape(1, CP)

    return dict(
        groups=groups, stride=stride, pad=pad, dilation=dilation, CP=CP,
        compute_dtype=compute_dtype,
        w1=pack_blockdiag_weight(w1_oihw, groups, CP, compute_dtype),
        w2=pack_blockdiag_weight(w2_oihw, groups, CP, compute_dtype),
        s1=pad_vec(s1), b1=pad_vec(b1), s2=pad_vec(s2), b2=pad_vec(b2))


# ---------------- pure-JAX reference (for correctness check) -----------------
def _ref_convbn(x, w_oihw, scale, bias, groups, stride, pad, dilation, relu):
    pad_amt = dilation if dilation > 1 else pad
    y = jax.lax.conv_general_dilated(
        x, w_oihw, window_strides=(stride, stride),
        padding=[(pad_amt, pad_amt), (pad_amt, pad_amt)],
        rhs_dilation=(dilation, dilation),
        feature_group_count=groups,
        dimension_numbers=("NCHW", "OIHW", "NCHW"))
    y = y * scale[None, :, None, None] + bias[None, :, None, None]
    return jnp.maximum(y, 0.0) if relu else y


if __name__ == "__main__":
    # Module config: inplanes=planes=4, groups=2, stride=1, downsample=None,
    # pad=1, dilation=1 (downsample=None requires stride=1 & inplanes==planes).
    N, C, H, W = 2, 4, 16, 16
    G, stride, pad, dilation = 2, 1, 1, 1
    Cg = C // G

    key = jax.random.PRNGKey(0)
    ks = jax.random.split(key, 11)

    x = jax.random.normal(ks[0], (N, C, H, W), jnp.float32)

    # Conv weights in PyTorch layout (Cout, Cin//G, 3, 3), bias=False.
    w1_oihw = jax.random.normal(ks[1], (C, Cg, 3, 3), jnp.float32) * 0.2
    w2_oihw = jax.random.normal(ks[2], (C, Cg, 3, 3), jnp.float32) * 0.2

    # BatchNorm parameters (inference semantics, folded into scale/bias).
    g1 = 1.0 + 0.1 * jax.random.normal(ks[3], (C,), jnp.float32)
    b1 = 0.1 * jax.random.normal(ks[4], (C,), jnp.float32)
    m1 = 0.1 * jax.random.normal(ks[5], (C,), jnp.float32)
    v1 = jnp.abs(jax.random.normal(ks[6], (C,), jnp.float32)) + 0.5
    g2 = 1.0 + 0.1 * jax.random.normal(ks[7], (C,), jnp.float32)
    b2 = 0.1 * jax.random.normal(ks[8], (C,), jnp.float32)
    m2 = 0.1 * jax.random.normal(ks[9], (C,), jnp.float32)
    v2 = jnp.abs(jax.random.normal(ks[10], (C,), jnp.float32)) + 0.5

    # Reference: conv1(bn,relu) -> conv2(bn) -> + x   (downsample is None)
    s1, bb1 = fold_bn(g1, b1, m1, v1)
    s2, bb2 = fold_bn(g2, b2, m2, v2)
    ref = _ref_convbn(x, w1_oihw, s1, bb1, G, stride, pad, dilation, relu=True)
    ref = _ref_convbn(ref, w2_oihw, s2, bb2, G, 1, pad, dilation, relu=False)
    ref = ref + x

    # f32 compute path: tight numerical check.
    params_f32 = prepare_params(
        w1_oihw, w2_oihw, (g1, b1, m1, v1), (g2, b2, m2, v2),
        groups=G, stride=stride, pad=pad, dilation=dilation,
        channels=C, compute_dtype=jnp.float32)
    out_f32 = jax.block_until_ready(basic_block_groups_forward(x, params_f32))
    np.testing.assert_allclose(np.asarray(out_f32), np.asarray(ref),
                               atol=1e-4, rtol=1e-4)

    # bf16 compute path (performance default): bf16 MXU inputs, f32 accumulate.
    params_bf16 = prepare_params(
        w1_oihw, w2_oihw, (g1, b1, m1, v1), (g2, b2, m2, v2),
        groups=G, stride=stride, pad=pad, dilation=dilation,
        channels=C, compute_dtype=jnp.bfloat16)
    out_bf16 = jax.block_until_ready(basic_block_groups_forward(x, params_bf16))
    np.testing.assert_allclose(np.asarray(out_bf16), np.asarray(ref),
                               atol=5e-2, rtol=5e-2)

    print("KERNEL_OK")
</pallas_src>

<mosaic_0001>
module attributes {stable_mosaic.version = 11 : i64} {
  func.func @kernel(%arg0: i32, %arg1: memref<1x16x16x128xf32, #tpu.memory_space<vmem>>, %arg2: memref<1152x128xf32, #tpu.memory_space<vmem>>, %arg3: memref<1152x128xf32, #tpu.memory_space<vmem>>, %arg4: memref<1x128xf32, #tpu.memory_space<vmem>>, %arg5: memref<1x128xf32, #tpu.memory_space<vmem>>, %arg6: memref<1x128xf32, #tpu.memory_space<vmem>>, %arg7: memref<1x128xf32, #tpu.memory_space<vmem>>, %arg8: memref<1x16x16x128xf32, #tpu.memory_space<vmem>>, %arg9: memref<18x18x128xf32, #tpu.memory_space<vmem>>, %arg10: memref<18x18x128xf32, #tpu.memory_space<vmem>>) attributes {dimension_semantics = [#tpu.dimension_semantics<parallel>], iteration_bounds = array<i64: 2>, scalar_prefetch = 0 : i64, scratch_operands = 2 : i64, tpu.core_type = #tpu.core_type<tc>, window_params = [{transform_indices = @transform_0, window_bounds = array<i64: 1, 16, 16, 128>}, {pipeline_mode = #tpu.pipeline_mode<synchronous>, transform_indices = @transform_1, window_bounds = array<i64: 1152, 128>}, {pipeline_mode = #tpu.pipeline_mode<synchronous>, transform_indices = @transform_2, window_bounds = array<i64: 1152, 128>}, {pipeline_mode = #tpu.pipeline_mode<synchronous>, transform_indices = @transform_3, window_bounds = array<i64: 1, 128>}, {pipeline_mode = #tpu.pipeline_mode<synchronous>, transform_indices = @transform_4, window_bounds = array<i64: 1, 128>}, {pipeline_mode = #tpu.pipeline_mode<synchronous>, transform_indices = @transform_5, window_bounds = array<i64: 1, 128>}, {pipeline_mode = #tpu.pipeline_mode<synchronous>, transform_indices = @transform_6, window_bounds = array<i64: 1, 128>}, {transform_indices = @transform_7, window_bounds = array<i64: 1, 16, 16, 128>}]} {
    %cst = arith.constant 0.000000e+00 : f32
    %0 = vector.broadcast %cst : f32 to vector<18x18x128xf32>
    %c0 = arith.constant 0 : index
    %c0_0 = arith.constant 0 : index
    %c0_1 = arith.constant 0 : index
    %1 = vector.load %arg9[%c0, %c0_0, %c0_1] : memref<18x18x128xf32, #tpu.memory_space<vmem>>, vector<18x18x128xf32>
    tpu.vector_store %arg9[%c0, %c0_0, %c0_1], %0 {strides = array<i32>} : memref<18x18x128xf32, #tpu.memory_space<vmem>>, vector<18x18x128xf32>,
    %cst_2 = arith.constant 0.000000e+00 : f32
    %2 = vector.broadcast %cst_2 : f32 to vector<18x18x128xf32>
    %c0_3 = arith.constant 0 : index
    %c0_4 = arith.constant 0 : index
    %c0_5 = arith.constant 0 : index
    %3 = vector.load %arg10[%c0_3, %c0_4, %c0_5] : memref<18x18x128xf32, #tpu.memory_space<vmem>>, vector<18x18x128xf32>
    tpu.vector_store %arg10[%c0_3, %c0_4, %c0_5], %2 {strides = array<i32>} : memref<18x18x128xf32, #tpu.memory_space<vmem>>, vector<18x18x128xf32>,
    %c0_6 = arith.constant 0 : index
    %c0_7 = arith.constant 0 : index
    %c0_8 = arith.constant 0 : index
    %c0_9 = arith.constant 0 : index
    %4 = vector.load %arg1[%c0_6, %c0_7, %c0_8, %c0_9] : memref<1x16x16x128xf32, #tpu.memory_space<vmem>>, vector<1x16x16x128xf32>
    %5 = vector.shape_cast %4 : vector<1x16x16x128xf32> to vector<16x16x128xf32>
    %c1 = arith.constant 1 : index
    %c1_10 = arith.constant 1 : index
    %c0_11 = arith.constant 0 : index
    %6 = vector.load %arg9[%c1, %c1_10, %c0_11] : memref<18x18x128xf32, #tpu.memory_space<vmem>>, vector<16x16x128xf32>
    tpu.vector_store %arg9[%c1, %c1_10, %c0_11], %5 {strides = array<i32>} : memref<18x18x128xf32, #tpu.memory_space<vmem>>, vector<16x16x128xf32>,
    %c0_12 = arith.constant 0 : index
    %c0_13 = arith.constant 0 : index
    %c0_14 = arith.constant 0 : index
    %7 = vector.load %arg9[%c0_12, %c0_13, %c0_14] : memref<18x18x128xf32, #tpu.memory_space<vmem>>, vector<18x18x128xf32>
    %8 = vector.extract_strided_slice %7 {offsets = [0, 0, 0], sizes = [16, 16, 128], strides = [1, 1, 1]} : vector<18x18x128xf32> to vector<16x16x128xf32>
    %9 = vector.shape_cast %8 : vector<16x16x128xf32> to vector<256x128xf32>
    %10 = vector.extract_strided_slice %7 {offsets = [0, 1, 0], sizes = [16, 16, 128], strides = [1, 1, 1]} : vector<18x18x128xf32> to vector<16x16x128xf32>
    %11 = vector.shape_cast %10 : vector<16x16x128xf32> to vector<256x128xf32>
    %12 = vector.extract_strided_slice %7 {offsets = [0, 2, 0], sizes = [16, 16, 128], strides = [1, 1, 1]} : vector<18x18x128xf32> to vector<16x16x128xf32>
    %13 = vector.shape_cast %12 : vector<16x16x128xf32> to vector<256x128xf32>
    %14 = vector.extract_strided_slice %7 {offsets = [1, 0, 0], sizes = [16, 16, 128], strides = [1, 1, 1]} : vector<18x18x128xf32> to vector<16x16x128xf32>
    %15 = vector.shape_cast %14 : vector<16x16x128xf32> to vector<256x128xf32>
    %16 = vector.extract_strided_slice %7 {offsets = [1, 1, 0], sizes = [16, 16, 128], strides = [1, 1, 1]} : vector<18x18x128xf32> to vector<16x16x128xf32>
    %17 = vector.shape_cast %16 : vector<16x16x128xf32> to vector<256x128xf32>
    %18 = vector.extract_strided_slice %7 {offsets = [1, 2, 0], sizes = [16, 16, 128], strides = [1, 1, 1]} : vector<18x18x128xf32> to vector<16x16x128xf32>
    %19 = vector.shape_cast %18 : vector<16x16x128xf32> to vector<256x128xf32>
    %20 = vector.extract_strided_slice %7 {offsets = [2, 0, 0], sizes = [16, 16, 128], strides = [1, 1, 1]} : vector<18x18x128xf32> to vector<16x16x128xf32>
    %21 = vector.shape_cast %20 : vector<16x16x128xf32> to vector<256x128xf32>
    %22 = vector.extract_strided_slice %7 {offsets = [2, 1, 0], sizes = [16, 16, 128], strides = [1, 1, 1]} : vector<18x18x128xf32> to vector<16x16x128xf32>
    %23 = vector.shape_cast %22 : vector<16x16x128xf32> to vector<256x128xf32>
    %24 = vector.extract_strided_slice %7 {offsets = [2, 2, 0], sizes = [16, 16, 128], strides = [1, 1, 1]} : vector<18x18x128xf32> to vector<16x16x128xf32>
    %25 = vector.shape_cast %24 : vector<16x16x128xf32> to vector<256x128xf32>
    %26 = tpu.concatenate %9, %11, %13, %15, %17, %19, %21, %23, %25 in 1 : vector<256x128xf32>, vector<256x128xf32>, vector<256x128xf32>, vector<256x128xf32>, vector<256x128xf32>, vector<256x128xf32>, vector<256x128xf32>, vector<256x128xf32>, vector<256x128xf32> -> vector<256x1152xf32>
    %c0_15 = arith.constant 0 : index
    %c0_16 = arith.constant 0 : index
    %27 = vector.load %arg2[%c0_15, %c0_16] : memref<1152x128xf32, #tpu.memory_space<vmem>>, vector<1152x128xf32>
    %cst_17 = arith.constant dense<0.000000e+00> : vector<256x128xf32>
    %28 = tpu.matmul %26, %27, %cst_17 {dimension_numbers = #tpu.dot_dimension_numbers<[1], [0], [0], [1], [0, 0, 1, 1], [], []>} : vector<256x1152xf32>, vector<1152x128xf32>, vector<256x128xf32> -> vector<256x128xf32>
    %c0_18 = arith.constant 0 : index
    %c0_19 = arith.constant 0 : index
    %29 = vector.load %arg4[%c0_18, %c0_19] : memref<1x128xf32, #tpu.memory_space<vmem>>, vector<1x128xf32>
    %30 = vector.broadcast %29 : vector<1x128xf32> to vector<256x128xf32>
    %31 = arith.mulf %28, %30 : vector<256x128xf32>
    %c0_20 = arith.constant 0 : index
    %c0_21 = arith.constant 0 : index
    %32 = vector.load %arg5[%c0_20, %c0_21] : memref<1x128xf32, #tpu.memory_space<vmem>>, vector<1x128xf32>
    %33 = vector.broadcast %32 : vector<1x128xf32> to vector<256x128xf32>
    %34 = arith.addf %31, %33 : vector<256x128xf32>
    %cst_22 = arith.constant 0.000000e+00 : f32
    %35 = vector.broadcast %cst_22 : f32 to vector<256x128xf32>
    %36 = arith.maximumf %34, %35 : vector<256x128xf32>
    %37 = vector.shape_cast %36 : vector<256x128xf32> to vector<16x16x128xf32>
    %c1_23 = arith.constant 1 : index
    %c1_24 = arith.constant 1 : index
    %c0_25 = arith.constant 0 : index
    %38 = vector.load %arg10[%c1_23, %c1_24, %c0_25] : memref<18x18x128xf32, #tpu.memory_space<vmem>>, vector<16x16x128xf32>
    tpu.vector_store %arg10[%c1_23, %c1_24, %c0_25], %37 {strides = array<i32>} : memref<18x18x128xf32, #tpu.memory_space<vmem>>, vector<16x16x128xf32>,
    %c0_26 = arith.constant 0 : index
    %c0_27 = arith.constant 0 : index
    %c0_28 = arith.constant 0 : index
    %39 = vector.load %arg10[%c0_26, %c0_27, %c0_28] : memref<18x18x128xf32, #tpu.memory_space<vmem>>, vector<18x18x128xf32>
    %40 = vector.extract_strided_slice %39 {offsets = [0, 0, 0], sizes = [16, 16, 128], strides = [1, 1, 1]} : vector<18x18x128xf32> to vector<16x16x128xf32>
    %41 = vector.shape_cast %40 : vector<16x16x128xf32> to vector<256x128xf32>
    %42 = vector.extract_strided_slice %39 {offsets = [0, 1, 0], sizes = [16, 16, 128], strides = [1, 1, 1]} : vector<18x18x128xf32> to vector<16x16x128xf32>
    %43 = vector.shape_cast %42 : vector<16x16x128xf32> to vector<256x128xf32>
    %44 = vector.extract_strided_slice %39 {offsets = [0, 2, 0], sizes = [16, 16, 128], strides = [1, 1, 1]} : vector<18x18x128xf32> to vector<16x16x128xf32>
    %45 = vector.shape_cast %44 : vector<16x16x128xf32> to vector<256x128xf32>
    %46 = vector.extract_strided_slice %39 {offsets = [1, 0, 0], sizes = [16, 16, 128], strides = [1, 1, 1]} : vector<18x18x128xf32> to vector<16x16x128xf32>
    %47 = vector.shape_cast %46 : vector<16x16x128xf32> to vector<256x128xf32>
    %48 = vector.extract_strided_slice %39 {offsets = [1, 1, 0], sizes = [16, 16, 128], strides = [1, 1, 1]} : vector<18x18x128xf32> to vector<16x16x128xf32>
    %49 = vector.shape_cast %48 : vector<16x16x128xf32> to vector<256x128xf32>
    %50 = vector.extract_strided_slice %39 {offsets = [1, 2, 0], sizes = [16, 16, 128], strides = [1, 1, 1]} : vector<18x18x128xf32> to vector<16x16x128xf32>
    %51 = vector.shape_cast %50 : vector<16x16x128xf32> to vector<256x128xf32>
    %52 = vector.extract_strided_slice %39 {offsets = [2, 0, 0], sizes = [16, 16, 128], strides = [1, 1, 1]} : vector<18x18x128xf32> to vector<16x16x128xf32>
    %53 = vector.shape_cast %52 : vector<16x16x128xf32> to vector<256x128xf32>
    %54 = vector.extract_strided_slice %39 {offsets = [2, 1, 0], sizes = [16, 16, 128], strides = [1, 1, 1]} : vector<18x18x128xf32> to vector<16x16x128xf32>
    %55 = vector.shape_cast %54 : vector<16x16x128xf32> to vector<256x128xf32>
    %56 = vector.extract_strided_slice %39 {offsets = [2, 2, 0], sizes = [16, 16, 128], strides = [1, 1, 1]} : vector<18x18x128xf32> to vector<16x16x128xf32>
    %57 = vector.shape_cast %56 : vector<16x16x128xf32> to vector<256x128xf32>
    %58 = tpu.concatenate %41, %43, %45, %47, %49, %51, %53, %55, %57 in 1 : vector<256x128xf32>, vector<256x128xf32>, vector<256x128xf32>, vector<256x128xf32>, vector<256x128xf32>, vector<256x128xf32>, vector<256x128xf32>, vector<256x128xf32>, vector<256x128xf32> -> vector<256x1152xf32>
    %c0_29 = arith.constant 0 : index
    %c0_30 = arith.constant 0 : index
    %59 = vector.load %arg3[%c0_29, %c0_30] : memref<1152x128xf32, #tpu.memory_space<vmem>>, vector<1152x128xf32>
    %cst_31 = arith.constant dense<0.000000e+00> : vector<256x128xf32>
    %60 = tpu.matmul %58, %59, %cst_31 {dimension_numbers = #tpu.dot_dimension_numbers<[1], [0], [0], [1], [0, 0, 1, 1], [], []>} : vector<256x1152xf32>, vector<1152x128xf32>, vector<256x128xf32> -> vector<256x128xf32>
    %c0_32 = arith.constant 0 : index
    %c0_33 = arith.constant 0 : index
    %61 = vector.load %arg6[%c0_32, %c0_33] : memref<1x128xf32, #tpu.memory_space<vmem>>, vector<1x128xf32>
    %62 = vector.broadcast %61 : vector<1x128xf32> to vector<256x128xf32>
    %63 = arith.mulf %60, %62 : vector<256x128xf32>
    %c0_34 = arith.constant 0 : index
    %c0_35 = arith.constant 0 : index
    %64 = vector.load %arg7[%c0_34, %c0_35] : memref<1x128xf32, #tpu.memory_space<vmem>>, vector<1x128xf32>
    %65 = vector.broadcast %64 : vector<1x128xf32> to vector<256x128xf32>
    %66 = arith.addf %63, %65 : vector<256x128xf32>
    %67 = vector.shape_cast %66 : vector<256x128xf32> to vector<16x16x128xf32>
    %68 = arith.addf %67, %5 : vector<16x16x128xf32>
    %c0_36 = arith.constant 0 : index
    %c0_37 = arith.constant 0 : index
    %c0_38 = arith.constant 0 : index
    %c0_39 = arith.constant 0 : index
    %69 = vector.load %arg8[%c0_36, %c0_37, %c0_38, %c0_39] : memref<1x16x16x128xf32, #tpu.memory_space<vmem>>, vector<1x16x16x128xf32>
    %70 = vector.shape_cast %69 : vector<1x16x16x128xf32> to vector<16x16x128xf32>
    %71 = vector.shape_cast %68 : vector<16x16x128xf32> to vector<1x16x16x128xf32>
    tpu.vector_store %arg8[%c0_36, %c0_37, %c0_38, %c0_39], %71 {strides = array<i32>} : memref<1x16x16x128xf32, #tpu.memory_space<vmem>>, vector<1x16x16x128xf32>,
    return
  }
  func.func @transform_0(%arg0: i32) -> (i32, i32, i32, i32) {
    %c0_i32 = arith.constant 0 : i32
    %c0_i32_0 = arith.constant 0 : i32
    %c0_i32_1 = arith.constant 0 : i32
    %c0_i32_2 = arith.constant 0 : i32
    return %arg0, %c0_i32, %c0_i32_0, %c0_i32_1 : i32, i32, i32, i32
  }
  func.func @transform_1(%arg0: i32) -> (i32, i32) {
    %c0_i32 = arith.constant 0 : i32
    %c0_i32_0 = arith.constant 0 : i32
    %c0_i32_1 = arith.constant 0 : i32
    return %c0_i32, %c0_i32_0 : i32, i32
  }
  func.func @transform_2(%arg0: i32) -> (i32, i32) {
    %c0_i32 = arith.constant 0 : i32
    %c0_i32_0 = arith.constant 0 : i32
    %c0_i32_1 = arith.constant 0 : i32
    return %c0_i32, %c0_i32_0 : i32, i32
  }
  func.func @transform_3(%arg0: i32) -> (i32, i32) {
    %c0_i32 = arith.constant 0 : i32
    %c0_i32_0 = arith.constant 0 : i32
    %c0_i32_1 = arith.constant 0 : i32
    return %c0_i32, %c0_i32_0 : i32, i32
  }
  func.func @transform_4(%arg0: i32) -> (i32, i32) {
    %c0_i32 = arith.constant 0 : i32
    %c0_i32_0 = arith.constant 0 : i32
    %c0_i32_1 = arith.constant 0 : i32
    return %c0_i32, %c0_i32_0 : i32, i32
  }
  func.func @transform_5(%arg0: i32) -> (i32, i32) {
    %c0_i32 = arith.constant 0 : i32
    %c0_i32_0 = arith.constant 0 : i32
    %c0_i32_1 = arith.constant 0 : i32
    return %c0_i32, %c0_i32_0 : i32, i32
  }
  func.func @transform_6(%arg0: i32) -> (i32, i32) {
    %c0_i32 = arith.constant 0 : i32
    %c0_i32_0 = arith.constant 0 : i32
    %c0_i32_1 = arith.constant 0 : i32
    return %c0_i32, %c0_i32_0 : i32, i32
  }
  func.func @transform_7(%arg0: i32) -> (i32, i32, i32, i32) {
    %c0_i32 = arith.constant 0 : i32
    %c0_i32_0 = arith.constant 0 : i32
    %c0_i32_1 = arith.constant 0 : i32
    %c0_i32_2 = arith.constant 0 : i32
    return %arg0, %c0_i32, %c0_i32_0, %c0_i32_1 : i32, i32, i32, i32
  }
}

</mosaic_0001>

<bundles_post_ra>
// kernel: tpu_custom_call.1
= control target key start
LH: loop header
LB: loop body
LE: loop exit
PB: predicated region body
PF: predicated region fallthrough
CT: control target
= control target key end

     0   :  { %12 = vsyncpa [#allocation5], 0  ;;  %s7811_s0 = inlined_call_operand.hbm [shape: f32[2,16,16,128], index: 0, kind: input, shape index: {}]   ;;  %s7812_s1 = inlined_call_operand.hbm [shape: f32[1152,128], index: 1, kind: input, shape index: {}]   ;;  %s7813_s2 = inlined_call_operand.hbm [shape: f32[1152,128], index: 2, kind: input, shape index: {}]   ;;  %s7814_s3 = inlined_call_operand.vmem [shape: f32[1,128], index: 3, kind: input, shape index: {}]   ;;  %s7815_s4 = inlined_call_operand.vmem [shape: f32[1,128], index: 4, kind: input, shape index: {}]   ;;  %s7816_s5 = inlined_call_operand.vmem [shape: f32[1,128], index: 5, kind: input, shape index: {}]   ;;  %s7817_s6 = inlined_call_operand.vmem [shape: f32[1,128], index: 6, kind: input, shape index: {}]   ;;  %s7818_s7 = inlined_call_operand.hbm [shape: f32[2,16,16,128], index: 7, kind: output, shape index: {}]  }
   0x1   :  { %14 = vsyncpa [#allocation5 + $0x1], 0 }
   0x2   :  { %15 = vsyncpa [#allocation8], 0 }
   0x3   :  { %16 = vsyncpa [#allocation6], 0 }
   0x4   :  { %18 = vsyncpa [#allocation6 + $0x1], 0  ;;  %s5643_s24 = smov 0   ;;  %s5645_s25 = smov 0  }
   0x5   :  { %s5647_s26 = smov 0   ;;  %s5649_s27 = smov 0  }
   0x6 LB: > { %s5664_s28 = sadd.s32 4294967295, %s5591_s27   ;;  %s4150_s29 = sadd.s32 4294967294, %s5591_s27   ;;  %s5591_s27 = sphi %s5649_s27, %s8162_s27   ;;  %s5587_s26 = sphi %s5647_s26, %s8161_s26   ;;  %s5583_s25 = sphi %s5645_s25, %s8160_s25   ;;  %s5579_s24 = sphi %s5643_s24, %s8159_s24  }
   0x7   : > { %p44_p0 = scmp.ne.s32.totalorder %s5583_s25, %s5579_s24  ;;  %p7819_p1 = scmp.eq.s32.totalorder %s5664_s28, 0 }
   0x8   : > { %p200_p3 = scmp.eq.s32.totalorder %s4150_s29, 1  ;;  %p4151_p5 = scmp.ge.s32.totalorder %s5591_s27, 1 }
   0x9   : > { %p5673_p4 = por %p7819_p1, %p44_p0  ;;  %p207_p7 = scmp.lt.s32.totalorder %s5591_s27, 3 }
   0xa   : > { %p5678_p6 = por %p200_p3, %p44_p0  ;;  %s5593_s10 = smov [#allocation7]  }
   0xb   : > { %s7968_s30 = scalar_select %p5673_p4, 1, 0 }
   0xc   : > { %s7969_s8 = scalar_select %p5678_p6, 1, 0 }
   0xd   : > { %p5683_p8 = pnand %p4151_p5, %p207_p7  ;;  %s219_s11 = sshll.u32 %s5593_s10, 4  ;;  %s5687_s11 = int_to_ptr.vmem [resolvable:$true] %s219_s11 }
   0xe   : > { %s5594_s13 = smov [#allocation9]   ;;  %s5435_s17 = scalar_lea.hbm %s7812_s1, 18432 }
   0xf   : > { %p5290_p9 = pneg %p5683_p8  ;;  %s232_s14 = sshll.u32 %s5594_s13, 4  ;;  %s5698_s14 = int_to_ptr.vmem [resolvable:$true] %s232_s14 }
  0x10   : > { %p5436_p12 = scmp.ne.s32.totalorder %s7812_s1, %s5435_s17  ;;  %p5442_p5 = scmp.lt.u32.totalorder %s5435_s17, %s7812_s1 }
  0x11   : > { %p5694_p11 = pnand %p5290_p9, %p7819_p1 }
  0x13   : > { %p5437_p13 = pneg %p5694_p11 }
  0x15   : > { %p5438_p0 = pnand %p5437_p13, %p5436_p12 }
  0x17   : > { %p5439_p3 = pneg %p5438_p0 }
  0x19   : > { %p5444_p7 = pnand %p5442_p5, %p5439_p3 }
  0x1b   : > { %5447 = shalt.err (!%p5444_p7)
}
  0x1c   : > { %s5448_s22 = scalar_lea.vmem %s5687_s11, 18432  ;;  %p5456_p2 = scmp.lt.s32.totalorder %s5687_s11, %s5687_s11 }
  0x1d   : > { %p5449_p9 = scmp.ne.s32.totalorder %s5687_s11, %s5448_s22  ;;  %p5457_p12 = scmp.lt.s32.totalorder %s5448_s22, %s5448_s22 }
  0x1f   : > { %p5451_p10 = pnand %p5449_p9, %p5437_p13  ;;  %p5458_p0 = por %p5457_p12, %p5456_p2 }
  0x21   : > { %p5452_p1 = pneg %p5451_p10 }
  0x23   : > { %p5459_p6 = pnand %p5458_p0, %p5452_p1 }
  0x25   : > { %5462 = shalt.err (!%p5459_p6)
}
  0x26   : > { %s7820_s23 = smov 128   ;;  %s5596_s29 = smov 8  }
  0x27   : > { %5293 = dma.hbm_to_vmem [thread:$0]  (!%p5694_p11), %s7812_s1, 18432, %s5687_s11, [#allocation8], %s7820_s23, %s7820_s23, %s5596_s29  }
  0x28   : > { %s5463_s17 = scalar_lea.hbm %s7813_s2, 18432 }
  0x29   : > { %p5464_p1 = scmp.ne.s32.totalorder %s7813_s2, %s5463_s17  ;;  %p5470_p10 = scmp.lt.u32.totalorder %s5463_s17, %s7813_s2 }
  0x2b   : > { %p5466_p2 = pnand %p5464_p1, %p5437_p13 }
  0x2d   : > { %p5467_p6 = pneg %p5466_p2 }
  0x2f   : > { %p5472_p3 = pnand %p5470_p10, %p5467_p6 }
  0x31   : > { %5475 = shalt.err (!%p5472_p3)
}
  0x32   : > { %s5476_s11 = scalar_lea.vmem %s5698_s14, 18432  ;;  %p5484_p12 = scmp.lt.s32.totalorder %s5698_s14, %s5698_s14 }
  0x33   : > { %p5477_p5 = scmp.ne.s32.totalorder %s5698_s14, %s5476_s11  ;;  %p5485_p0 = scmp.lt.s32.totalorder %s5476_s11, %s5476_s11 }
  0x35   : > { %p5479_p7 = pnand %p5477_p5, %p5437_p13  ;;  %p5486_p1 = por %p5485_p0, %p5484_p12 }
  0x37   : > { %p5480_p9 = pneg %p5479_p7 }
  0x39   : > { %p5487_p2 = pnand %p5486_p1, %p5480_p9 }
  0x3b   : > { %5490 = shalt.err (!%p5487_p2)
}
  0x3c   : > { %5296 = dma.hbm_to_vmem [thread:$0]  (!%p5694_p11), %s7813_s2, 18432, %s5698_s14, [#allocation8], %s7820_s23, %s7820_s23, %s5596_s29  }
  0x3d   : > { %s5759_s12 = sadd.s32 1, %s5591_s27   ;;  %s31_s13 = sadd.s32 1, %s5587_s26 }
  0x3e   : > { %s28_s15 = ssub.s32 %s5591_s27, %s5759_s12  ;;  %p38_p13 = scmp.ne.s32.totalorder %s5587_s26, %s5583_s25 }
  0x3f   : > { %p29_p6 = scmp.eq.s32.totalorder %s28_s15, 0  ;;  %p39_p10 = scmp.eq.s32.totalorder %s5591_s27, 0 }
  0x40   : > { %p7972_p3 = scmp.eq.s32.totalorder %s5664_s28, 1  ;;  %p5307_p7 = scmp.lt.s32.totalorder %s5591_s27, 2 }
  0x41   : > { %s5775_s17 = scalar_select %p29_p6, %s5587_s26, %s31_s13  }
  0x42   : > { %p5769_p5 = por %p7972_p3, %p38_p13  ;;  %p40_p9 = por %p39_p10, %p38_p13 }
  0x43   : > { %s258_s18 = sand.u32 1, %s5587_s26   ;;  %s4172_s14 = sshll.u32 %s5591_s27, 12 }
  0x44   : > { %s7973_s16 = scalar_select %p5769_p5, 1, 0 }
  0x45   : > { %s4155_s19 = sshll.u32 %s258_s18, 8  ;;  %s5782_s11 = scalar_lea.hbm %s7811_s0, %s4172_s14 }
  0x46   : > { %s262_s22 = scalar_lea.vmem [#allocation4], %s4155_s19  ;;  %p5786_p11 = pnand %p5307_p7, %p40_p9 }
  0x47   : > { %s269_s10 = sshll.u32 %s262_s22, 4  ;;  %s5790_s15 = scalar_lea.sflag [#allocation5], %s258_s18  ;;  %s5784_s10 = int_to_ptr.vmem [resolvable:$true] %s269_s10 }
  0x48   : > { %s5491_s23 = scalar_lea.hbm %s5782_s11, 4096  ;;  %p5493_p0 = pneg %p5786_p11 }
  0x49   : > { %p5492_p12 = scmp.ne.s32.totalorder %s5782_s11, %s5491_s23  ;;  %s5496_s20 = scalar_lea.hbm %s7811_s0, 8192 }
  0x4a   : > { %p5497_p13 = scmp.lt.u32.totalorder %s5782_s11, %s7811_s0  ;;  %p5498_p6 = scmp.lt.u32.totalorder %s5496_s20, %s5491_s23 }
  0x4b   : > { %p5494_p1 = pnand %p5493_p0, %p5492_p12  ;;  %p5500_p3 = scmp.lt.u32.totalorder %s5491_s23, %s5782_s11 }
  0x4c   : > { %p5499_p10 = por %p5498_p6, %p5497_p13 }
  0x4d   : > { %p5495_p2 = pneg %p5494_p1 }
  0x4e   : > { %p5501_p7 = por %p5500_p3, %p5499_p10 }
  0x50   : > { %p5502_p9 = pnand %p5501_p7, %p5495_p2 }
  0x52   : > { %5505 = shalt.err (!%p5502_p9)
}
  0x53   : > { %s5506_s18 = scalar_lea.vmem %s5784_s10, 4096  ;;  %s5597_s19 = smov [#allocation4]  }
  0x54   : > { %p5507_p12 = scmp.ne.s32.totalorder %s5784_s10, %s5506_s18  ;;  %s5511_s14 = sshll.u32 %s5597_s19, 4  ;;  %s5512_s14 = int_to_ptr.vmem [resolvable:$false] %s5511_s14 }
  0x55   : > { %s5513_s21 = scalar_lea.vmem %s5512_s14, 8192  ;;  %p5514_p4 = scmp.lt.s32.totalorder %s5784_s10, %s5512_s14 }
  0x56   : > { %p5509_p1 = pnand %p5507_p12, %p5493_p0  ;;  %p5515_p13 = scmp.lt.s32.totalorder %s5513_s21, %s5506_s18 }
  0x58   : > { %p5510_p5 = pneg %p5509_p1  ;;  %p5516_p6 = por %p5515_p13, %p5514_p4 }
  0x5a   : > { %p5517_p10 = pnand %p5516_p6, %p5510_p5 }
  0x5c   : > { %5520 = shalt.err (!%p5517_p10)
}
  0x5d   : > { %s7975_s23 = smov 128   ;;  %281 = sbr.rel (%p5683_p8) target bundleno = 1545 (0x609), region = 48 }
  0x5e   : > { %5300 = dma.hbm_to_vmem [thread:$0]  (!%p5786_p11), %s5782_s11, 4096, %s5784_s10, %s5790_s15, %s7975_s23, %s7975_s23, %s5596_s29  }
  0x64   : > { %s5824_s20 = sand.u32 1, %s5583_s25   ;;  %p7976_p4 = scmp.ne.s32.totalorder %s7968_s30, 0 }
  0x65   : > { %s4159_s22 = sshll.u32 %s5824_s20, 8  ;;  %s284_s18 = scalar_lea.sflag [#allocation5], %s5824_s20 }
  0x66   : > { %s5830_s13 = scalar_lea.vmem [#allocation4], %s4159_s22 }
  0x67   : > { %5566 = dma.done.wait (%p7976_p4), %s284_s18, 4096  }
  0x68   : > { %5568 = vsyncadd (%p7976_p4), %s284_s18, 4294963200  ;;  %p7977_p5 = scmp.eq.s32.totalorder %s5664_s28, 0 }
  0x6a   : > { %5570 = dma.done.wait (%p7977_p5), [#allocation8], 36864   ;;  %p7978_p8 = pmov %p7977_p5 }
  0x6b   : > { %vm601_vm0 = vcmask 1046528   ;;  %v7823_v0 = vmov 0.0|0.0   ;;  %v5599_v1 = vmov 0.0   ;;  %v861_v3 = vld [vmem:[#allocation7] sm:$0xff]  ;;  %v862_v4 = vld [vmem:[#allocation7 + $0x8] sm:$0xff]  ;;  %v863_v5 = vld [vmem:[#allocation7 + $0x10] sm:$0xff] }
  0x6c   : > { %5572 = vsyncadd (%p7978_p8), [#allocation8], 4294930432  ;;  %4430 = vmatprep.subr.bf16.mxu0 %v7823_v0  ;;  %326 = vst [vmem:[#allocation2] sm:$0xff] %v5599_v1  ;;  %v5843_v2 = vrot.slane %v5599_v1, 1  ;;  %v4431_v6 = vpack.c.bf16 %v862_v4, %v861_v3  ;;  %v864_v7 = vld [vmem:[#allocation7 + $0x18] sm:$0xff]  ;;  %v865_v9 = vld [vmem:[#allocation7 + $0x20] sm:$0xff] }
  0x6d   : > { %328 = vst [vmem:[#allocation2 + $0x10] sm:$0x3] %v5599_v1  ;;  %329 = vst [vmem:[#allocation2 + $0x18] sm:$0xff] %v5599_v1  ;;  %v4434_v8 = vpack.c.bf16 %v864_v7, %v863_v5  ;;  %v866_v10 = vld [vmem:[#allocation7 + $0x28] sm:$0xff]  ;;  %v867_v12 = vld [vmem:[#allocation7 + $0x30] sm:$0xff]  ;;  %vm714_vm1 = vcmask 1045504  }
  0x6e   : > { %330 = vst [vmem:[#allocation2 + $0x20] sm:$0xff] %v5599_v1  ;;  %331 = vst [vmem:[#allocation2 + $0x28] sm:$0x3] %v5599_v1  ;;  %1069 = vmatprep.mubr.f32.mxu0 %v5843_v2  ;;  %4432 = vmatpush1.bf16.msra.mxu0 %v4431_v6  ;;  %v4437_v11 = vpack.c.bf16 %v866_v10, %v865_v9  ;;  %v868_v13 = vld [vmem:[#allocation7 + $0x38] sm:$0xff]  ;;  %v434_v15 = vld [vmem:[%s5830_s13] sm:$0xff]  ;;  %s7643_s21 = scalar_lea.vmem [#allocation10], %s4159_s22 }
  0x6f   : > { %332 = vst [vmem:[#allocation2 + $0x30] sm:$0xff] %v5599_v1  ;;  %333 = vst [vmem:[#allocation2 + $0x38] sm:$0xff] %v5599_v1  ;;  %4433 = vmatprep.subr.bf16.mxu0 %v7823_v0  ;;  %v4440_v14 = vpack.c.bf16 %v868_v13, %v867_v12  ;;  %v869_v16 = vld [vmem:[#allocation7 + $0x40] sm:$0xff]  ;;  %v870_v17 = vld [vmem:[#allocation7 + $0x48] sm:$0xff]  ;;  %s4173_s23 = sshll.u32 %s5664_s28, 12  ;;  %s4058_s22 = sshll.u32 %s7643_s21, 4  ;;  %s7765_s22 = int_to_ptr.vmem [resolvable:$true] %s4058_s22 }
  0x70   : > { %334 = vst [vmem:[#allocation2 + $0x40] sm:$0x3] %v5599_v1  ;;  %335 = vst [vmem:[#allocation2 + $0x48] sm:$0xff] %v5599_v1  ;;  %v435_v18 = vld [vmem:[%s5830_s13 + $0x8] sm:$0xff]  ;;  %v436_v19 = vld [vmem:[%s5830_s13 + $0x10] sm:$0xff]  ;;  %v4443_v23 = vpack.c.bf16 %v870_v17, %v869_v16  ;;  %s7763_s30 = scalar_lea.hbm %s7818_s7, %s4173_s23  ;;  %s4045_s28 = scalar_lea.sflag [#allocation6], %s5824_s20 }
  0x71   : > { %336 = vst [vmem:[#allocation2 + $0x50] sm:$0xff] %v5599_v1  ;;  %337 = vst [vmem:[#allocation2 + $0x58] sm:$0x3] %v5599_v1  ;;  %v437_v20 = vld [vmem:[%s5830_s13 + $0x18] sm:$0xff]  ;;  %v438_v21 = vld [vmem:[%s5830_s13 + $0x20] sm:$0xff]  ;;  %s5521_s9 = scalar_lea.vmem %s7765_s22, 4096 }
  0x72   : > { %338 = vst [vmem:[#allocation2 + $0x60] sm:$0xff] %v5599_v1  ;;  %339 = vst [vmem:[#allocation2 + $0x68] sm:$0xff] %v5599_v1  ;;  %4435 = vmatpush1.bf16.msra.mxu0 %v4434_v8  ;;  %v439_v22 = vld [vmem:[%s5830_s13 + $0x28] sm:$0xff]  ;;  %v440_v24 = vld [vmem:[%s5830_s13 + $0x30] sm:$0xff]  ;;  %p5522_p11 = scmp.ne.s32.totalorder %s7765_s22, %s5521_s9  ;;  %p8156_p0 = scmp.ne.s32.totalorder %s7973_s16, 0 }
  0x73   : > { %340 = vst [vmem:[#allocation2 + $0x70] sm:$0x3] %v5599_v1  ;;  %341 = vst [vmem:[#allocation2 + $0x78] sm:$0xff] %v5599_v1  ;;  %4436 = vmatprep.subr.bf16.mxu0 %v7823_v0  ;;  %v871_v25 = vld [vmem:[#allocation7 + $0x50] sm:$0xff]  ;;  %v872_v26 = vld [vmem:[#allocation7 + $0x58] sm:$0xff]  ;;  %s5600_s29 = smov [#allocation10]  }
  0x74   : > { %342 = vst [vmem:[#allocation2 + $0x80] sm:$0xff] %v5599_v1  ;;  %343 = vst [vmem:[#allocation2 + $0x88] sm:$0x3] %v5599_v1  ;;  %v441_v27 = vld [vmem:[%s5830_s13 + $0x38] sm:$0xff]  ;;  %v442_v28 = vld [vmem:[%s5830_s13 + $0x40] sm:$0xff]  ;;  %v4446_v32 = vpack.c.bf16 %v872_v26, %v871_v25  ;;  %p5523_p2 = pnand %p5522_p11, %p8156_p0  ;;  %s5525_s11 = sshll.u32 %s5600_s29, 4  ;;  %s5526_s11 = int_to_ptr.vmem [resolvable:$false] %s5525_s11 }
  0x75   : > { %344 = vst [vmem:[#allocation2 + $0x90] sm:$0xff] %v5599_v1  ;;  %345 = vst [vmem:[#allocation2 + $0x98] sm:$0xff] %v5599_v1  ;;  %v443_v29 = vld [vmem:[%s5830_s13 + $0x48] sm:$0xff]  ;;  %v444_v30 = vld [vmem:[%s5830_s13 + $0x50] sm:$0xff]  ;;  %s5527_s10 = scalar_lea.vmem %s5526_s11, 8192  ;;  %p5528_p7 = scmp.lt.s32.totalorder %s7765_s22, %s5526_s11 }
  0x76   : > { %346 = vst [vmem:[#allocation2 + $0xa0] sm:$0x3] %v5599_v1  ;;  %347 = vst [vmem:[#allocation2 + $0xa8] sm:$0xff] %v5599_v1  ;;  %4438 = vmatpush1.bf16.msra.mxu0 %v4437_v11  ;;  %v445_v31 = vld [vmem:[%s5830_s13 + $0x58] sm:$0xff]  ;;  %v873_v33 = vld [vmem:[#allocation7 + $0x60] sm:$0xff]  ;;  %p5524_p3 = pneg %p5523_p2  ;;  %p5529_p9 = scmp.lt.s32.totalorder %s5527_s10, %s5521_s9 }
  0x77   : > { %348 = vst [vmem:[#allocation2 + $0xb0] sm:$0xff] %v5599_v1  ;;  %349 = vst [vmem:[#allocation2 + $0xb8] sm:$0x3] %v5599_v1  ;;  %4439 = vmatprep.subr.bf16.mxu0 %v7823_v0  ;;  %v874_v34 = vld [vmem:[#allocation7 + $0x68] sm:$0xff]  ;;  %v446_v35 = vld [vmem:[%s5830_s13 + $0x60] sm:$0xff] }
  0x78   : > { %350 = vst [vmem:[#allocation2 + $0xc0] sm:$0xff] %v5599_v1  ;;  %351 = vst [vmem:[#allocation2 + $0xc8] sm:$0xff] %v5599_v1  ;;  %v447_v36 = vld [vmem:[%s5830_s13 + $0x68] sm:$0xff]  ;;  %v4449_v37 = vpack.c.bf16 %v874_v34, %v873_v33  ;;  %v875_v38 = vld [vmem:[#allocation7 + $0x70] sm:$0xff]  ;;  %p5530_p12 = por %p5529_p9, %p5528_p7 }
  0x79   : > { %352 = vst [vmem:[#allocation2 + $0xd0] sm:$0x3] %v5599_v1  ;;  %353 = vst [vmem:[#allocation2 + $0xd8] sm:$0xff] %v5599_v1  ;;  %v876_v39 = vld [vmem:[#allocation7 + $0x78] sm:$0xff]  ;;  %v448_v40 = vld [vmem:[%s5830_s13 + $0x70] sm:$0xff] }
  0x7a   : > { %354 = vst [vmem:[#allocation2 + $0xe0] sm:$0xff] %v5599_v1  ;;  %355 = vst [vmem:[#allocation2 + $0xe8] sm:$0x3] %v5599_v1  ;;  %4441 = vmatpush1.bf16.msra.mxu0 %v4440_v14  ;;  %v4452_v41 = vpack.c.bf16 %v876_v39, %v875_v38  ;;  %v449_v42 = vld [vmem:[%s5830_s13 + $0x78] sm:$0xff]  ;;  %v877_v43 = vld [vmem:[#allocation7 + $0x80] sm:$0xff]  ;;  %p5531_p1 = pnand %p5530_p12, %p5524_p3 }
  0x7b   : > { %356 = vst [vmem:[#allocation2 + $0xf0] sm:$0xff] %v5599_v1  ;;  %357 = vst [vmem:[#allocation2 + $0xf8] sm:$0xff] %v5599_v1  ;;  %4442 = vmatprep.subr.bf16.mxu0 %v7823_v0  ;;  %v878_v44 = vld [vmem:[#allocation7 + $0x88] sm:$0xff]  ;;  %v450_v45 = vld [vmem:[%s5830_s13 + $0x80] sm:$0xff] }
  0x7c   : > { %358 = vst [vmem:[#allocation2 + $0x100] sm:$0x3] %v5599_v1  ;;  %359 = vst [vmem:[#allocation2 + $0x108] sm:$0xff] %v5599_v1  ;;  %v451_v46 = vld [vmem:[%s5830_s13 + $0x88] sm:$0xff]  ;;  %v452_v47 = vld [vmem:[%s5830_s13 + $0x90] sm:$0xff]  ;;  %v4455_v48 = vpack.c.bf16 %v878_v44, %v877_v43 }
  0x7d   : > { %360 = vst [vmem:[#allocation2 + $0x110] sm:$0xff] %v5599_v1  ;;  %361 = vst [vmem:[#allocation2 + $0x118] sm:$0x3] %v5599_v1  ;;  %v879_v49 = vld [vmem:[#allocation7 + $0x90] sm:$0xff]  ;;  %v453_v50 = vld [vmem:[%s5830_s13 + $0x98] sm:$0xff] }
  0x7e   : > { %362 = vst [vmem:[#allocation2 + $0x120] sm:$0xff] %v5599_v1  ;;  %363 = vst [vmem:[#allocation2 + $0x128] sm:$0xff] %v5599_v1  ;;  %4444 = vmatpush1.bf16.msra.mxu0 %v4443_v23  ;;  %v880_v51 = vld [vmem:[#allocation7 + $0x98] sm:$0xff]  ;;  %v454_v52 = vld [vmem:[%s5830_s13 + $0xa0] sm:$0xff] }
  0x7f   : > { %364 = vst [vmem:[#allocation2 + $0x130] sm:$0x3] %v5599_v1  ;;  %365 = vst [vmem:[#allocation2 + $0x138] sm:$0xff] %v5599_v1  ;;  %4445 = vmatprep.subr.bf16.mxu0 %v7823_v0  ;;  %v455_v53 = vld [vmem:[%s5830_s13 + $0xa8] sm:$0xff]  ;;  %v456_v54 = vld [vmem:[%s5830_s13 + $0xb0] sm:$0xff]  ;;  %v4458_v56 = vpack.c.bf16 %v880_v51, %v879_v49 }
  0x80   : > { %366 = vst [vmem:[#allocation2 + $0x140] sm:$0xff] %v5599_v1  ;;  %367 = vst [vmem:[#allocation2 + $0x148] sm:$0x3] %v5599_v1  ;;  %v457_v55 = vld [vmem:[%s5830_s13 + $0xb8] sm:$0xff]  ;;  %v458_v57 = vld [vmem:[%s5830_s13 + $0xc0] sm:$0xff] }
  0x81   : > { %368 = vst [vmem:[#allocation2 + $0x150] sm:$0xff] %v5599_v1  ;;  %369 = vst [vmem:[#allocation2 + $0x158] sm:$0xff] %v5599_v1  ;;  %v881_v58 = vld [vmem:[#allocation7 + $0xa0] sm:$0xff]  ;;  %v882_v59 = vld [vmem:[#allocation7 + $0xa8] sm:$0xff] }
  0x82   : > { %370 = vst [vmem:[#allocation2 + $0x160] sm:$0x3] %v5599_v1  ;;  %371 = vst [vmem:[#allocation2 + $0x168] sm:$0xff] %v5599_v1  ;;  %4447 = vmatpush1.bf16.msra.mxu0 %v4446_v32  ;;  %v459_v60 = vld [vmem:[%s5830_s13 + $0xc8] sm:$0xff]  ;;  %v460_v61 = vld [vmem:[%s5830_s13 + $0xd0] sm:$0xff]  ;;  %v4461_v63 = vpack.c.bf16 %v882_v59, %v881_v58 }
  0x83   : > { %372 = vst [vmem:[#allocation2 + $0x170] sm:$0xff] %v5599_v1  ;;  %373 = vst [vmem:[#allocation2 + $0x178] sm:$0x3] %v5599_v1  ;;  %4448 = vmatprep.subr.bf16.mxu0 %v7823_v0  ;;  %v461_v62 = vld [vmem:[%s5830_s13 + $0xd8] sm:$0xff]  ;;  %v883_v3 = vld [vmem:[#allocation7 + $0xb0] sm:$0xff] }
  0x84   : > { %374 = vst [vmem:[#allocation2 + $0x180] sm:$0xff] %v5599_v1  ;;  %375 = vst [vmem:[#allocation2 + $0x188] sm:$0xff] %v5599_v1  ;;  %v884_v4 = vld [vmem:[#allocation7 + $0xb8] sm:$0xff]  ;;  %v885_v6 = vld [vmem:[#allocation7 + $0xc0] sm:$0xff] }
  0x85   : > { %376 = vst [vmem:[#allocation2 + $0x190] sm:$0x3] %v5599_v1  ;;  %379 = vst [vmem:[#allocation2 + $0x1a8] sm:$0x3] %v5599_v1  ;;  %v4464_v5 = vpack.c.bf16 %v884_v4, %v883_v3  ;;  %v886_v7 = vld [vmem:[#allocation7 + $0xc8] sm:$0xff]  ;;  %v462_v8 = vld [vmem:[%s5830_s13 + $0xe0] sm:$0xff] }
  0x86   : > { %382 = vst [vmem:[#allocation3 + $0x10] sm:$0x3] %v5599_v1  ;;  %383 = vst [vmem:[#allocation3 + $0x18] sm:$0xff] %v5599_v1  ;;  %4450 = vmatpush1.bf16.msra.mxu0 %v4449_v37  ;;  %v463_v9 = vld [vmem:[%s5830_s13 + $0xe8] sm:$0xff]  ;;  %v4467_v10 = vpack.c.bf16 %v886_v7, %v885_v6  ;;  %v887_v11 = vld [vmem:[#allocation7 + $0xd0] sm:$0xff] }
  0x87   : > { %384 = vst [vmem:[#allocation3 + $0x20] sm:$0xff] %v5599_v1  ;;  %385 = vst [vmem:[#allocation3 + $0x28] sm:$0x3] %v5599_v1  ;;  %4451 = vmatprep.subr.bf16.mxu0 %v7823_v0  ;;  %v888_v12 = vld [vmem:[#allocation7 + $0xd8] sm:$0xff]  ;;  %v889_v14 = vld [vmem:[#allocation7 + $0xe0] sm:$0xff] }
  0x88   : > { %386 = vst [vmem:[#allocation3 + $0x30] sm:$0xff] %v5599_v1  ;;  %387 = vst [vmem:[#allocation3 + $0x38] sm:$0xff] %v5599_v1  ;;  %v4470_v13 = vpack.c.bf16 %v888_v12, %v887_v11  ;;  %v891_v17 = vld [vmem:[#allocation7 + $0xf0] sm:$0xff]  ;;  %v900_v44 = vld [vmem:[#allocation7 + $0x138] sm:$0xff] }
  0x89   : > { %388 = vst [vmem:[#allocation3 + $0x40] sm:$0x3] %v5599_v1  ;;  %389 = vst [vmem:[#allocation3 + $0x48] sm:$0xff] %v5599_v1  ;;  %v899_v43 = vld [vmem:[#allocation7 + $0x130] sm:$0xff]  ;;  %v902_v49 = vld [vmem:[#allocation7 + $0x148] sm:$0xff] }
  0x8a   : > { %390 = vst [vmem:[#allocation3 + $0x50] sm:$0xff] %v5599_v1  ;;  %391 = vst [vmem:[#allocation3 + $0x58] sm:$0x3] %v5599_v1  ;;  %4453 = vmatpush1.bf16.msra.mxu0 %v4452_v41  ;;  %v903_v58 = vld [vmem:[#allocation7 + $0x150] sm:$0xff]  ;;  %v904_v59 = vld [vmem:[#allocation7 + $0x158] sm:$0xff] }
  0x8b   : > { %392 = vst [vmem:[#allocation3 + $0x60] sm:$0xff] %v5599_v1  ;;  %393 = vst [vmem:[#allocation3 + $0x68] sm:$0xff] %v5599_v1  ;;  %4454 = vmatprep.subr.bf16.mxu0 %v7823_v0  ;;  %v906_v6 = vld [vmem:[#allocation7 + $0x168] sm:$0xff] }
  0x8c   : > { %394 = vst [vmem:[#allocation3 + $0x70] sm:$0x3] %v5599_v1  ;;  %395 = vst [vmem:[#allocation3 + $0x78] sm:$0xff] %v5599_v1 }
  0x8d   : > { %396 = vst [vmem:[#allocation3 + $0x80] sm:$0xff] %v5599_v1  ;;  %397 = vst [vmem:[#allocation3 + $0x88] sm:$0x3] %v5599_v1 }
  0x8e   : > { %398 = vst [vmem:[#allocation3 + $0x90] sm:$0xff] %v5599_v1  ;;  %399 = vst [vmem:[#allocation3 + $0x98] sm:$0xff] %v5599_v1  ;;  %4456 = vmatpush1.bf16.msra.mxu0 %v4455_v48  ;;  %v901_v48 = vld [vmem:[#allocation7 + $0x140] sm:$0xff] }
  0x8f   : > { %400 = vst [vmem:[#allocation3 + $0xa0] sm:$0x3] %v5599_v1  ;;  %401 = vst [vmem:[#allocation3 + $0xa8] sm:$0xff] %v5599_v1  ;;  %4457 = vmatprep.subr.bf16.mxu0 %v7823_v0 }
  0x90   : > { %402 = vst [vmem:[#allocation3 + $0xb0] sm:$0xff] %v5599_v1  ;;  %403 = vst [vmem:[#allocation3 + $0xb8] sm:$0x3] %v5599_v1 }
  0x91   : > { %404 = vst [vmem:[#allocation3 + $0xc0] sm:$0xff] %v5599_v1  ;;  %405 = vst [vmem:[#allocation3 + $0xc8] sm:$0xff] %v5599_v1 }
  0x92   : > { %406 = vst [vmem:[#allocation3 + $0xd0] sm:$0x3] %v5599_v1  ;;  %407 = vst [vmem:[#allocation3 + $0xd8] sm:$0xff] %v5599_v1  ;;  %4459 = vmatpush1.bf16.msra.mxu0 %v4458_v56 }
  0x93   : > { %408 = vst [vmem:[#allocation3 + $0xe0] sm:$0xff] %v5599_v1  ;;  %409 = vst [vmem:[#allocation3 + $0xe8] sm:$0x3] %v5599_v1  ;;  %4460 = vmatprep.subr.bf16.mxu0 %v7823_v0 }
  0x94   : > { %410 = vst [vmem:[#allocation3 + $0xf0] sm:$0xff] %v5599_v1  ;;  %411 = vst [vmem:[#allocation3 + $0xf8] sm:$0xff] %v5599_v1 }
  0x95   : > { %412 = vst [vmem:[#allocation3 + $0x100] sm:$0x3] %v5599_v1  ;;  %413 = vst [vmem:[#allocation3 + $0x108] sm:$0xff] %v5599_v1 }
  0x96   : > { %414 = vst [vmem:[#allocation3 + $0x110] sm:$0xff] %v5599_v1  ;;  %415 = vst [vmem:[#allocation3 + $0x118] sm:$0x3] %v5599_v1  ;;  %4462 = vmatpush1.bf16.msra.mxu0 %v4461_v63 }
  0x97   : > { %416 = vst [vmem:[#allocation3 + $0x120] sm:$0xff] %v5599_v1  ;;  %417 = vst [vmem:[#allocation3 + $0x128] sm:$0xff] %v5599_v1  ;;  %4463 = vmatprep.subr.bf16.mxu0 %v7823_v0 }
  0x98   : > { %418 = vst [vmem:[#allocation3 + $0x130] sm:$0x3] %v5599_v1  ;;  %419 = vst [vmem:[#allocation3 + $0x138] sm:$0xff] %v5599_v1 }
  0x99   : > { %420 = vst [vmem:[#allocation3 + $0x140] sm:$0xff] %v5599_v1  ;;  %421 = vst [vmem:[#allocation3 + $0x148] sm:$0x3] %v5599_v1 }
  0x9a   : > { %422 = vst [vmem:[#allocation3 + $0x150] sm:$0xff] %v5599_v1  ;;  %423 = vst [vmem:[#allocation3 + $0x158] sm:$0xff] %v5599_v1  ;;  %4465 = vmatpush1.bf16.msra.mxu0 %v4464_v5  ;;  %v905_v5 = vld [vmem:[#allocation7 + $0x160] sm:$0xff] }
  0x9b   : > { %424 = vst [vmem:[#allocation3 + $0x160] sm:$0x3] %v5599_v1  ;;  %425 = vst [vmem:[#allocation3 + $0x168] sm:$0xff] %v5599_v1  ;;  %4466 = vmatprep.subr.bf16.mxu0 %v7823_v0 }
  0x9c   : > { %426 = vst [vmem:[#allocation3 + $0x170] sm:$0xff] %v5599_v1  ;;  %427 = vst [vmem:[#allocation3 + $0x178] sm:$0x3] %v5599_v1 }
  0x9d   : > { %428 = vst [vmem:[#allocation3 + $0x180] sm:$0xff] %v5599_v1  ;;  %429 = vst [vmem:[#allocation3 + $0x188] sm:$0xff] %v5599_v1 }
  0x9e   : > { %430 = vst [vmem:[#allocation3 + $0x190] sm:$0x3] %v5599_v1  ;;  %433 = vst [vmem:[#allocation3 + $0x1a8] sm:$0x3] %v5599_v1  ;;  %4468 = vmatpush1.bf16.msra.mxu0 %v4467_v10  ;;  %v4497_v10 = vpack.c.bf16 %v906_v6, %v905_v5 }
  0x9f   : > { %467 = vst [vmem:[#allocation2 + $0x19] sm:$0xff] %v434_v15  ;;  %468 = vst [vmem:[#allocation2 + $0x21] sm:$0xff] %v435_v18  ;;  %4469 = vmatprep.subr.bf16.mxu0 %v7823_v0  ;;  %v890_v15 = vld [vmem:[#allocation7 + $0xe8] sm:$0xff]  ;;  %v892_v18 = vld [vmem:[#allocation7 + $0xf8] sm:$0xff] }
  0xa0   : > { %469 = vst [vmem:[#allocation2 + $0x31] sm:$0xff] %v436_v19  ;;  %470 = vst [vmem:[#allocation2 + $0x39] sm:$0xff] %v437_v20  ;;  %v4473_v16 = vpack.c.bf16 %v890_v15, %v889_v14  ;;  %v5990_v19 = vld [vmem:[#allocation2 + $0x10] sm:$0x3]  ;;  %v4476_v20 = vpack.c.bf16 %v892_v18, %v891_v17  ;;  %v908_v15 = vld [vmem:[#allocation7 + $0x178] sm:$0xff] }
  0xa1   : > { %471 = vst [vmem:[#allocation2 + $0x49] sm:$0xff] %v438_v21  ;;  %472 = vst [vmem:[#allocation2 + $0x51] sm:$0xff] %v439_v22  ;;  %v893_v21 = vld [vmem:[#allocation7 + $0x100] sm:$0xff]  ;;  %v894_v22 = vld [vmem:[#allocation7 + $0x108] sm:$0xff]  ;;  %v605_v23 = vrot.slane %v5990_v19, 1 }
  0xa2   : > { %473 = vst [vmem:[#allocation2 + $0x61] sm:$0xff] %v440_v24  ;;  %474 = vst [vmem:[#allocation2 + $0x69] sm:$0xff] %v441_v27  ;;  %4471 = vmatpush1.bf16.msra.mxu0 %v4470_v13  ;;  %v4479_v26 = vpack.c.bf16 %v894_v22, %v893_v21  ;;  %v907_v14 = vld [vmem:[#allocation7 + $0x170] sm:$0xff]  ;;  %v909_v21 = vld [vmem:[#allocation7 + $0x180] sm:$0xff] }
  0xa3   : > { %475 = vst [vmem:[#allocation2 + $0x79] sm:$0xff] %v442_v28  ;;  %476 = vst [vmem:[#allocation2 + $0x81] sm:$0xff] %v443_v29  ;;  %4472 = vmatprep.subr.bf16.mxu0 %v7823_v0  ;;  %v606_v27 = vsel %vm601_vm0, %v5843_v2, %v605_v23  ;;  %v4500_v17 = vpack.c.bf16 %v908_v15, %v907_v14  ;;  %v910_v22 = vld [vmem:[#allocation7 + $0x188] sm:$0xff] }
  0xa4   : > { %477 = vst [vmem:[#allocation2 + $0x91] sm:$0xff] %v444_v30  ;;  %478 = vst [vmem:[#allocation2 + $0x99] sm:$0xff] %v445_v31  ;;  %v895_v30 = vld [vmem:[#allocation7 + $0x110] sm:$0xff]  ;;  %v896_v31 = vld [vmem:[#allocation7 + $0x118] sm:$0xff] }
  0xa5   : > { %479 = vst [vmem:[#allocation2 + $0xa9] sm:$0xff] %v446_v35  ;;  %480 = vst [vmem:[#allocation2 + $0xb1] sm:$0xff] %v447_v36  ;;  %v4482_v33 = vpack.c.bf16 %v896_v31, %v895_v30  ;;  %v897_v35 = vld [vmem:[#allocation7 + $0x120] sm:$0xff]  ;;  %v898_v36 = vld [vmem:[#allocation7 + $0x128] sm:$0xff] }
  0xa6   : > { %481 = vst [vmem:[#allocation2 + $0xc1] sm:$0xff] %v448_v40  ;;  %482 = vst [vmem:[#allocation2 + $0xc9] sm:$0xff] %v449_v42  ;;  %4474 = vmatpush1.bf16.msra.mxu0 %v4473_v16  ;;  %v5994_v24 = vld [vmem:[#allocation2 + $0x18] sm:$0xff]  ;;  %v5996_v25 = vld [vmem:[#allocation2 + $0x20] sm:$0xff]  ;;  %v4485_v39 = vpack.c.bf16 %v898_v36, %v897_v35 }
  0xa7   : > { %483 = vst [vmem:[#allocation2 + $0xd9] sm:$0xff] %v450_v45  ;;  %484 = vst [vmem:[#allocation2 + $0xe1] sm:$0xff] %v451_v46  ;;  %4475 = vmatprep.subr.bf16.mxu0 %v7823_v0  ;;  %v607_v28 = vrot.slane %v5994_v24, 1  ;;  %v608_v29 = vrot.slane %v5996_v25, 1  ;;  %v6003_v32 = vld [vmem:[#allocation2 + $0x28] sm:$0x3] }
  0xa8   : > { %485 = vst [vmem:[#allocation2 + $0xf1] sm:$0xff] %v452_v47  ;;  %486 = vst [vmem:[#allocation2 + $0xf9] sm:$0xff] %v453_v50  ;;  %v610_v2 = vrot.slane %v6003_v32, 1  ;;  %v6011_v37 = vld [vmem:[#allocation2 + $0x30] sm:$0xff]  ;;  %v6013_v38 = vld [vmem:[#allocation2 + $0x38] sm:$0xff] }
  0xa9   : > { %487 = vst [vmem:[#allocation2 + $0x109] sm:$0xff] %v454_v52  ;;  %488 = vst [vmem:[#allocation2 + $0x111] sm:$0xff] %v455_v53  ;;  %v6007_v34 = vsel %vm601_vm0, %v607_v28, %v608_v29  ;;  %v612_v41 = vrot.slane %v6011_v37, 1  ;;  %v613_v42 = vrot.slane %v6013_v38, 1  ;;  %v507_v45 = vld [vmem:[#allocation2 + $0x40] sm:$0x3]  ;;  %v4491_v52 = vpack.c.bf16 %v902_v49, %v901_v48 }
  0xaa   : > { %489 = vst [vmem:[#allocation2 + $0x121] sm:$0xff] %v456_v54  ;;  %490 = vst [vmem:[#allocation2 + $0x129] sm:$0xff] %v457_v55  ;;  %4477 = vmatpush1.bf16.msra.mxu0 %v4476_v20  ;;  %v6018_v40 = vsel %vm601_vm0, %v608_v29, %v610_v2  ;;  %v615_v47 = vrot.slane %v507_v45, 1  ;;  %v6029_v50 = vld [vmem:[#allocation2 + $0x48] sm:$0xff]  ;;  %v6031_v51 = vld [vmem:[#allocation2 + $0x50] sm:$0xff]  ;;  %v725_v53 = vrot.slane %v6011_v37, 2 }
  0xab   : > { %491 = vst [vmem:[#allocation2 + $0x139] sm:$0xff] %v458_v57  ;;  %492 = vst [vmem:[#allocation2 + $0x141] sm:$0xff] %v459_v60  ;;  %4478 = vmatprep.subr.bf16.mxu0 %v7823_v0  ;;  %v6026_v46 = vsel %vm601_vm0, %v612_v41, %v613_v42  ;;  %v726_v54 = vrot.slane %v6013_v38, 2  ;;  %v617_v56 = vrot.slane %v6029_v50, 1  ;;  %v618_v57 = vrot.slane %v6031_v51, 1  ;;  %v6056_v7 = vld [vmem:[#allocation2 + $0x60] sm:$0xff] }
  0xac   : > { %493 = vst [vmem:[#allocation2 + $0x151] sm:$0xff] %v460_v61  ;;  %494 = vst [vmem:[#allocation2 + $0x159] sm:$0xff] %v461_v62  ;;  %v6038_v55 = vsel %vm601_vm0, %v613_v42, %v615_v47  ;;  %v6043_v60 = vld [vmem:[#allocation2 + $0x58] sm:$0x3]  ;;  %v4494_v62 = vpack.c.bf16 %v904_v59, %v903_v58  ;;  %v728_v63 = vrot.slane %v507_v45, 2  ;;  %v622_v12 = vrot.slane %v6056_v7, 1 }
  0xad   : > { %495 = vst [vmem:[#allocation2 + $0x169] sm:$0xff] %v462_v8  ;;  %496 = vst [vmem:[#allocation2 + $0x171] sm:$0xff] %v463_v9  ;;  %1070 = vmatmul.mubr.f32.vlgmr.msra.gmra.mrb[0].mxu0 %v5599_v1  ;;  %v6046_v61 = vsel %vm714_vm1, %v725_v53, %v726_v54  ;;  %v6052_v3 = vsel %vm601_vm0, %v617_v56, %v618_v57  ;;  %v620_v4 = vrot.slane %v6043_v60, 1  ;;  %v6058_v8 = vld [vmem:[#allocation2 + $0x68] sm:$0xff]  ;;  %v6071_v16 = vld [vmem:[#allocation2 + $0x70] sm:$0x3] }
  0xae   : > { %4480 = vmatpush1.bf16.msra.mxu0 %v4479_v26  ;;  %1074 = vmatprep.mubr.f32.mxu0 %v606_v27  ;;  %7979 = vst [vmem:[#allocation14_spill] sm:$0xff] %v6052_v3  ;;  %v6061_v9 = vsel %vm714_vm1, %v726_v54, %v728_v63  ;;  %v623_v13 = vrot.slane %v6058_v8, 1  ;;  %v625_v20 = vrot.slane %v6071_v16, 1  ;;  %v6080_v23 = vld [vmem:[#allocation2 + $0x78] sm:$0xff]  ;;  %v6082_v26 = vld [vmem:[#allocation2 + $0x80] sm:$0xff]  ;;  %v4503_v27 = vpack.c.bf16 %v910_v22, %v909_v21  ;;  %v911_v31 = vld [vmem:[#allocation7 + $0x190] sm:$0xff] }
  0xaf   : > { %4481 = vmatprep.subr.bf16.mxu0 %v7823_v0  ;;  %4302 = vmatprep.mubr.f32.mxu1 %v6046_v61  ;;  %v6066_v11 = vsel %vm601_vm0, %v618_v57, %v620_v4  ;;  %v627_v29 = vrot.slane %v6080_v23, 1  ;;  %v628_v30 = vrot.slane %v6082_v26, 1  ;;  %v6092_v2 = vld [vmem:[#allocation2 + $0x88] sm:$0x3]  ;;  %v913_v41 = vld [vmem:[#allocation7 + $0x1a0] sm:$0xff]  ;;  %v915_v49 = vld [vmem:[#allocation7 + $0x1b0] sm:$0xff] }
  0xb0   : > { %7980 = vst [vmem:[#allocation15_spill] sm:$0xff] %v6066_v11  ;;  %v6076_v18 = vsel %vm601_vm0, %v622_v12, %v623_v13  ;;  %v6087_v28 = vsel %vm601_vm0, %v623_v13, %v625_v20  ;;  %v914_v42 = vld [vmem:[#allocation7 + $0x1a8] sm:$0xff]  ;;  %v6113_v53 = vld [vmem:[#allocation2 + $0xa0] sm:$0x3]  ;;  %v6124_v63 = vld [vmem:[#allocation2 + $0xb0] sm:$0xff] }
  0xb1   : > { %1075 = vmatmul.mubr.f32.gmra.mrb[2].mxu0 %v5599_v1  ;;  %v4488_v1 = vpack.c.bf16 %v900_v44, %v899_v43  ;;  %7981 = vst [vmem:[#allocation16_spill] sm:$0xff] %v6076_v18  ;;  %7982 = vst [vmem:[#allocation17_spill] sm:$0xff] %v6087_v28  ;;  %v6097_v36 = vsel %vm601_vm0, %v627_v29, %v628_v30  ;;  %v6101_v43 = vld [vmem:[#allocation2 + $0x90] sm:$0xff]  ;;  %v6103_v44 = vld [vmem:[#allocation2 + $0x98] sm:$0xff]  ;;  %v4509_v45 = vpack.c.bf16 %v914_v42, %v913_v41 }
  0xb2   : > { %1079 = vmatprep.mubr.f32.mxu0 %v6007_v34  ;;  %4483 = vmatpush1.bf16.msra.mxu0 %v4482_v33  ;;  %v912_v33 = vld [vmem:[#allocation7 + $0x198] sm:$0xff]  ;;  %7983 = vst [vmem:[#allocation18_spill] sm:$0xff] %v6097_v36  ;;  %v632_v47 = vrot.slane %v6101_v43, 1  ;;  %v633_v48 = vrot.slane %v6103_v44, 1  ;;  %v635_v57 = vrot.slane %v6113_v53, 1  ;;  %v917_v58 = vld [vmem:[#allocation7 + $0x1c0] sm:$0xff] }
  0xb3   : > { %4484 = vmatprep.subr.bf16.mxu0 %v7823_v0  ;;  %v4506_v35 = vpack.c.bf16 %v912_v33, %v911_v31  ;;  %v918_v59 = vld [vmem:[#allocation7 + $0x1c8] sm:$0xff]  ;;  %v919_v12 = vld [vmem:[#allocation7 + $0x1d0] sm:$0xff]  ;;  %v920_v13 = vld [vmem:[#allocation7 + $0x1d8] sm:$0xff] }
  0xb4   : > { %v6118_v56 = vsel %vm601_vm0, %v632_v47, %v633_v48  ;;  %v4515_v4 = vpack.c.bf16 %v918_v59, %v917_v58  ;;  %v6129_v5 = vsel %vm601_vm0, %v633_v48, %v635_v57  ;;  %v6134_v14 = vld [vmem:[#allocation2 + $0xb8] sm:$0x3]  ;;  %v4518_v15 = vpack.c.bf16 %v920_v13, %v919_v12  ;;  %v921_v21 = vld [vmem:[#allocation7 + $0x1e0] sm:$0xff]  ;;  %v922_v22 = vld [vmem:[#allocation7 + $0x1e8] sm:$0xff] }
  0xb5   : > { %1080 = vmatmul.mubr.f32.gmra.mrb[4].mxu0 %v5994_v24  ;;  %7985 = vst [vmem:[#allocation20_spill] sm:$0xff] %v6118_v56  ;;  %7986 = vst [vmem:[#allocation21_spill] sm:$0xff] %v6129_v5  ;;  %v640_v20 = vrot.slane %v6134_v14, 1  ;;  %v6145_v29 = vld [vmem:[#allocation2 + $0xc8] sm:$0xff]  ;;  %v924_v41 = vld [vmem:[#allocation7 + $0x1f8] sm:$0xff] }
  0xb6   : > { %1084 = vmatprep.mubr.f32.mxu0 %v6018_v40  ;;  %4486 = vmatpush1.bf16.msra.mxu0 %v4485_v39  ;;  %v630_v39 = vrot.slane %v6092_v2, 1  ;;  %v6155_v42 = vld [vmem:[#allocation2 + $0xd0] sm:$0x3]  ;;  %v6176_v59 = vld [vmem:[#allocation2 + $0xe8] sm:$0x3]  ;;  %v6186_v12 = vld [vmem:[#allocation2 + $0xf8] sm:$0xff] }
  0xb7   : > { %4487 = vmatprep.subr.bf16.mxu0 %v7823_v0  ;;  %v645_v48 = vrot.slane %v6155_v42, 1 }
  0xb9   : > { %1085 = vmatmul.mubr.f32.gmra.mrb[6].mxu0 %v5996_v25 }
  0xba   : > { %1089 = vmatprep.mubr.f32.mxu0 %v6026_v46  ;;  %4489 = vmatpush1.bf16.msra.mxu0 %v4488_v1  ;;  %v6108_v1 = vsel %vm601_vm0, %v628_v30, %v630_v39  ;;  %v4521_v30 = vpack.c.bf16 %v922_v22, %v921_v21  ;;  %v923_v39 = vld [vmem:[#allocation7 + $0x1f0] sm:$0xff]  ;;  %v6195_v21 = vld [vmem:[#allocation2 + $0x100] sm:$0x3] }
  0xbb   : > { %4490 = vmatprep.subr.bf16.mxu0 %v7823_v0  ;;  %7984 = vst [vmem:[#allocation19_spill] sm:$0xff] %v6108_v1 }
  0xbd   : > { %1090 = vmatmul.mubr.f32.gmra.mrb[8].mxu0 %v6011_v37 }
  0xbe   : > { %1094 = vmatprep.mubr.f32.mxu0 %v6038_v55  ;;  %4492 = vmatpush1.bf16.msra.mxu0 %v4491_v52  ;;  %v916_v52 = vld [vmem:[#allocation7 + $0x1b8] sm:$0xff] }
  0xbf   : > { %4493 = vmatprep.subr.bf16.mxu0 %v7823_v0  ;;  %v4512_v54 = vpack.c.bf16 %v916_v52, %v915_v49  ;;  %v6164_v49 = vld [vmem:[#allocation2 + $0xd8] sm:$0xff]  ;;  %v6166_v52 = vld [vmem:[#allocation2 + $0xe0] sm:$0xff] }
  0xc0   : > { %v647_v57 = vrot.slane %v6164_v49, 1  ;;  %v648_v58 = vrot.slane %v6166_v52, 1 }
  0xc1   : > { %1095 = vmatmul.mubr.f32.gmra.mrb[10].mxu0 %v6013_v38 }
  0xc2   : > { %1099 = vmatprep.mubr.f32.mxu0 %v6052_v3  ;;  %4495 = vmatpush1.bf16.msra.mxu0 %v4494_v62  ;;  %v6122_v62 = vld [vmem:[#allocation2 + $0xa8] sm:$0xff] }
  0xc3   : > { %4496 = vmatprep.subr.bf16.mxu0 %v7823_v0  ;;  %v637_v6 = vrot.slane %v6122_v62, 1 }
  0xc5   : > { %1100 = vmatmul.mubr.f32.gmra.mrb[12].mxu0 %v6029_v50 }
  0xc6   : > { %1104 = vmatprep.mubr.f32.mxu0 %v6066_v11  ;;  %4498 = vmatpush1.bf16.msra.mxu0 %v4497_v10  ;;  %v638_v10 = vrot.slane %v6124_v63, 1  ;;  %v8006_v11 = vmov 0.0|0.0  }
  0xc7   : > { %4499 = vmatprep.subr.bf16.mxu0 %v7823_v0 }
  0xc8   : > { %v6150_v31 = vsel %vm601_vm0, %v638_v10, %v640_v20  ;;  %v653_v20 = vrot.slane %v6186_v12, 1 }
  0xc9   : > { %1105 = vmatmul.mubr.f32.gmra.mrb[14].mxu0 %v6031_v51  ;;  %7988 = vst [vmem:[#allocation23_spill] sm:$0xff] %v6150_v31 }
  0xca   : > { %1109 = vmatprep.mubr.f32.mxu0 %v6076_v18  ;;  %4501 = vmatpush1.bf16.msra.mxu0 %v4500_v17  ;;  %v6139_v17 = vsel %vm601_vm0, %v637_v6, %v638_v10  ;;  %v650_v6 = vrot.slane %v6176_v59, 1  ;;  %v6184_v10 = vld [vmem:[#allocation2 + $0xf0] sm:$0xff] }
  0xcb   : > { %4502 = vmatprep.subr.bf16.mxu0 %v7823_v0  ;;  %7987 = vst [vmem:[#allocation22_spill] sm:$0xff] %v6139_v17 }
  0xcc   : > { %v6191_v13 = vsel %vm601_vm0, %v648_v58, %v650_v6  ;;  %v6222_v6 = vld [vmem:[#allocation2 + $0x120] sm:$0xff] }
  0xcd   : > { %1110 = vmatmul.mubr.f32.gmra.mrb[16].mxu0 %v6056_v7  ;;  %7992 = vst [vmem:[#allocation27_spill] sm:$0xff] %v6191_v13 }
  0xce   : > { %1114 = vmatprep.mubr.f32.mxu0 %v6087_v28  ;;  %4504 = vmatpush1.bf16.msra.mxu0 %v4503_v27  ;;  %v6143_v27 = vld [vmem:[#allocation2 + $0xc0] sm:$0xff]  ;;  %v721_v28 = vrot.slane %v5996_v25, 2 }
  0xcf   : > { %4505 = vmatprep.subr.bf16.mxu0 %v7823_v0  ;;  %v642_v33 = vrot.slane %v6143_v27, 1 }
  0xd1   : > { %1115 = vmatmul.mubr.f32.gmra.mrb[18].mxu0 %v6058_v8 }
  0xd2   : > { %1119 = vmatprep.mubr.f32.mxu0 %v6097_v36  ;;  %4507 = vmatpush1.bf16.msra.mxu0 %v4506_v35  ;;  %v643_v35 = vrot.slane %v6145_v29, 1  ;;  %v465_v36 = vld [vmem:[%s5830_s13 + $0xf8] sm:$0xff] }
  0xd3   : > { %4508 = vmatprep.subr.bf16.mxu0 %v7823_v0  ;;  %498 = vst [vmem:[#allocation2 + $0x189] sm:$0xff] %v465_v36 }
  0xd4   : > { %v6160_v47 = vsel %vm601_vm0, %v642_v33, %v643_v35  ;;  %v6203_v33 = vld [vmem:[#allocation2 + $0x108] sm:$0xff] }
  0xd5   : > { %1120 = vmatmul.mubr.f32.gmra.mrb[20].mxu0 %v6080_v23  ;;  %7989 = vst [vmem:[#allocation24_spill] sm:$0xff] %v6160_v47 }
  0xd6   : > { %1124 = vmatprep.mubr.f32.mxu0 %v6108_v1  ;;  %4510 = vmatpush1.bf16.msra.mxu0 %v4509_v45  ;;  %v4524_v45 = vpack.c.bf16 %v924_v41, %v923_v39  ;;  %v657_v41 = vrot.slane %v6203_v33, 1 }
  0xd7   : > { %4511 = vmatprep.subr.bf16.mxu0 %v7823_v0 }
  0xd9   : > { %1125 = vmatmul.mubr.f32.gmra.mrb[22].mxu0 %v6082_v26 }
  0xda   : > { %1129 = vmatprep.mubr.f32.mxu0 %v6118_v56  ;;  %4513 = vmatpush1.bf16.msra.mxu0 %v4512_v54  ;;  %v6171_v54 = vsel %vm601_vm0, %v643_v35, %v645_v48  ;;  %v6205_v35 = vld [vmem:[#allocation2 + $0x110] sm:$0xff]  ;;  %v6214_v48 = vld [vmem:[#allocation2 + $0x118] sm:$0x3] }
  0xdb   : > { %4514 = vmatprep.subr.bf16.mxu0 %v7823_v0  ;;  %7990 = vst [vmem:[#allocation25_spill] sm:$0xff] %v6171_v54  ;;  %v6291_v56 = vld [vmem:[#allocation2 + $0x178] sm:$0x3] }
  0xdd   : > { %1130 = vmatmul.mubr.f32.gmra.mrb[24].mxu0 %v6101_v43 }
  0xde   : > { %1134 = vmatprep.mubr.f32.mxu0 %v6129_v5  ;;  %4516 = vmatpush1.bf16.msra.mxu0 %v4515_v4  ;;  %v6181_v4 = vsel %vm601_vm0, %v647_v57, %v648_v58  ;;  %v660_v58 = vrot.slane %v6214_v48, 1 }
  0xdf   : > { %4517 = vmatprep.subr.bf16.mxu0 %v7823_v0  ;;  %7991 = vst [vmem:[#allocation26_spill] sm:$0xff] %v6181_v4 }
  0xe1   : > { %1135 = vmatmul.mubr.f32.gmra.mrb[26].mxu0 %v6103_v44 }
  0xe2   : > { %1139 = vmatprep.mubr.f32.mxu0 %v6139_v17  ;;  %4519 = vmatpush1.bf16.msra.mxu0 %v4518_v15  ;;  %v652_v15 = vrot.slane %v6184_v10, 1  ;;  %v6279_v17 = vld [vmem:[#allocation2 + $0x168] sm:$0xff] }
  0xe3   : > { %4520 = vmatprep.subr.bf16.mxu0 %v7823_v0  ;;  %v677_v5 = vrot.slane %v6279_v17, 1 }
  0xe4   : > { %v6200_v22 = vsel %vm601_vm0, %v652_v15, %v653_v20  ;;  %v6224_v15 = vld [vmem:[#allocation2 + $0x128] sm:$0xff] }
  0xe5   : > { %1140 = vmatmul.mubr.f32.gmra.mrb[28].mxu0 %v6122_v62  ;;  %7993 = vst [vmem:[#allocation28_spill] sm:$0xff] %v6200_v22 }
  0xe6   : > { %1144 = vmatprep.mubr.f32.mxu0 %v6150_v31  ;;  %4522 = vmatpush1.bf16.msra.mxu0 %v4521_v30  ;;  %v655_v30 = vrot.slane %v6195_v21, 1 }
  0xe7   : > { %4523 = vmatprep.subr.bf16.mxu0 %v7823_v0 }
  0xe8   : > { %v6210_v39 = vsel %vm601_vm0, %v653_v20, %v655_v30  ;;  %v662_v30 = vrot.slane %v6222_v6, 1 }
  0xe9   : > { %1145 = vmatmul.mubr.f32.gmra.mrb[30].mxu0 %v6124_v63  ;;  %7994 = vst [vmem:[#allocation29_spill] sm:$0xff] %v6210_v39 }
  0xea   : > { %1149 = vmatprep.mubr.f32.mxu0 %v6160_v47  ;;  %4525 = vmatpush1.bf16.msra.mxu0 %v4524_v45  ;;  %v658_v45 = vrot.slane %v6205_v35, 1  ;;  %v6260_v47 = vld [vmem:[#allocation2 + $0x150] sm:$0xff] }
  0xeb   : > { %4526 = vmatprep.subr.bf16.mxu0 %v7823_v0  ;;  %v663_v0 = vrot.slane %v6224_v15, 1 }
  0xec   : > { %v6219_v57 = vsel %vm601_vm0, %v657_v41, %v658_v45  ;;  %v6229_v20 = vsel %vm601_vm0, %v658_v45, %v660_v58 }
  0xed   : > { %1150 = vmatmul.mubr.f32.gmra.mrb[32].mxu0 %v6143_v27  ;;  %7995 = vst [vmem:[#allocation30_spill] sm:$0xff] %v6219_v57  ;;  %7996 = vst [vmem:[#allocation31_spill] sm:$0xff] %v6229_v20  ;;  %v6238_v41 = vsel %vm601_vm0, %v662_v30, %v663_v0 }
  0xee   : > { %1154 = vmatprep.mubr.f32.mxu0 %v6171_v54  ;;  %7997 = vst [vmem:[#allocation32_spill] sm:$0xff] %v6238_v41 }
  0xf1   : > { %1155 = vmatmul.mubr.f32.gmra.mrb[34].mxu0 %v6145_v29 }
  0xf2   : > { %1159 = vmatprep.mubr.f32.mxu0 %v6181_v4  ;;  %v6252_v4 = vld [vmem:[#allocation2 + $0x148] sm:$0x3] }
  0xf3   : > { %v670_v54 = vrot.slane %v6252_v4, 1 }
  0xf5   : > { %1160 = vmatmul.mubr.f32.gmra.mrb[36].mxu0 %v6164_v49 }
  0xf6   : > { %1164 = vmatprep.mubr.f32.mxu0 %v6191_v13  ;;  %v6241_v13 = vld [vmem:[#allocation2 + $0x138] sm:$0xff] }
  0xf7   : > { %v667_v58 = vrot.slane %v6241_v13, 1 }
  0xf9   : > { %1165 = vmatmul.mubr.f32.gmra.mrb[38].mxu0 %v6166_v52 }
  0xfa   : > { %1169 = vmatprep.mubr.f32.mxu0 %v6200_v22 }
  0xfd   : > { %1170 = vmatmul.mubr.f32.gmra.mrb[40].mxu0 %v6184_v10 }
  0xfe   : > { %1174 = vmatprep.mubr.f32.mxu0 %v6210_v39  ;;  %v6233_v39 = vld [vmem:[#allocation2 + $0x130] sm:$0x3] }
  0xff   : > { %v665_v22 = vrot.slane %v6233_v39, 1 }
 0x101   : > { %1175 = vmatmul.mubr.f32.gmra.mrb[42].mxu0 %v6186_v12  ;;  %v6248_v45 = vsel %vm601_vm0, %v663_v0, %v665_v22  ;;  %v672_v22 = vrot.slane %v6260_v47, 1 }
 0x102   : > { %1179 = vmatprep.mubr.f32.mxu0 %v6219_v57  ;;  %v6243_v57 = vld [vmem:[#allocation2 + $0x140] sm:$0xff]  ;;  %7998 = vst [vmem:[#allocation33_spill] sm:$0xff] %v6248_v45 }
 0x105   : > { %1180 = vmatmul.mubr.f32.gmra.mrb[44].mxu0 %v6203_v33 }
 0x106   : > { %1184 = vmatprep.mubr.f32.mxu0 %v6229_v20  ;;  %v668_v20 = vrot.slane %v6243_v57, 1 }
 0x108   : > { %v6257_v30 = vsel %vm601_vm0, %v667_v58, %v668_v20  ;;  %v6267_v0 = vsel %vm601_vm0, %v668_v20, %v670_v54  ;;  %v6271_v58 = vld [vmem:[#allocation2 + $0x160] sm:$0x3]  ;;  %v6281_v54 = vld [vmem:[#allocation2 + $0x170] sm:$0xff] }
 0x109   : > { %1185 = vmatmul.mubr.f32.gmra.mrb[46].mxu0 %v6205_v35  ;;  %7999 = vst [vmem:[#allocation34_spill] sm:$0xff] %v6257_v30  ;;  %8000 = vst [vmem:[#allocation35_spill] sm:$0xff] %v6267_v0 }
 0x10a   : > { %1189 = vmatprep.mubr.f32.mxu0 %v6238_v41  ;;  %v6262_v41 = vld [vmem:[#allocation2 + $0x158] sm:$0xff] }
 0x10d   : > { %1190 = vmatmul.mubr.f32.gmra.mrb[48].mxu0 %v6222_v6 }
 0x10e   : > { %1194 = vmatprep.mubr.f32.mxu0 %v6248_v45  ;;  %v673_v45 = vrot.slane %v6262_v41, 1 }
 0x110   : > { %v6276_v31 = vsel %vm601_vm0, %v672_v22, %v673_v45  ;;  %v464_v22 = vld [vmem:[%s5830_s13 + $0xf0] sm:$0xff] }
 0x111   : > { %1195 = vmatmul.mubr.f32.gmra.mrb[50].mxu0 %v6224_v15  ;;  %8001 = vst [vmem:[#allocation36_spill] sm:$0xff] %v6276_v31  ;;  %497 = vst [vmem:[#allocation2 + $0x181] sm:$0xff] %v464_v22 }
 0x112   : > { %1199 = vmatprep.mubr.f32.mxu0 %v6257_v30  ;;  %v675_v30 = vrot.slane %v6271_v58, 1 }
 0x114   : > { %v6286_v20 = vsel %vm601_vm0, %v673_v45, %v675_v30  ;;  %v6306_v30 = vld [vmem:[#allocation2] sm:$0xff] }
 0x115   : > { %1200 = vmatmul.mubr.f32.gmra.mrb[52].mxu0 %v6241_v13  ;;  %8002 = vst [vmem:[#allocation37_spill] sm:$0xff] %v6286_v20  ;;  %8005 = vst [vmem:[#allocation40_spill] sm:$0xff] %v6306_v30  ;;  %v6309_v22 = vrot.slane %v6306_v30, 2 }
 0x116   : > { %1204 = vmatprep.mubr.f32.mxu0 %v6267_v0  ;;  %v678_v0 = vrot.slane %v6281_v54, 1 }
 0x118   : > { %v6296_v1 = vsel %vm601_vm0, %v677_v5, %v678_v0  ;;  %v925_v5 = vld [vmem:[#allocation7 + $0x200] sm:$0xff] }
 0x119   : > { %1205 = vmatmul.mubr.f32.gmra.mrb[54].mxu0 %v6243_v57  ;;  %8003 = vst [vmem:[#allocation38_spill] sm:$0xff] %v6296_v1 }
 0x11a   : > { %1209 = vmatprep.mubr.f32.mxu0 %v6276_v31  ;;  %v680_v31 = vrot.slane %v6291_v56, 1 }
 0x11c   : > { %v6303_v45 = vsel %vm601_vm0, %v678_v0, %v680_v31  ;;  %v927_v31 = vld [vmem:[#allocation7 + $0x210] sm:$0xff]  ;;  %v928_v0 = vld [vmem:[#allocation7 + $0x218] sm:$0xff] }
 0x11d   : > { %1210 = vmatmul.mubr.f32.gmra.mrb[56].mxu0 %v6260_v47  ;;  %8004 = vst [vmem:[#allocation39_spill] sm:$0xff] %v6303_v45  ;;  %v4530_v18 = vpack.c.bf16 %v928_v0, %v927_v31  ;;  %v936_v31 = vld [vmem:[#allocation7 + $0x258] sm:$0xff]  ;;  %v937_v0 = vld [vmem:[#allocation7 + $0x260] sm:$0xff] }
 0x11e   : > { %1214 = vmatprep.mubr.f32.mxu0 %v6286_v20  ;;  %v926_v20 = vld [vmem:[#allocation7 + $0x208] sm:$0xff] }
 0x11f   : > { %v4527_v36 = vpack.c.bf16 %v926_v20, %v925_v5  ;;  %v929_v20 = vld [vmem:[#allocation7 + $0x220] sm:$0xff]  ;;  %v930_v5 = vld [vmem:[#allocation7 + $0x228] sm:$0xff] }
 0x120   : > { %v4533_v3 = vpack.c.bf16 %v930_v5, %v929_v20  ;;  %v938_v20 = vld [vmem:[#allocation7 + $0x268] sm:$0xff] }
 0x121   : > { %1215 = vmatmul.mubr.f32.gmra.mrb[58].mxu0 %v6262_v41 }
 0x122   : > { %1219 = vmatprep.mubr.f32.mxu0 %v6296_v1  ;;  %v718_v1 = vrot.slane %v5990_v19, 2 }
 0x124   : > { %v719_v30 = vsel %vm714_vm1, %v6309_v22, %v718_v1  ;;  %v932_v1 = vld [vmem:[#allocation7 + $0x238] sm:$0xff] }
 0x125   : > { %1220 = vmatmul.mubr.f32.gmra.mrb[60].mxu0 %v6279_v17 }
 0x126   : > { %1224 = vmatprep.mubr.f32.mxu0 %v6303_v45  ;;  %v720_v45 = vrot.slane %v5994_v24, 2 }
 0x128   : > { %v6324_v19 = vsel %vm714_vm1, %v720_v45, %v721_v28  ;;  %v933_v45 = vld [vmem:[#allocation7 + $0x240] sm:$0xff] }
 0x129   : > { %1225 = vmatmul.mubr.f32.gmra.mrb[62].mxu0 %v6281_v54 }
 0x12a   : > { %1294 = vmatprep.mubr.f32.mxu0 %v5994_v24  ;;  %v931_v24 = vld [vmem:[#allocation7 + $0x230] sm:$0xff] }
 0x12d   : > { %1295 = vmatmul.mubr.f32.vlgmr.msra.gmra.mrb[0].mxu0 %v6309_v22 }
 0x12e   : > { %4528 = vmatpush1.bf16.msra.mxu0 %v4527_v36  ;;  %1299 = vmatprep.mubr.f32.mxu0 %v5996_v25  ;;  %v723_v36 = vrot.slane %v6003_v32, 2 }
 0x12f   : > { %4529 = vmatprep.subr.bf16.mxu0 %v8006_v11 }
 0x130   : > { %v6331_v25 = vsel %vm714_vm1, %v721_v28, %v723_v36  ;;  %v733_v36 = vrot.slane %v6043_v60, 2  ;;  %v941_v60 = vld [vmem:[#allocation7 + $0x280] sm:$0xff] }
 0x131   : > { %1300 = vmatmul.mubr.f32.gmra.mrb[2].mxu0 %v719_v30  ;;  %v935_v30 = vld [vmem:[#allocation7 + $0x250] sm:$0xff] }
 0x132   : > { %1304 = vmatprep.mubr.f32.mxu0 %v6011_v37  ;;  %4531 = vmatpush1.bf16.msra.mxu0 %v4530_v18  ;;  %v4536_v37 = vpack.c.bf16 %v932_v1, %v931_v24  ;;  %v934_v18 = vld [vmem:[#allocation7 + $0x248] sm:$0xff]  ;;  %v4542_v28 = vpack.c.bf16 %v936_v31, %v935_v30  ;;  %v4545_v24 = vpack.c.bf16 %v938_v20, %v937_v0  ;;  %v738_v31 = vrot.slane %v6071_v16, 2  ;;  %v945_v16 = vld [vmem:[#allocation7 + $0x2a0] sm:$0xff] }
 0x133   : > { %4532 = vmatprep.subr.bf16.mxu0 %v8006_v11  ;;  %v4539_v32 = vpack.c.bf16 %v934_v18, %v933_v45  ;;  %v736_v45 = vrot.slane %v6058_v8, 2  ;;  %v741_v0 = vrot.slane %v6082_v26, 2 }
 0x135   : > { %1305 = vmatmul.mubr.f32.gmra.mrb[4].mxu0 %v6324_v19 }
 0x136   : > { %1309 = vmatprep.mubr.f32.mxu0 %v6013_v38  ;;  %4534 = vmatpush1.bf16.msra.mxu0 %v4533_v3  ;;  %v730_v38 = vrot.slane %v6029_v50, 2  ;;  %v731_v3 = vrot.slane %v6031_v51, 2 }
 0x137   : > { %4535 = vmatprep.subr.bf16.mxu0 %v8006_v11 }
 0x138   : > { %v6345_v5 = vsel %vm714_vm1, %v730_v38, %v731_v3  ;;  %v6352_v1 = vsel %vm714_vm1, %v731_v3, %v733_v36  ;;  %v6367_v3 = vsel %vm714_vm1, %v736_v45, %v738_v31  ;;  %v946_v36 = vld [vmem:[#allocation7 + $0x2a8] sm:$0xff] }
 0x139   : > { %1310 = vmatmul.mubr.f32.gmra.mrb[6].mxu0 %v6331_v25 }
 0x13a   : > { %1314 = vmatprep.mubr.f32.mxu0 %v6029_v50  ;;  %4537 = vmatpush1.bf16.msra.mxu0 %v4536_v37  ;;  %v939_v50 = vld [vmem:[#allocation7 + $0x270] sm:$0xff]  ;;  %v735_v37 = vrot.slane %v6056_v7, 2 }
 0x13b   : > { %4538 = vmatprep.subr.bf16.mxu0 %v8006_v11 }
 0x13c   : > { %v6360_v30 = vsel %vm714_vm1, %v735_v37, %v736_v45  ;;  %v745_v45 = vrot.slane %v6101_v43, 2 }
 0x13d   : > { %1315 = vmatmul.mubr.f32.gmra.mrb[8].mxu0 %v6046_v61 }
 0x13e   : > { %1319 = vmatprep.mubr.f32.mxu0 %v6031_v51  ;;  %4540 = vmatpush1.bf16.msra.mxu0 %v4539_v32  ;;  %v940_v51 = vld [vmem:[#allocation7 + $0x278] sm:$0xff]  ;;  %v942_v32 = vld [vmem:[#allocation7 + $0x288] sm:$0xff] }
 0x13f   : > { %4541 = vmatprep.subr.bf16.mxu0 %v8006_v11  ;;  %v4548_v18 = vpack.c.bf16 %v940_v51, %v939_v50  ;;  %v4551_v38 = vpack.c.bf16 %v942_v32, %v941_v60  ;;  %v743_v50 = vrot.slane %v6092_v2, 2  ;;  %v4557_v51 = vpack.c.bf16 %v946_v36, %v945_v16  ;;  %v949_v2 = vld [vmem:[#allocation7 + $0x2c0] sm:$0xff]  ;;  %v950_v32 = vld [vmem:[#allocation7 + $0x2c8] sm:$0xff] }
 0x140   : > { %v954_v16 = vld [vmem:[#allocation7 + $0x2e8] sm:$0xff] }
 0x141   : > { %1320 = vmatmul.mubr.f32.gmra.mrb[10].mxu0 %v6061_v9  ;;  %v6382_v37 = vsel %vm714_vm1, %v741_v0, %v743_v50  ;;  %v753_v50 = vrot.slane %v6134_v14, 2 }
 0x142   : > { %1324 = vmatprep.mubr.f32.mxu0 %v6056_v7  ;;  %4543 = vmatpush1.bf16.msra.mxu0 %v4542_v28  ;;  %v943_v7 = vld [vmem:[#allocation7 + $0x290] sm:$0xff]  ;;  %v740_v28 = vrot.slane %v6080_v23, 2 }
 0x143   : > { %4544 = vmatprep.subr.bf16.mxu0 %v8006_v11 }
 0x145   : > { %1325 = vmatmul.mubr.f32.gmra.mrb[12].mxu0 %v6345_v5 }
 0x146   : > { %1329 = vmatprep.mubr.f32.mxu0 %v6058_v8  ;;  %4546 = vmatpush1.bf16.msra.mxu0 %v4545_v24  ;;  %v944_v8 = vld [vmem:[#allocation7 + $0x298] sm:$0xff]  ;;  %v6375_v24 = vsel %vm714_vm1, %v740_v28, %v741_v0  ;;  %v750_v28 = vrot.slane %v6122_v62, 2  ;;  %v751_v0 = vrot.slane %v6124_v63, 2 }
 0x147   : > { %4547 = vmatprep.subr.bf16.mxu0 %v8006_v11  ;;  %v4554_v20 = vpack.c.bf16 %v944_v8, %v943_v7  ;;  %v4563_v7 = vpack.c.bf16 %v950_v32, %v949_v2  ;;  %v761_v2 = vrot.slane %v6166_v52, 2  ;;  %v763_v32 = vrot.slane %v6176_v59, 2 }
 0x148   : > { %v6405_v36 = vsel %vm714_vm1, %v750_v28, %v751_v0  ;;  %v768_v59 = vrot.slane %v6195_v21, 2  ;;  %v773_v21 = vrot.slane %v6214_v48, 2  ;;  %v778_v48 = vrot.slane %v6233_v39, 2  ;;  %v993_v39 = vld [vmem:[#allocation7 + $0x420] sm:$0xff] }
 0x149   : > { %1330 = vmatmul.mubr.f32.gmra.mrb[14].mxu0 %v6352_v1 }
 0x14a   : > { %1334 = vmatprep.mubr.f32.mxu0 %v6080_v23  ;;  %4549 = vmatpush1.bf16.msra.mxu0 %v4548_v18  ;;  %v947_v23 = vld [vmem:[#allocation7 + $0x2b0] sm:$0xff]  ;;  %v746_v18 = vrot.slane %v6103_v44, 2 }
 0x14b   : > { %4550 = vmatprep.subr.bf16.mxu0 %v8006_v11 }
 0x14c   : > { %v6390_v31 = vsel %vm714_vm1, %v745_v45, %v746_v18  ;;  %v756_v45 = vrot.slane %v6145_v29, 2 }
 0x14d   : > { %1335 = vmatmul.mubr.f32.gmra.mrb[16].mxu0 %v6360_v30 }
 0x14e   : > { %1339 = vmatprep.mubr.f32.mxu0 %v6082_v26  ;;  %4552 = vmatpush1.bf16.msra.mxu0 %v4551_v38  ;;  %v948_v26 = vld [vmem:[#allocation7 + $0x2b8] sm:$0xff]  ;;  %v748_v38 = vrot.slane %v6113_v53, 2  ;;  %v953_v53 = vld [vmem:[#allocation7 + $0x2e0] sm:$0xff] }
 0x14f   : > { %4553 = vmatprep.subr.bf16.mxu0 %v8006_v11  ;;  %v4560_v60 = vpack.c.bf16 %v948_v26, %v947_v23  ;;  %v6412_v23 = vsel %vm714_vm1, %v751_v0, %v753_v50  ;;  %v755_v26 = vrot.slane %v6143_v27, 2  ;;  %v989_v0 = vld [vmem:[#allocation7 + $0x400] sm:$0xff]  ;;  %v991_v50 = vld [vmem:[#allocation7 + $0x410] sm:$0xff] }
 0x150   : > { %v6397_v8 = vsel %vm714_vm1, %v746_v18, %v748_v38  ;;  %v6440_v38 = vsel %vm714_vm1, %v761_v2, %v763_v32  ;;  %v996_v32 = vld [vmem:[#allocation7 + $0x438] sm:$0xff] }
 0x151   : > { %1340 = vmatmul.mubr.f32.gmra.mrb[18].mxu0 %v6367_v3  ;;  %v6420_v14 = vsel %vm714_vm1, %v755_v26, %v756_v45  ;;  %v994_v26 = vld [vmem:[#allocation7 + $0x428] sm:$0xff] }
 0x152   : > { %1344 = vmatprep.mubr.f32.mxu0 %v6101_v43  ;;  %4555 = vmatpush1.bf16.msra.mxu0 %v4554_v20  ;;  %v951_v43 = vld [vmem:[#allocation7 + $0x2d0] sm:$0xff] }
 0x153   : > { %4556 = vmatprep.subr.bf16.mxu0 %v8006_v11 }
 0x155   : > { %1345 = vmatmul.mubr.f32.gmra.mrb[20].mxu0 %v6375_v24 }
 0x156   : > { %1349 = vmatprep.mubr.f32.mxu0 %v6103_v44  ;;  %4558 = vmatpush1.bf16.msra.mxu0 %v4557_v51  ;;  %v952_v44 = vld [vmem:[#allocation7 + $0x2d8] sm:$0xff]  ;;  %v4569_v51 = vpack.c.bf16 %v954_v16, %v953_v53 }
 0x157   : > { %4559 = vmatprep.subr.bf16.mxu0 %v8006_v11  ;;  %v4566_v20 = vpack.c.bf16 %v952_v44, %v951_v43 }
 0x159   : > { %1350 = vmatmul.mubr.f32.gmra.mrb[22].mxu0 %v6382_v37 }
 0x15a   : > { %1354 = vmatprep.mubr.f32.mxu0 %v6122_v62  ;;  %4561 = vmatpush1.bf16.msra.mxu0 %v4560_v60  ;;  %v955_v62 = vld [vmem:[#allocation7 + $0x2f0] sm:$0xff]  ;;  %v758_v60 = vrot.slane %v6155_v42, 2 }
 0x15b   : > { %4562 = vmatprep.subr.bf16.mxu0 %v8006_v11 }
 0x15d   : > { %1355 = vmatmul.mubr.f32.gmra.mrb[24].mxu0 %v6390_v31 }
 0x15e   : > { %1359 = vmatprep.mubr.f32.mxu0 %v6124_v63  ;;  %4564 = vmatpush1.bf16.msra.mxu0 %v4563_v7  ;;  %v956_v63 = vld [vmem:[#allocation7 + $0x2f8] sm:$0xff] }
 0x15f   : > { %4565 = vmatprep.subr.bf16.mxu0 %v8006_v11  ;;  %v4572_v18 = vpack.c.bf16 %v956_v63, %v955_v62  ;;  %v992_v62 = vld [vmem:[#allocation7 + $0x418] sm:$0xff] }
 0x160   : > { %v4626_v63 = vpack.c.bf16 %v992_v62, %v991_v50  ;;  %v793_v50 = vrot.slane %v6291_v56, 2  ;;  %v1004_v62 = vld [vmem:[#allocation7 + $0x478] sm:$0xff] }
 0x161   : > { %1360 = vmatmul.mubr.f32.gmra.mrb[26].mxu0 %v6397_v8 }
 0x162   : > { %1364 = vmatprep.mubr.f32.mxu0 %v6143_v27  ;;  %4567 = vmatpush1.bf16.msra.mxu0 %v4566_v20  ;;  %v6427_v27 = vsel %vm714_vm1, %v756_v45, %v758_v60  ;;  %v990_v20 = vld [vmem:[#allocation7 + $0x408] sm:$0xff]  ;;  %v4630_v60 = vpack.c.bf16 %v994_v26, %v993_v39 }
 0x163   : > { %4568 = vmatprep.subr.bf16.mxu0 %v8006_v11  ;;  %v4622_v16 = vpack.c.bf16 %v990_v20, %v989_v0  ;;  %v6509_v0 = vld [vmem:[#allocation2 + $0x180] sm:$0xff]  ;;  %v958_v39 = vld [vmem:[#allocation7 + $0x308] sm:$0xff] }
 0x164   : > { %v1001_v20 = vld [vmem:[#allocation7 + $0x460] sm:$0xff] }
 0x165   : > { %1365 = vmatmul.mubr.f32.gmra.mrb[28].mxu0 %v6405_v36  ;;  %4623 = vmatprep.subr.bf16.mxu1 %v4622_v16 }
 0x166   : > { %1369 = vmatprep.mubr.f32.mxu0 %v6145_v29  ;;  %4570 = vmatpush1.bf16.msra.mxu0 %v4569_v51  ;;  %v760_v29 = vrot.slane %v6164_v49, 2  ;;  %v781_v51 = vrot.slane %v6243_v57, 2 }
 0x167   : > { %4571 = vmatprep.subr.bf16.mxu0 %v8006_v11  ;;  %4625 = vmatpush3.bf16.msra.mxu1 %v4622_v16 }
 0x168   : > { %v6434_v42 = vsel %vm714_vm1, %v760_v29, %v761_v2  ;;  %4627 = vmatprep.subr.bf16.mxu1 %v4626_v63  ;;  %v785_v29 = vrot.slane %v6260_v47, 2  ;;  %v786_v2 = vrot.slane %v6262_v41, 2 }
 0x169   : > { %1370 = vmatmul.mubr.f32.gmra.mrb[30].mxu0 %v6412_v23 }
 0x16a   : > { %1374 = vmatprep.mubr.f32.mxu0 %v6164_v49  ;;  %4573 = vmatpush1.bf16.msra.mxu0 %v4572_v18  ;;  %v765_v49 = vrot.slane %v6184_v10, 2  ;;  %v783_v18 = vrot.slane %v6252_v4, 2  ;;  %v997_v4 = vld [vmem:[#allocation7 + $0x440] sm:$0xff] }
 0x16b   : > { %4574 = vmatprep.subr.bf16.mxu0 %v8006_v11  ;;  %4629 = vmatpush3.bf16.msra.mxu1 %v4626_v63  ;;  %v957_v63 = vld [vmem:[#allocation7 + $0x300] sm:$0xff] }
 0x16c   : > { %4631 = vmatprep.subr.bf16.mxu1 %v4630_v60  ;;  %v4575_v56 = vpack.c.bf16 %v958_v39, %v957_v63  ;;  %v977_v63 = vld [vmem:[#allocation7 + $0x3a0] sm:$0xff]  ;;  %v8012_v39 = vld [vmem:[#allocation19_spill] sm:$0xff] }
 0x16d   : > { %1375 = vmatmul.mubr.f32.gmra.mrb[32].mxu0 %v6420_v14 }
 0x16e   : > { %1379 = vmatprep.mubr.f32.mxu0 %v6166_v52  ;;  %v766_v52 = vrot.slane %v6186_v12, 2 }
 0x16f   : > { %4633 = vmatpush3.bf16.msra.mxu1 %v4630_v60  ;;  %v960_v60 = vld [vmem:[#allocation7 + $0x318] sm:$0xff] }
 0x170   : > { %v6447_v7 = vsel %vm714_vm1, %v765_v49, %v766_v52  ;;  %v6453_v43 = vsel %vm714_vm1, %v766_v52, %v768_v59  ;;  %v998_v52 = vld [vmem:[#allocation7 + $0x448] sm:$0xff]  ;;  %v6499_v59 = vsel %vm714_vm1, %v785_v29, %v786_v2  ;;  %v961_v29 = vld [vmem:[#allocation7 + $0x320] sm:$0xff] }
 0x171   : > { %1380 = vmatmul.mubr.f32.gmra.mrb[34].mxu0 %v6427_v27 }
 0x172   : > { %1384 = vmatprep.mubr.f32.mxu0 %v6184_v10  ;;  %v770_v10 = vrot.slane %v6203_v33, 2 }
 0x175   : > { %1385 = vmatmul.mubr.f32.gmra.mrb[36].mxu0 %v6434_v42 }
 0x176   : > { %1389 = vmatprep.mubr.f32.mxu0 %v6186_v12  ;;  %v771_v12 = vrot.slane %v6205_v35, 2 }
 0x178   : > { %v6460_v44 = vsel %vm714_vm1, %v770_v10, %v771_v12  ;;  %v6466_v28 = vsel %vm714_vm1, %v771_v12, %v773_v21  ;;  %v788_v10 = vrot.slane %v6271_v58, 2  ;;  %v4638_v12 = vpack.c.bf16 %v998_v52, %v997_v4  ;;  %v967_v4 = vld [vmem:[#allocation7 + $0x350] sm:$0xff]  ;;  %v8007_v52 = vld [vmem:[#allocation14_spill] sm:$0xff] }
 0x179   : > { %1390 = vmatmul.mubr.f32.gmra.mrb[38].mxu0 %v6440_v38  ;;  %v790_v21 = vrot.slane %v6279_v17, 2 }
 0x17a   : > { %1394 = vmatprep.mubr.f32.mxu0 %v6203_v33  ;;  %v775_v33 = vrot.slane %v6222_v6, 2 }
 0x17d   : > { %1395 = vmatmul.mubr.f32.gmra.mrb[40].mxu0 %v6447_v7 }
 0x17e   : > { %1399 = vmatprep.mubr.f32.mxu0 %v6205_v35  ;;  %v776_v35 = vrot.slane %v6224_v15, 2 }
 0x180   : > { %v6473_v53 = vsel %vm714_vm1, %v775_v33, %v776_v35  ;;  %v791_v33 = vrot.slane %v6281_v54, 2 }
 0x181   : > { %1400 = vmatmul.mubr.f32.gmra.mrb[42].mxu0 %v6453_v43 }
 0x182   : > { %1404 = vmatprep.mubr.f32.mxu0 %v6222_v6  ;;  %v6479_v6 = vsel %vm714_vm1, %v776_v35, %v778_v48  ;;  %v1000_v35 = vld [vmem:[#allocation7 + $0x458] sm:$0xff]  ;;  %v1002_v48 = vld [vmem:[#allocation7 + $0x468] sm:$0xff]  ;;  %v6514_v16 = vsel %vm714_vm1, %v790_v21, %v791_v33 }
 0x185   : > { %1405 = vmatmul.mubr.f32.gmra.mrb[44].mxu0 %v6460_v44 }
 0x186   : > { %1409 = vmatprep.mubr.f32.mxu0 %v6224_v15  ;;  %v780_v15 = vrot.slane %v6241_v13, 2 }
 0x188   : > { %v6486_v45 = vsel %vm714_vm1, %v780_v15, %v781_v51  ;;  %v1003_v15 = vld [vmem:[#allocation7 + $0x470] sm:$0xff] }
 0x189   : > { %1410 = vmatmul.mubr.f32.gmra.mrb[46].mxu0 %v6466_v28  ;;  %v4650_v26 = vpack.c.bf16 %v1004_v62, %v1003_v15  ;;  %v8011_v15 = vld [vmem:[#allocation18_spill] sm:$0xff] }
 0x18a   : > { %1414 = vmatprep.mubr.f32.mxu0 %v6241_v13  ;;  %v995_v13 = vld [vmem:[#allocation7 + $0x430] sm:$0xff] }
 0x18b   : > { %v4634_v49 = vpack.c.bf16 %v996_v32, %v995_v13  ;;  %v964_v32 = vld [vmem:[#allocation7 + $0x338] sm:$0xff] }
 0x18d   : > { %1415 = vmatmul.mubr.f32.gmra.mrb[48].mxu0 %v6473_v53  ;;  %4635 = vmatprep.subr.bf16.mxu1 %v4634_v49 }
 0x18e   : > { %1419 = vmatprep.mubr.f32.mxu0 %v6243_v57  ;;  %v6492_v57 = vsel %vm714_vm1, %v781_v51, %v783_v18  ;;  %4637 = vmatpush3.bf16.msra.mxu1 %v4634_v49  ;;  %v6522_v51 = vsel %vm714_vm1, %v791_v33, %v793_v50  ;;  %v959_v18 = vld [vmem:[#allocation7 + $0x310] sm:$0xff] }
 0x18f   : > { %4639 = vmatprep.subr.bf16.mxu1 %v4638_v12  ;;  %v4578_v13 = vpack.c.bf16 %v960_v60, %v959_v18  ;;  %v971_v33 = vld [vmem:[#allocation7 + $0x370] sm:$0xff] }
 0x190   : > { %v8013_v18 = vld [vmem:[#allocation20_spill] sm:$0xff] }
 0x191   : > { %1420 = vmatmul.mubr.f32.gmra.mrb[50].mxu0 %v6479_v6 }
 0x192   : > { %1424 = vmatprep.mubr.f32.mxu0 %v6260_v47  ;;  %v999_v47 = vld [vmem:[#allocation7 + $0x450] sm:$0xff]  ;;  %4641 = vmatpush3.bf16.msra.mxu1 %v4638_v12  ;;  %v969_v12 = vld [vmem:[#allocation7 + $0x360] sm:$0xff] }
 0x193   : > { %v4642_v58 = vpack.c.bf16 %v1000_v35, %v999_v47  ;;  %v8008_v47 = vld [vmem:[#allocation15_spill] sm:$0xff]  ;;  %v8009_v35 = vld [vmem:[#allocation16_spill] sm:$0xff] }
 0x195   : > { %1425 = vmatmul.mubr.f32.gmra.mrb[52].mxu0 %v6486_v45  ;;  %4643 = vmatprep.subr.bf16.mxu1 %v4642_v58 }
 0x196   : > { %1429 = vmatprep.mubr.f32.mxu0 %v6262_v41  ;;  %v6505_v41 = vsel %vm714_vm1, %v786_v2, %v788_v10  ;;  %4645 = vmatpush3.bf16.msra.mxu1 %v4642_v58  ;;  %v962_v2 = vld [vmem:[#allocation7 + $0x328] sm:$0xff] }
 0x199   : > { %1430 = vmatmul.mubr.f32.gmra.mrb[54].mxu0 %v6492_v57 }
 0x19a   : > { %1434 = vmatprep.mubr.f32.mxu0 %v6279_v17  ;;  %v4646_v17 = vpack.c.bf16 %v1002_v48, %v1001_v20  ;;  %v973_v20 = vld [vmem:[#allocation7 + $0x380] sm:$0xff]  ;;  %v8010_v48 = vld [vmem:[#allocation17_spill] sm:$0xff] }
 0x19c   : > { %4647 = vmatprep.subr.bf16.mxu1 %v4646_v17 }
 0x19d   : > { %1435 = vmatmul.mubr.f32.gmra.mrb[56].mxu0 %v6499_v59  ;;  %4649 = vmatpush3.bf16.msra.mxu1 %v4646_v17  ;;  %v975_v17 = vld [vmem:[#allocation7 + $0x390] sm:$0xff] }
 0x19e   : > { %1439 = vmatprep.mubr.f32.mxu0 %v6281_v54  ;;  %v6517_v54 = vld [vmem:[#allocation2 + $0x188] sm:$0xff]  ;;  %4651 = vmatprep.subr.bf16.mxu1 %v4650_v26 }
 0x1a1   : > { %1440 = vmatmul.mubr.f32.gmra.mrb[58].mxu0 %v6505_v41  ;;  %4653 = vmatpush3.bf16.msra.mxu1 %v4650_v26 }
 0x1a2   : > { %1444 = vmatprep.mubr.f32.mxu0 %v6509_v0  ;;  %4654 = vmatprep.subr.bf16.mxu1 %v8006_v11 }
 0x1a4   : > { %4303 = vmatmul.mubr.f32.vlgmr.msra.gmra.mrb[0].mxu1 %v6061_v9 }
 0x1a5   : > { %1445 = vmatmul.mubr.f32.gmra.mrb[60].mxu0 %v6514_v16  ;;  %4305 = vmatprep.mubr.f32.mxu1 %v6345_v5 }
 0x1a6   : > { %1449 = vmatprep.mubr.f32.mxu0 %v6517_v54 }
 0x1a8   : > { %4306 = vmatmul.mubr.f32.gmra.mrb[2].mxu1 %v6352_v1 }
 0x1a9   : > { %1450 = vmatmul.mubr.f32.gmra.mrb[62].mxu0 %v6522_v51  ;;  %4308 = vmatprep.mubr.f32.mxu1 %v6360_v30 }
 0x1aa   : > { %1519 = vmatprep.mubr.f32.mxu0 %v6324_v19  ;;  %v963_v19 = vld [vmem:[#allocation7 + $0x330] sm:$0xff] }
 0x1ac   : > { %4309 = vmatmul.mubr.f32.gmra.mrb[4].mxu1 %v6367_v3 }
 0x1ad   : > { %1520 = vmatmul.mubr.f32.vlgmr.msra.gmra.mrb[0].mxu0 %v6007_v34  ;;  %v4581_v34 = vpack.c.bf16 %v962_v2, %v961_v29  ;;  %4311 = vmatprep.mubr.f32.mxu1 %v6375_v24  ;;  %v8014_v29 = vld [vmem:[#allocation21_spill] sm:$0xff] }
 0x1ae   : > { %4576 = vmatpush1.bf16.msra.mxu0 %v4575_v56  ;;  %1524 = vmatprep.mubr.f32.mxu0 %v6331_v25  ;;  %v965_v25 = vld [vmem:[#allocation7 + $0x340] sm:$0xff]  ;;  %v979_v56 = vld [vmem:[#allocation7 + $0x3b0] sm:$0xff] }
 0x1af   : > { %4577 = vmatprep.subr.bf16.mxu0 %v8006_v11 }
 0x1b0   : > { %4312 = vmatmul.mubr.f32.gmra.mrb[6].mxu1 %v6382_v37 }
 0x1b1   : > { %1525 = vmatmul.mubr.f32.gmra.mrb[2].mxu0 %v6018_v40  ;;  %v4584_v40 = vpack.c.bf16 %v964_v32, %v963_v19  ;;  %4314 = vmatprep.mubr.f32.mxu1 %v6390_v31  ;;  %v8015_v19 = vld [vmem:[#allocation22_spill] sm:$0xff]  ;;  %v6588_v32 = vld [vmem:[#allocation2 + $0x190] sm:$0x3] }
 0x1b2   : > { %1529 = vmatprep.mubr.f32.mxu0 %v6046_v61  ;;  %4579 = vmatpush1.bf16.msra.mxu0 %v4578_v13  ;;  %v966_v61 = vld [vmem:[#allocation7 + $0x348] sm:$0xff]  ;;  %v981_v13 = vld [vmem:[#allocation7 + $0x3c0] sm:$0xff] }
 0x1b3   : > { %4580 = vmatprep.subr.bf16.mxu0 %v8006_v11  ;;  %v4587_v49 = vpack.c.bf16 %v966_v61, %v965_v25  ;;  %v838_v25 = vrot.slane %v6517_v54, 2  ;;  %v985_v61 = vld [vmem:[#allocation7 + $0x3e0] sm:$0xff] }
 0x1b4   : > { %4315 = vmatmul.mubr.f32.gmra.mrb[8].mxu1 %v6397_v8 }
 0x1b5   : > { %1530 = vmatmul.mubr.f32.gmra.mrb[4].mxu0 %v6026_v46  ;;  %4317 = vmatprep.mubr.f32.mxu1 %v6405_v36 }
 0x1b6   : > { %1534 = vmatprep.mubr.f32.mxu0 %v6061_v9  ;;  %4582 = vmatpush1.bf16.msra.mxu0 %v4581_v34  ;;  %v968_v9 = vld [vmem:[#allocation7 + $0x358] sm:$0xff]  ;;  %v983_v34 = vld [vmem:[#allocation7 + $0x3d0] sm:$0xff] }
 0x1b7   : > { %4583 = vmatprep.subr.bf16.mxu0 %v8006_v11  ;;  %v4590_v10 = vpack.c.bf16 %v968_v9, %v967_v4  ;;  %v840_v4 = vrot.slane %v6588_v32, 2  ;;  %v8016_v9 = vld [vmem:[#allocation23_spill] sm:$0xff] }
 0x1b8   : > { %4318 = vmatmul.mubr.f32.gmra.mrb[10].mxu1 %v6412_v23 }
 0x1b9   : > { %1535 = vmatmul.mubr.f32.gmra.mrb[6].mxu0 %v6038_v55  ;;  %4320 = vmatprep.mubr.f32.mxu1 %v6420_v14 }
 0x1ba   : > { %1539 = vmatprep.mubr.f32.mxu0 %v6345_v5  ;;  %4585 = vmatpush1.bf16.msra.mxu0 %v4584_v40  ;;  %v970_v5 = vld [vmem:[#allocation7 + $0x368] sm:$0xff] }
 0x1bb   : > { %4586 = vmatprep.subr.bf16.mxu0 %v8006_v11  ;;  %v4593_v21 = vpack.c.bf16 %v970_v5, %v969_v12  ;;  %v987_v12 = vld [vmem:[#allocation7 + $0x3f0] sm:$0xff]  ;;  %v988_v5 = vld [vmem:[#allocation7 + $0x3f8] sm:$0xff] }
 0x1bc   : > { %4321 = vmatmul.mubr.f32.gmra.mrb[12].mxu1 %v6427_v27 }
 0x1bd   : > { %1540 = vmatmul.mubr.f32.gmra.mrb[8].mxu0 %v8007_v52  ;;  %4323 = vmatprep.mubr.f32.mxu1 %v6434_v42 }
 0x1be   : > { %1544 = vmatprep.mubr.f32.mxu0 %v6352_v1  ;;  %4588 = vmatpush1.bf16.msra.mxu0 %v4587_v49  ;;  %v972_v1 = vld [vmem:[#allocation7 + $0x378] sm:$0xff]  ;;  %v986_v49 = vld [vmem:[#allocation7 + $0x3e8] sm:$0xff] }
 0x1bf   : > { %4589 = vmatprep.subr.bf16.mxu0 %v8006_v11  ;;  %v4596_v58 = vpack.c.bf16 %v972_v1, %v971_v33  ;;  %v8017_v33 = vld [vmem:[#allocation24_spill] sm:$0xff]  ;;  %v4620_v1 = vpack.c.bf16 %v988_v5, %v987_v12  ;;  %v5356_v12 = vld [vmem:[#allocation2 + $0x60] sm:$0xff] }
 0x1c0   : > { %4324 = vmatmul.mubr.f32.gmra.mrb[14].mxu1 %v6440_v38  ;;  %v2645_v5 = vld [vmem:[#allocation9 + $0x60] sm:$0xff] }
 0x1c1   : > { %1545 = vmatmul.mubr.f32.gmra.mrb[10].mxu0 %v8008_v47  ;;  %4326 = vmatprep.mubr.f32.mxu1 %v6447_v7 }
 0x1c2   : > { %1549 = vmatprep.mubr.f32.mxu0 %v6360_v30  ;;  %4591 = vmatpush1.bf16.msra.mxu0 %v4590_v10  ;;  %v974_v30 = vld [vmem:[#allocation7 + $0x388] sm:$0xff] }
 0x1c3   : > { %4592 = vmatprep.subr.bf16.mxu0 %v8006_v11  ;;  %v4599_v50 = vpack.c.bf16 %v974_v30, %v973_v20  ;;  %v8020_v20 = vld [vmem:[#allocation27_spill] sm:$0xff]  ;;  %v8021_v30 = vld [vmem:[#allocation28_spill] sm:$0xff] }
 0x1c4   : > { %4327 = vmatmul.mubr.f32.gmra.mrb[16].mxu1 %v6453_v43 }
 0x1c5   : > { %1550 = vmatmul.mubr.f32.gmra.mrb[12].mxu0 %v8009_v35  ;;  %4329 = vmatprep.mubr.f32.mxu1 %v6460_v44 }
 0x1c6   : > { %1554 = vmatprep.mubr.f32.mxu0 %v6367_v3  ;;  %4594 = vmatpush1.bf16.msra.mxu0 %v4593_v21  ;;  %v976_v3 = vld [vmem:[#allocation7 + $0x398] sm:$0xff]  ;;  %v841_v21 = vsel %vm714_vm1, %v838_v25, %v840_v4  ;;  %v5355_v4 = vld [vmem:[#allocation2 + $0x50] sm:$0xff] }
 0x1c7   : > { %4595 = vmatprep.subr.bf16.mxu0 %v8006_v11  ;;  %v4602_v62 = vpack.c.bf16 %v976_v3, %v975_v17  ;;  %v6636_v17 = vld [vmem:[#allocation2 + $0x1a8] sm:$0x3] }
 0x1c8   : > { %4330 = vmatmul.mubr.f32.gmra.mrb[18].mxu1 %v6466_v28  ;;  %v8032_v3 = vld [vmem:[#allocation39_spill] sm:$0xff] }
 0x1c9   : > { %1555 = vmatmul.mubr.f32.gmra.mrb[14].mxu0 %v8010_v48  ;;  %4332 = vmatprep.mubr.f32.mxu1 %v6473_v53 }
 0x1ca   : > { %1559 = vmatprep.mubr.f32.mxu0 %v6375_v24  ;;  %4597 = vmatpush1.bf16.msra.mxu0 %v4596_v58  ;;  %v978_v24 = vld [vmem:[#allocation7 + $0x3a8] sm:$0xff]  ;;  %v8019_v58 = vld [vmem:[#allocation26_spill] sm:$0xff] }
 0x1cb   : > { %4598 = vmatprep.subr.bf16.mxu0 %v8006_v11  ;;  %v4605_v26 = vpack.c.bf16 %v978_v24, %v977_v63  ;;  %v833_v63 = vrot.slane %v6588_v32, 1  ;;  %v5353_v32 = vld [vmem:[#allocation2 + $0x38] sm:$0xff] }
 0x1cc   : > { %4333 = vmatmul.mubr.f32.gmra.mrb[20].mxu1 %v6479_v6 }
 0x1cd   : > { %1560 = vmatmul.mubr.f32.gmra.mrb[16].mxu0 %v8011_v15  ;;  %4335 = vmatprep.mubr.f32.mxu1 %v6486_v45 }
 0x1ce   : > { %1564 = vmatprep.mubr.f32.mxu0 %v6382_v37  ;;  %4600 = vmatpush1.bf16.msra.mxu0 %v4599_v50  ;;  %v980_v37 = vld [vmem:[#allocation7 + $0x3b8] sm:$0xff]  ;;  %v8023_v50 = vld [vmem:[#allocation30_spill] sm:$0xff] }
 0x1cf   : > { %4601 = vmatprep.subr.bf16.mxu0 %v8006_v11  ;;  %v4608_v60 = vpack.c.bf16 %v980_v37, %v979_v56  ;;  %v2634_v56 = vld [vmem:[#allocation9 + $0x8] sm:$0xff]  ;;  %v2635_v37 = vld [vmem:[#allocation9 + $0x10] sm:$0xff] }
 0x1d0   : > { %4336 = vmatmul.mubr.f32.gmra.mrb[22].mxu1 %v6492_v57 }
 0x1d1   : > { %1565 = vmatmul.mubr.f32.gmra.mrb[18].mxu0 %v8012_v39  ;;  %4338 = vmatprep.mubr.f32.mxu1 %v6499_v59 }
 0x1d2   : > { %1569 = vmatprep.mubr.f32.mxu0 %v6390_v31  ;;  %4603 = vmatpush1.bf16.msra.mxu0 %v4602_v62  ;;  %v982_v31 = vld [vmem:[#allocation7 + $0x3c8] sm:$0xff] }
 0x1d3   : > { %4604 = vmatprep.subr.bf16.mxu0 %v8006_v11  ;;  %v4611_v2 = vpack.c.bf16 %v982_v31, %v981_v13  ;;  %v2636_v13 = vld [vmem:[#allocation9 + $0x18] sm:$0xff]  ;;  %v5352_v31 = vld [vmem:[#allocation2 + $0x30] sm:$0xff] }
 0x1d4   : > { %4339 = vmatmul.mubr.f32.gmra.mrb[24].mxu1 %v6505_v41 }
 0x1d5   : > { %1570 = vmatmul.mubr.f32.gmra.mrb[20].mxu0 %v8013_v18  ;;  %4341 = vmatprep.mubr.f32.mxu1 %v6514_v16 }
 0x1d6   : > { %1574 = vmatprep.mubr.f32.mxu0 %v6397_v8  ;;  %4606 = vmatpush1.bf16.msra.mxu0 %v4605_v26  ;;  %v984_v8 = vld [vmem:[#allocation7 + $0x3d8] sm:$0xff]  ;;  %v2633_v26 = vld [vmem:[#allocation9] sm:$0xff] }
 0x1d7   : > { %4607 = vmatprep.subr.bf16.mxu0 %v8006_v11  ;;  %v4614_v40 = vpack.c.bf16 %v984_v8, %v983_v34  ;;  %v2638_v34 = vld [vmem:[#allocation9 + $0x28] sm:$0xff] }
 0x1d8   : > { %4342 = vmatmul.mubr.f32.gmra.mrb[26].mxu1 %v6522_v51 }
 0x1d9   : > { %1575 = vmatmul.mubr.f32.gmra.mrb[22].mxu0 %v8014_v29 }
 0x1da   : > { %1579 = vmatprep.mubr.f32.mxu0 %v6405_v36  ;;  %4609 = vmatpush1.bf16.msra.mxu0 %v4608_v60  ;;  %v837_v36 = vrot.slane %v6509_v0, 2  ;;  %v4655_v60 = vpack.c.bf16 %v2634_v56, %v2633_v26  ;;  %v2651_v26 = vld [vmem:[#allocation9 + $0x90] sm:$0xff]  ;;  %v2652_v56 = vld [vmem:[#allocation9 + $0x98] sm:$0xff] }
 0x1db   : > { %4610 = vmatprep.subr.bf16.mxu0 %v8006_v11 }
 0x1dc   : > { %v839_v10 = vsel %vm714_vm1, %v837_v36, %v838_v25  ;;  %4656 = vmatpush1.bf16.msra.mxu1 %v4655_v60  ;;  %v5354_v25 = vld [vmem:[#allocation2 + $0x48] sm:$0xff]  ;;  %v2653_v60 = vld [vmem:[#allocation9 + $0xa0] sm:$0xff] }
 0x1dd   : > { %1580 = vmatmul.mubr.f32.gmra.mrb[24].mxu0 %v8015_v19  ;;  %4344 = vmatprep.mubr.f32.mxu1 %v839_v10 }
 0x1de   : > { %1584 = vmatprep.mubr.f32.mxu0 %v6412_v23  ;;  %4612 = vmatpush1.bf16.msra.mxu0 %v4611_v2  ;;  %v4617_v23 = vpack.c.bf16 %v986_v49, %v985_v61  ;;  %v2637_v2 = vld [vmem:[#allocation9 + $0x20] sm:$0xff]  ;;  %v2642_v49 = vld [vmem:[#allocation9 + $0x48] sm:$0xff] }
 0x1df   : > { %4613 = vmatprep.subr.bf16.mxu0 %v8006_v11  ;;  %4345 = vmatmul.mubr.f32.gmra.mrb[28].mxu1 %v841_v21  ;;  %v4661_v8 = vpack.c.bf16 %v2638_v34, %v2637_v2  ;;  %v2641_v61 = vld [vmem:[#allocation9 + $0x40] sm:$0xff]  ;;  %v2656_v2 = vld [vmem:[#allocation9 + $0xb8] sm:$0xff]  ;;  %v5362_v34 = vld [vmem:[#allocation2 + $0xa8] sm:$0xff] }
 0x1e0   : > { %4347 = vmatprep.mubr.f32.mxu1 %v6309_v22  ;;  %4657 = vmatprep.subr.bf16.mxu1 %v8006_v11 }
 0x1e1   : > { %1585 = vmatmul.mubr.f32.gmra.mrb[26].mxu0 %v8016_v9 }
 0x1e2   : > { %1589 = vmatprep.mubr.f32.mxu0 %v6420_v14  ;;  %4615 = vmatpush1.bf16.msra.mxu0 %v4614_v40  ;;  %v8018_v14 = vld [vmem:[#allocation25_spill] sm:$0xff]  ;;  %v2639_v40 = vld [vmem:[#allocation9 + $0x30] sm:$0xff] }
 0x1e3   : > { %4616 = vmatprep.subr.bf16.mxu0 %v8006_v11 }
 0x1e5   : > { %1590 = vmatmul.mubr.f32.gmra.mrb[28].mxu0 %v8017_v33 }
 0x1e6   : > { %1594 = vmatprep.mubr.f32.mxu0 %v6427_v27  ;;  %4618 = vmatpush1.bf16.msra.mxu0 %v4617_v23  ;;  %v8022_v27 = vld [vmem:[#allocation29_spill] sm:$0xff]  ;;  %v2643_v23 = vld [vmem:[#allocation9 + $0x50] sm:$0xff] }
 0x1e7   : > { %4619 = vmatprep.subr.bf16.mxu0 %v8006_v11 }
 0x1e9   : > { %1595 = vmatmul.mubr.f32.gmra.mrb[30].mxu0 %v8018_v14 }
 0x1ea   : > { %1599 = vmatprep.mubr.f32.mxu0 %v6434_v42  ;;  %4621 = vmatpush1.bf16.msra.mxu0 %v4620_v1  ;;  %v8024_v42 = vld [vmem:[#allocation31_spill] sm:$0xff] }
 0x1eb   : > { %v5357_v1 = vld [vmem:[#allocation2 + $0x68] sm:$0xff] }
 0x1ed   : > { %1600 = vmatmul.mubr.f32.gmra.mrb[32].mxu0 %v8019_v58 }
 0x1ee   : > { %1604 = vmatprep.mubr.f32.mxu0 %v6440_v38  ;;  %v8025_v38 = vld [vmem:[#allocation32_spill] sm:$0xff] }
 0x1f1   : > { %1605 = vmatmul.mubr.f32.gmra.mrb[34].mxu0 %v8020_v20 }
 0x1f2   : > { %1609 = vmatprep.mubr.f32.mxu0 %v6447_v7  ;;  %v8026_v7 = vld [vmem:[#allocation33_spill] sm:$0xff] }
 0x1f5   : > { %1610 = vmatmul.mubr.f32.gmra.mrb[36].mxu0 %v8021_v30 }
 0x1f6   : > { %1614 = vmatprep.mubr.f32.mxu0 %v6453_v43  ;;  %v8027_v43 = vld [vmem:[#allocation34_spill] sm:$0xff] }
 0x1f9   : > { %1615 = vmatmul.mubr.f32.gmra.mrb[38].mxu0 %v8022_v27 }
 0x1fa   : > { %1619 = vmatprep.mubr.f32.mxu0 %v6460_v44  ;;  %v8028_v44 = vld [vmem:[#allocation35_spill] sm:$0xff] }
 0x1fd   : > { %1620 = vmatmul.mubr.f32.gmra.mrb[40].mxu0 %v8023_v50 }
 0x1fe   : > { %1624 = vmatprep.mubr.f32.mxu0 %v6466_v28  ;;  %v8029_v28 = vld [vmem:[#allocation36_spill] sm:$0xff] }
 0x201   : > { %1625 = vmatmul.mubr.f32.gmra.mrb[42].mxu0 %v8024_v42 }
 0x202   : > { %1629 = vmatprep.mubr.f32.mxu0 %v6473_v53  ;;  %v8030_v53 = vld [vmem:[#allocation37_spill] sm:$0xff] }
 0x205   : > { %1630 = vmatmul.mubr.f32.gmra.mrb[44].mxu0 %v8025_v38 }
 0x206   : > { %1634 = vmatprep.mubr.f32.mxu0 %v6479_v6  ;;  %v8031_v6 = vld [vmem:[#allocation38_spill] sm:$0xff] }
 0x209   : > { %1635 = vmatmul.mubr.f32.gmra.mrb[46].mxu0 %v8026_v7 }
 0x20a   : > { %1639 = vmatprep.mubr.f32.mxu0 %v6486_v45  ;;  %v830_v45 = vrot.slane %v6509_v0, 1 }
 0x20d   : > { %1640 = vmatmul.mubr.f32.gmra.mrb[48].mxu0 %v8027_v43 }
 0x20e   : > { %1644 = vmatprep.mubr.f32.mxu0 %v6492_v57  ;;  %v831_v57 = vrot.slane %v6517_v54, 1 }
 0x210   : > { %v6653_v24 = vsel %vm601_vm0, %v831_v57, %v833_v63  ;;  %v2650_v63 = vld [vmem:[#allocation9 + $0x88] sm:$0xff] }
 0x211   : > { %1645 = vmatmul.mubr.f32.gmra.mrb[50].mxu0 %v8028_v44 }
 0x212   : > { %1649 = vmatprep.mubr.f32.mxu0 %v6499_v59  ;;  %v8033_v59 = vld [vmem:[#allocation40_spill] sm:$0xff] }
 0x213   : > { %v6640_v62 = vrot.slane %v8033_v59, 1  ;;  %v5358_v59 = vld [vmem:[#allocation2 + $0x78] sm:$0xff] }
 0x215   : > { %1650 = vmatmul.mubr.f32.gmra.mrb[52].mxu0 %v8029_v28 }
 0x216   : > { %1654 = vmatprep.mubr.f32.mxu0 %v6505_v41  ;;  %v857_v41 = vrot.slane %v6636_v17, 2 }
 0x219   : > { %1655 = vmatmul.mubr.f32.gmra.mrb[54].mxu0 %v8030_v53 }
 0x21a   : > { %1659 = vmatprep.mubr.f32.mxu0 %v6514_v16  ;;  %v6644_v16 = vsel %vm601_vm0, %v830_v45, %v831_v57  ;;  %v2647_v45 = vld [vmem:[#allocation9 + $0x70] sm:$0xff]  ;;  %v2648_v57 = vld [vmem:[#allocation9 + $0x78] sm:$0xff] }
 0x21d   : > { %1660 = vmatmul.mubr.f32.gmra.mrb[56].mxu0 %v8031_v6 }
 0x21e   : > { %1664 = vmatprep.mubr.f32.mxu0 %v6522_v51  ;;  %v858_v51 = vsel %vm714_vm1, %v6309_v22, %v857_v41  ;;  %v4658_v22 = vpack.c.bf16 %v2636_v13, %v2635_v37  ;;  %v2649_v41 = vld [vmem:[#allocation9 + $0x80] sm:$0xff]  ;;  %v5360_v37 = vld [vmem:[#allocation2 + $0x90] sm:$0xff]  ;;  %v2654_v13 = vld [vmem:[#allocation9 + $0xa8] sm:$0xff] }
 0x21f   : > { %4348 = vmatmul.mubr.f32.gmra.mrb[30].mxu1 %v858_v51  ;;  %v5359_v51 = vld [vmem:[#allocation2 + $0x80] sm:$0xff] }
 0x220   : > { %2841 = vmatprep.mubr.f32.mxu1 %v6640_v62  ;;  %4659 = vmatpush1.bf16.msra.mxu1 %v4658_v22  ;;  %v5361_v22 = vld [vmem:[#allocation2 + $0x98] sm:$0xff] }
 0x221   : > { %1665 = vmatmul.mubr.f32.gmra.mrb[58].mxu0 %v8032_v3  ;;  %4660 = vmatprep.subr.bf16.mxu1 %v8006_v11 }
 0x222   : > { %1669 = vmatprep.mubr.f32.mxu0 %v839_v10  ;;  %v2644_v10 = vld [vmem:[#allocation9 + $0x58] sm:$0xff] }
 0x224   : > { %4662 = vmatpush1.bf16.msra.mxu1 %v4661_v8  ;;  %v5364_v8 = vld [vmem:[#allocation2 + $0xc0] sm:$0xff] }
 0x225   : > { %1670 = vmatmul.mubr.f32.gmra.mrb[60].mxu0 %v6644_v16  ;;  %4663 = vmatprep.subr.bf16.mxu1 %v8006_v11 }
 0x226   : > { %1674 = vmatprep.mubr.f32.mxu0 %v841_v21  ;;  %v2646_v21 = vld [vmem:[#allocation9 + $0x68] sm:$0xff] }
 0x229   : > { %1675 = vmatmul.mubr.f32.gmra.mrb[62].mxu0 %v6653_v24 }
 0x22a   : > { %1744 = vmatprep.mubr.f32.mxu0 %v6026_v46  ;;  %v2640_v46 = vld [vmem:[#allocation9 + $0x38] sm:$0xff] }
 0x22b   : > { %v4664_v36 = vpack.c.bf16 %v2640_v46, %v2639_v40  ;;  %v5368_v40 = vld [vmem:[#allocation2 + $0xf0] sm:$0xff]  ;;  %v2762_v46 = vld [vmem:[#allocation9 + $0x408] sm:$0xff] }
 0x22d   : > { %1745 = vmatmul.mubr.f32.vlgmr.msra.gmra.mrb[0].mxu0 %v5352_v31  ;;  %4665 = vmatpush1.bf16.msra.mxu1 %v4664_v36  ;;  %v2655_v31 = vld [vmem:[#allocation9 + $0xb0] sm:$0xff] }
 0x22e   : > { %1749 = vmatprep.mubr.f32.mxu0 %v6038_v55  ;;  %v4667_v55 = vpack.c.bf16 %v2642_v49, %v2641_v61  ;;  %4666 = vmatprep.subr.bf16.mxu1 %v8006_v11  ;;  %v5373_v49 = vld [vmem:[#allocation2 + $0x128] sm:$0xff] }
 0x231   : > { %1750 = vmatmul.mubr.f32.gmra.mrb[2].mxu0 %v5353_v32  ;;  %4668 = vmatpush1.bf16.msra.mxu1 %v4667_v55  ;;  %v5366_v32 = vld [vmem:[#allocation2 + $0xd8] sm:$0xff] }
 0x232   : > { %1754 = vmatprep.mubr.f32.mxu0 %v8007_v52  ;;  %v4670_v52 = vpack.c.bf16 %v2644_v10, %v2643_v23  ;;  %4669 = vmatprep.subr.bf16.mxu1 %v8006_v11  ;;  %v2660_v23 = vld [vmem:[#allocation9 + $0xd8] sm:$0xff] }
 0x235   : > { %1755 = vmatmul.mubr.f32.gmra.mrb[4].mxu0 %v5354_v25  ;;  %4671 = vmatpush1.bf16.msra.mxu1 %v4670_v52  ;;  %v2658_v25 = vld [vmem:[#allocation9 + $0xc8] sm:$0xff]  ;;  %v5374_v52 = vld [vmem:[#allocation2 + $0x138] sm:$0xff] }
 0x236   : > { %1759 = vmatprep.mubr.f32.mxu0 %v8008_v47  ;;  %v4673_v47 = vpack.c.bf16 %v2646_v21, %v2645_v5  ;;  %4672 = vmatprep.subr.bf16.mxu1 %v8006_v11 }
 0x239   : > { %1760 = vmatmul.mubr.f32.gmra.mrb[6].mxu0 %v5355_v4  ;;  %4674 = vmatpush1.bf16.msra.mxu1 %v4673_v47  ;;  %v2659_v4 = vld [vmem:[#allocation9 + $0xd0] sm:$0xff]  ;;  %v2661_v47 = vld [vmem:[#allocation9 + $0xe0] sm:$0xff] }
 0x23a   : > { %1764 = vmatprep.mubr.f32.mxu0 %v8009_v35  ;;  %v4676_v35 = vpack.c.bf16 %v2648_v57, %v2647_v45  ;;  %4675 = vmatprep.subr.bf16.mxu1 %v8006_v11  ;;  %v4694_v10 = vpack.c.bf16 %v2660_v23, %v2659_v4  ;;  %v2671_v23 = vld [vmem:[#allocation9 + $0x130] sm:$0xff] }
 0x23d   : > { %1765 = vmatmul.mubr.f32.gmra.mrb[8].mxu0 %v5356_v12  ;;  %4677 = vmatpush1.bf16.msra.mxu1 %v4676_v35  ;;  %v2766_v12 = vld [vmem:[#allocation9 + $0x428] sm:$0xff]  ;;  %v5375_v35 = vld [vmem:[#allocation2 + $0x140] sm:$0xff] }
 0x23e   : > { %1769 = vmatprep.mubr.f32.mxu0 %v8010_v48  ;;  %v4679_v48 = vpack.c.bf16 %v2650_v63, %v2649_v41  ;;  %4678 = vmatprep.subr.bf16.mxu1 %v8006_v11  ;;  %v2663_v63 = vld [vmem:[#allocation9 + $0xf0] sm:$0xff] }
 0x241   : > { %1770 = vmatmul.mubr.f32.gmra.mrb[10].mxu0 %v5357_v1  ;;  %4680 = vmatpush1.bf16.msra.mxu1 %v4679_v48  ;;  %v2662_v1 = vld [vmem:[#allocation9 + $0xe8] sm:$0xff]  ;;  %v2664_v48 = vld [vmem:[#allocation9 + $0xf8] sm:$0xff] }
 0x242   : > { %1774 = vmatprep.mubr.f32.mxu0 %v8011_v15  ;;  %v4682_v15 = vpack.c.bf16 %v2652_v56, %v2651_v26  ;;  %4681 = vmatprep.subr.bf16.mxu1 %v8006_v11  ;;  %v4697_v57 = vpack.c.bf16 %v2662_v1, %v2661_v47  ;;  %v5376_v26 = vld [vmem:[#allocation2 + $0x150] sm:$0xff]  ;;  %v2770_v56 = vld [vmem:[#allocation9 + $0x448] sm:$0xff] }
 0x243   : > { %v2674_v47 = vld [vmem:[#allocation9 + $0x148] sm:$0xff] }
 0x245   : > { %1775 = vmatmul.mubr.f32.gmra.mrb[12].mxu0 %v5358_v59  ;;  %4683 = vmatpush1.bf16.msra.mxu1 %v4682_v15  ;;  %v2768_v59 = vld [vmem:[#allocation9 + $0x438] sm:$0xff] }
 0x246   : > { %1779 = vmatprep.mubr.f32.mxu0 %v8012_v39  ;;  %v4685_v39 = vpack.c.bf16 %v2654_v13, %v2653_v60  ;;  %4684 = vmatprep.subr.bf16.mxu1 %v8006_v11  ;;  %v2275_v13 = vld [vmem:[#allocation3 + $0x10] sm:$0x3] }
 0x249   : > { %1780 = vmatmul.mubr.f32.gmra.mrb[14].mxu0 %v5359_v51  ;;  %4686 = vmatpush1.bf16.msra.mxu1 %v4685_v39  ;;  %v4700_v51 = vpack.c.bf16 %v2664_v48, %v2663_v63  ;;  %v5377_v39 = vld [vmem:[#allocation2 + $0x158] sm:$0xff] }
 0x24a   : > { %1784 = vmatprep.mubr.f32.mxu0 %v8013_v18  ;;  %v4688_v18 = vpack.c.bf16 %v2656_v2, %v2655_v31  ;;  %4687 = vmatprep.subr.bf16.mxu1 %v8006_v11  ;;  %v2378_v31 = vrot.slane %v2275_v13, 1  ;;  %v2772_v2 = vld [vmem:[#allocation9 + $0x458] sm:$0xff] }
 0x24d   : > { %1785 = vmatmul.mubr.f32.gmra.mrb[16].mxu0 %v5360_v37  ;;  %4689 = vmatpush1.bf16.msra.mxu1 %v4688_v18  ;;  %v2379_v18 = vsel %vm601_vm0, %v6640_v62, %v2378_v31  ;;  %v2680_v31 = vld [vmem:[#allocation9 + $0x178] sm:$0xff] }
 0x24e   : > { %1789 = vmatprep.mubr.f32.mxu0 %v8014_v29  ;;  %v5363_v29 = vld [vmem:[#allocation2 + $0xb0] sm:$0xff]  ;;  %4690 = vmatprep.subr.bf16.mxu1 %v8006_v11 }
 0x251   : > { %1790 = vmatmul.mubr.f32.gmra.mrb[18].mxu0 %v5361_v22  ;;  %v5378_v22 = vld [vmem:[#allocation2] sm:$0xff] }
 0x252   : > { %1794 = vmatprep.mubr.f32.mxu0 %v8015_v19  ;;  %v5365_v19 = vld [vmem:[#allocation2 + $0xc8] sm:$0xff] }
 0x255   : > { %1795 = vmatmul.mubr.f32.gmra.mrb[20].mxu0 %v5362_v34 }
 0x256   : > { %1799 = vmatprep.mubr.f32.mxu0 %v8016_v9  ;;  %v5367_v9 = vld [vmem:[#allocation2 + $0xe0] sm:$0xff] }
 0x259   : > { %1800 = vmatmul.mubr.f32.gmra.mrb[22].mxu0 %v5363_v29  ;;  %v5379_v29 = vld [vmem:[#allocation2 + $0x168] sm:$0xff] }
 0x25a   : > { %1804 = vmatprep.mubr.f32.mxu0 %v8017_v33  ;;  %v5369_v33 = vld [vmem:[#allocation2 + $0xf8] sm:$0xff] }
 0x25d   : > { %1805 = vmatmul.mubr.f32.gmra.mrb[24].mxu0 %v5364_v8  ;;  %v2774_v8 = vld [vmem:[#allocation9 + $0x468] sm:$0xff] }
 0x25e   : > { %1809 = vmatprep.mubr.f32.mxu0 %v8018_v14  ;;  %v5370_v14 = vld [vmem:[#allocation2 + $0x108] sm:$0xff] }
 0x261   : > { %1810 = vmatmul.mubr.f32.gmra.mrb[26].mxu0 %v5365_v19 }
 0x262   : > { %1814 = vmatprep.mubr.f32.mxu0 %v8019_v58  ;;  %v5371_v58 = vld [vmem:[#allocation2 + $0x110] sm:$0xff] }
 0x265   : > { %1815 = vmatmul.mubr.f32.gmra.mrb[28].mxu0 %v5366_v32 }
 0x266   : > { %1819 = vmatprep.mubr.f32.mxu0 %v8020_v20  ;;  %v5372_v20 = vld [vmem:[#allocation2 + $0x120] sm:$0xff] }
 0x269   : > { %1820 = vmatmul.mubr.f32.gmra.mrb[30].mxu0 %v5367_v9 }
 0x26a   : > { %1824 = vmatprep.mubr.f32.mxu0 %v8021_v30  ;;  %v2761_v30 = vld [vmem:[#allocation9 + $0x400] sm:$0xff] }
 0x26b   : > { %v6690_v36 = vpack.c.bf16 %v2762_v46, %v2761_v30  ;;  %v850_v46 = vrot.slane %v6636_v17, 1 }
 0x26d   : > { %1825 = vmatmul.mubr.f32.gmra.mrb[32].mxu0 %v5368_v40  ;;  %8034 = vst [vmem:[#allocation14_spill] sm:$0xff] %v6690_v36  ;;  %4847 = vmatprep.subr.bf16.mxu0 %v6690_v36  ;;  %v5380_v40 = vld [vmem:[#allocation2 + $0x170] sm:$0xff] }
 0x26e   : > { %1829 = vmatprep.mubr.f32.mxu0 %v8022_v27  ;;  %v2657_v27 = vld [vmem:[#allocation9 + $0xc0] sm:$0xff]  ;;  %4849 = vmatpush3.bf16.msra.mxu0 %v6690_v36 }
 0x271   : > { %1830 = vmatmul.mubr.f32.gmra.mrb[34].mxu0 %v5369_v33  ;;  %v2665_v33 = vld [vmem:[#allocation9 + $0x100] sm:$0xff] }
 0x272   : > { %1834 = vmatprep.mubr.f32.mxu0 %v8023_v50  ;;  %v4691_v50 = vpack.c.bf16 %v2658_v25, %v2657_v27  ;;  %v2667_v25 = vld [vmem:[#allocation9 + $0x110] sm:$0xff] }
 0x274   : > { %4692 = vmatpush1.bf16.msra.mxu1 %v4691_v50  ;;  %v2668_v50 = vld [vmem:[#allocation9 + $0x118] sm:$0xff] }
 0x275   : > { %1835 = vmatmul.mubr.f32.gmra.mrb[36].mxu0 %v5370_v14  ;;  %4693 = vmatprep.subr.bf16.mxu1 %v8006_v11  ;;  %v2666_v14 = vld [vmem:[#allocation9 + $0x108] sm:$0xff] }
 0x276   : > { %1839 = vmatprep.mubr.f32.mxu0 %v8024_v42 }
 0x277   : > { %v6692_v61 = vpop.f32.mrb[0].mxu1 }
 0x278   : > { %v6694_v42 = vpop.f32.mrb[1].mxu1  ;;  %4695 = vmatpush1.bf16.msra.mxu1 %v4694_v10 }
 0x279   : > { %1840 = vmatmul.mubr.f32.gmra.mrb[38].mxu0 %v5371_v58  ;;  %4696 = vmatprep.subr.bf16.mxu1 %v8006_v11  ;;  %v2775_v58 = vld [vmem:[#allocation9 + $0x470] sm:$0xff] }
 0x27a   : > { %1844 = vmatprep.mubr.f32.mxu0 %v8025_v38  ;;  %v2763_v38 = vld [vmem:[#allocation9 + $0x410] sm:$0xff] }
 0x27b   : > { %v6705_v5 = vpop.f32.mrb[2].mxu1 }
 0x27c   : > { %v6710_v45 = vpop.f32.mrb[3].mxu1  ;;  %4698 = vmatpush1.bf16.msra.mxu1 %v4697_v57 }
 0x27d   : > { %1845 = vmatmul.mubr.f32.gmra.mrb[40].mxu0 %v5372_v20  ;;  %4699 = vmatprep.subr.bf16.mxu1 %v8006_v11  ;;  %v2776_v20 = vld [vmem:[#allocation9 + $0x478] sm:$0xff] }
 0x27e   : > { %1849 = vmatprep.mubr.f32.mxu0 %v8026_v7  ;;  %v2764_v7 = vld [vmem:[#allocation9 + $0x418] sm:$0xff]  ;;  %v6747_v30 = vpack.c.bf16 %v2776_v20, %v2775_v58 }
 0x27f   : > { %v6700_v55 = vpack.c.bf16 %v2764_v7, %v2763_v38  ;;  %v6721_v15 = vpop.f32.mrb[4].mxu1  ;;  %v2670_v38 = vld [vmem:[#allocation9 + $0x128] sm:$0xff] }
 0x280   : > { %4701 = vmatpush1.bf16.msra.mxu1 %v4700_v51  ;;  %v6726_v60 = vpop.f32.mrb[5].mxu1  ;;  %8041 = vst [vmem:[#allocation21_spill] sm:$0xff] %v6747_v30 }
 0x281   : > { %1850 = vmatmul.mubr.f32.gmra.mrb[42].mxu0 %v5373_v49  ;;  %8035 = vst [vmem:[#allocation15_spill] sm:$0xff] %v6700_v55  ;;  %4851 = vmatprep.subr.bf16.mxu0 %v6700_v55  ;;  %v2669_v49 = vld [vmem:[#allocation9 + $0x120] sm:$0xff] }
 0x282   : > { %1854 = vmatprep.mubr.f32.mxu0 %v8027_v43  ;;  %v2765_v43 = vld [vmem:[#allocation9 + $0x420] sm:$0xff]  ;;  %4853 = vmatpush3.bf16.msra.mxu0 %v6700_v55 }
 0x283   : > { %v6708_v21 = vpack.c.bf16 %v2766_v12, %v2765_v43  ;;  %4702 = vmatprep.subr.bf16.mxu1 %v8006_v11  ;;  %2842 = vmatmul.mubr.f32.vlgmr.msra.gmra.mrb[32].mxu1 %v5378_v22  ;;  %v6738_v19 = vpop.f32.mrb[6].mxu1  ;;  %v2673_v12 = vld [vmem:[#allocation9 + $0x140] sm:$0xff] }
 0x284   : > { %2846 = vmatprep.mubr.f32.mxu1 %v2379_v18  ;;  %v6742_v9 = vpop.f32.mrb[7].mxu1  ;;  %v4715_v57 = vpack.c.bf16 %v2674_v47, %v2673_v12  ;;  %v2689_v12 = vld [vmem:[#allocation9 + $0x1c0] sm:$0xff]  ;;  %v2690_v47 = vld [vmem:[#allocation9 + $0x1c8] sm:$0xff] }
 0x285   : > { %1855 = vmatmul.mubr.f32.gmra.mrb[44].mxu0 %v5374_v52  ;;  %8036 = vst [vmem:[#allocation16_spill] sm:$0xff] %v6708_v21  ;;  %4855 = vmatprep.subr.bf16.mxu0 %v6708_v21 }
 0x286   : > { %1859 = vmatprep.mubr.f32.mxu0 %v8028_v44  ;;  %v2767_v44 = vld [vmem:[#allocation9 + $0x430] sm:$0xff]  ;;  %4857 = vmatpush3.bf16.msra.mxu0 %v6708_v21 }
 0x287   : > { %v6716_v41 = vpack.c.bf16 %v2768_v59, %v2767_v44  ;;  %2847 = vmatmul.mubr.f32.gmra.mrb[34].mxu1 %v5378_v22  ;;  %v2675_v44 = vld [vmem:[#allocation9 + $0x150] sm:$0xff]  ;;  %v2676_v59 = vld [vmem:[#allocation9 + $0x158] sm:$0xff] }
 0x288   : > { %v4718_v48 = vpack.c.bf16 %v2676_v59, %v2675_v44  ;;  %v4739_v44 = vpack.c.bf16 %v2690_v47, %v2689_v12  ;;  %v2696_v47 = vld [vmem:[#allocation9 + $0x1f8] sm:$0xff] }
 0x289   : > { %1860 = vmatmul.mubr.f32.gmra.mrb[46].mxu0 %v5375_v35  ;;  %8037 = vst [vmem:[#allocation17_spill] sm:$0xff] %v6716_v41  ;;  %4859 = vmatprep.subr.bf16.mxu0 %v6716_v41 }
 0x28a   : > { %1864 = vmatprep.mubr.f32.mxu0 %v8029_v28  ;;  %v2769_v28 = vld [vmem:[#allocation9 + $0x440] sm:$0xff]  ;;  %4861 = vmatpush3.bf16.msra.mxu0 %v6716_v41 }
 0x28b   : > { %v6724_v37 = vpack.c.bf16 %v2770_v56, %v2769_v28  ;;  %v2678_v28 = vld [vmem:[#allocation9 + $0x168] sm:$0xff] }
 0x28d   : > { %1865 = vmatmul.mubr.f32.gmra.mrb[48].mxu0 %v5376_v26  ;;  %8038 = vst [vmem:[#allocation18_spill] sm:$0xff] %v6724_v37  ;;  %4863 = vmatprep.subr.bf16.mxu0 %v6724_v37  ;;  %v2677_v26 = vld [vmem:[#allocation9 + $0x160] sm:$0xff] }
 0x28e   : > { %1869 = vmatprep.mubr.f32.mxu0 %v8030_v53  ;;  %v2771_v53 = vld [vmem:[#allocation9 + $0x450] sm:$0xff]  ;;  %4865 = vmatpush3.bf16.msra.mxu0 %v6724_v37  ;;  %v4721_v13 = vpack.c.bf16 %v2678_v28, %v2677_v26 }
 0x28f   : > { %v6733_v34 = vpack.c.bf16 %v2772_v2, %v2771_v53 }
 0x291   : > { %1870 = vmatmul.mubr.f32.gmra.mrb[50].mxu0 %v5377_v39  ;;  %8039 = vst [vmem:[#allocation19_spill] sm:$0xff] %v6733_v34  ;;  %4867 = vmatprep.subr.bf16.mxu0 %v6733_v34 }
 0x292   : > { %1874 = vmatprep.mubr.f32.mxu0 %v8031_v6  ;;  %v2773_v6 = vld [vmem:[#allocation9 + $0x460] sm:$0xff]  ;;  %4869 = vmatpush3.bf16.msra.mxu0 %v6733_v34 }
 0x293   : > { %v6740_v32 = vpack.c.bf16 %v2774_v8, %v2773_v6  ;;  %v2682_v6 = vld [vmem:[#allocation9 + $0x188] sm:$0xff] }
 0x295   : > { %1875 = vmatmul.mubr.f32.gmra.mrb[52].mxu0 %v5379_v29  ;;  %8040 = vst [vmem:[#allocation20_spill] sm:$0xff] %v6740_v32  ;;  %4871 = vmatprep.subr.bf16.mxu0 %v6740_v32  ;;  %v2681_v29 = vld [vmem:[#allocation9 + $0x180] sm:$0xff] }
 0x296   : > { %1879 = vmatprep.mubr.f32.mxu0 %v8032_v3  ;;  %v4703_v3 = vpack.c.bf16 %v2666_v14, %v2665_v33  ;;  %4873 = vmatpush3.bf16.msra.mxu0 %v6740_v32  ;;  %v2683_v14 = vld [vmem:[#allocation9 + $0x190] sm:$0xff] }
 0x297   : > { %4875 = vmatprep.subr.bf16.mxu0 %v6747_v30 }
 0x298   : > { %4704 = vmatpush1.bf16.msra.mxu1 %v4703_v3  ;;  %v2684_v3 = vld [vmem:[#allocation9 + $0x198] sm:$0xff] }
 0x299   : > { %1880 = vmatmul.mubr.f32.gmra.mrb[54].mxu0 %v5380_v40  ;;  %4705 = vmatprep.subr.bf16.mxu1 %v8006_v11  ;;  %v4727_v40 = vpack.c.bf16 %v2682_v6, %v2681_v29  ;;  %v4730_v20 = vpack.c.bf16 %v2684_v3, %v2683_v14 }
 0x29a   : > { %1884 = vmatprep.mubr.f32.mxu0 %v6644_v16  ;;  %4877 = vmatpush3.bf16.msra.mxu0 %v6747_v30  ;;  %v6755_v16 = vpop.f32.mrb[8].mxu1 }
 0x29b   : > { %v6757_v27 = vpop.f32.mrb[9].mxu1 }
 0x29c   : > { %v6764_v17 = vpop.f32.mrb[10].mxu1 }
 0x29d   : > { %1885 = vmatmul.mubr.f32.gmra.mrb[56].mxu0 %v6509_v0  ;;  %v4706_v0 = vpack.c.bf16 %v2668_v50, %v2667_v25  ;;  %v6766_v7 = vpop.f32.mrb[11].mxu1  ;;  %v2685_v25 = vld [vmem:[#allocation9 + $0x1a0] sm:$0xff]  ;;  %v2686_v50 = vld [vmem:[#allocation9 + $0x1a8] sm:$0xff] }
 0x29e   : > { %1889 = vmatprep.mubr.f32.mxu0 %v6653_v24  ;;  %v851_v24 = vsel %vm601_vm0, %v6640_v62, %v850_v46  ;;  %v6769_v4 = vpop.f32.mrb[12].mxu1 }
 0x29f   : > { %4707 = vmatpush1.bf16.msra.mxu1 %v4706_v0  ;;  %v6771_v10 = vpop.f32.mrb[13].mxu1 }
 0x2a0   : > { %4708 = vmatprep.subr.bf16.mxu1 %v8006_v11  ;;  %v6774_v43 = vpop.f32.mrb[14].mxu1 }
 0x2a1   : > { %1890 = vmatmul.mubr.f32.gmra.mrb[58].mxu0 %v6517_v54  ;;  %v4709_v54 = vpack.c.bf16 %v2670_v38, %v2669_v49  ;;  %v6776_v1 = vpop.f32.mrb[15].mxu1  ;;  %v2687_v38 = vld [vmem:[#allocation9 + $0x1b0] sm:$0xff] }
 0x2a2   : > { %1894 = vmatprep.mubr.f32.mxu0 %v6640_v62  ;;  %v2672_v62 = vld [vmem:[#allocation9 + $0x138] sm:$0xff]  ;;  %v6779_v35 = vpop.f32.mrb[16].mxu1 }
 0x2a3   : > { %4710 = vmatpush1.bf16.msra.mxu1 %v4709_v54  ;;  %v4712_v52 = vpack.c.bf16 %v2672_v62, %v2671_v23  ;;  %v6781_v63 = vpop.f32.mrb[17].mxu1  ;;  %v2688_v54 = vld [vmem:[#allocation9 + $0x1b8] sm:$0xff] }
 0x2a4   : > { %4711 = vmatprep.subr.bf16.mxu1 %v8006_v11  ;;  %v6784_v51 = vpop.f32.mrb[18].mxu1  ;;  %v4736_v62 = vpack.c.bf16 %v2688_v54, %v2687_v38 }
 0x2a5   : > { %1895 = vmatmul.mubr.f32.gmra.mrb[60].mxu0 %v5378_v22  ;;  %v6786_v56 = vpop.f32.mrb[19].mxu1 }
 0x2a6   : > { %1899 = vmatprep.mubr.f32.mxu0 %v851_v24  ;;  %v6789_v39 = vpop.f32.mrb[20].mxu1  ;;  %v4733_v24 = vpack.c.bf16 %v2686_v50, %v2685_v25 }
 0x2a7   : > { %4713 = vmatpush1.bf16.msra.mxu1 %v4712_v52  ;;  %v6791_v53 = vpop.f32.mrb[21].mxu1 }
 0x2a8   : > { %4714 = vmatprep.subr.bf16.mxu1 %v8006_v11  ;;  %v6794_v18 = vpop.f32.mrb[22].mxu1 }
 0x2a9   : > { %1900 = vmatmul.mubr.f32.gmra.mrb[62].mxu0 %v5378_v22  ;;  %v2679_v22 = vld [vmem:[#allocation9 + $0x170] sm:$0xff]  ;;  %v6796_v8 = vpop.f32.mrb[23].mxu1 }
 0x2aa   : > { %v4724_v2 = vpack.c.bf16 %v2680_v31, %v2679_v22  ;;  %v6799_v33 = vpop.f32.mrb[24].mxu1  ;;  %v2692_v22 = vld [vmem:[#allocation9 + $0x1d8] sm:$0xff]  ;;  %v6828_v31 = vld [vmem:[%s7815_s4] ss:$0 sm:$0xff] }
 0x2ab   : > { %4716 = vmatpush1.bf16.msra.mxu1 %v4715_v57  ;;  %v6801_v58 = vpop.f32.mrb[25].mxu1 }
 0x2ac   : > { %4717 = vmatprep.subr.bf16.mxu1 %v8006_v11  ;;  %v6804_v46 = vpop.f32.mrb[26].mxu1 }
 0x2ad   : > { %v6806_v0 = vpop.f32.mrb[27].mxu1 }
 0x2af   : > { %4719 = vmatpush1.bf16.msra.mxu1 %v4718_v48  ;;  %v6822_v48 = vld [vmem:[%s7814_s3] ss:$0 sm:$0xff] }
 0x2b0   : > { %4720 = vmatprep.subr.bf16.mxu1 %v8006_v11 }
 0x2b2   : > { %v6809_v49 = vpop.f32.mrb[28].mxu1 }
 0x2b3   : > { %4722 = vmatpush1.bf16.msra.mxu1 %v4721_v13  ;;  %v6811_v23 = vpop.f32.mrb[29].mxu1  ;;  %v2691_v13 = vld [vmem:[#allocation9 + $0x1d0] sm:$0xff] }
 0x2b4   : > { %4723 = vmatprep.subr.bf16.mxu1 %v8006_v11 }
 0x2b7   : > { %4725 = vmatpush1.bf16.msra.mxu1 %v4724_v2  ;;  %v4742_v2 = vpack.c.bf16 %v2692_v22, %v2691_v13 }
 0x2b8   : > { %4726 = vmatprep.subr.bf16.mxu1 %v8006_v11 }
 0x2bb   : > { %4728 = vmatpush1.bf16.msra.mxu1 %v4727_v40 }
 0x2bc   : > { %4729 = vmatprep.subr.bf16.mxu1 %v8006_v11 }
 0x2bf   : > { %4731 = vmatpush1.bf16.msra.mxu1 %v4730_v20  ;;  %v2694_v20 = vld [vmem:[#allocation9 + $0x1e8] sm:$0xff] }
 0x2c0   : > { %4732 = vmatprep.subr.bf16.mxu1 %v8006_v11 }
 0x2c3   : > { %4734 = vmatpush1.bf16.msra.mxu1 %v4733_v24 }
 0x2c4   : > { %4735 = vmatprep.subr.bf16.mxu1 %v8006_v11 }
 0x2c7   : > { %4737 = vmatpush1.bf16.msra.mxu1 %v4736_v62 }
 0x2c8   : > { %4738 = vmatprep.subr.bf16.mxu1 %v8006_v11 }
 0x2cb   : > { %4740 = vmatpush1.bf16.msra.mxu1 %v4739_v44 }
 0x2cc   : > { %4741 = vmatprep.subr.bf16.mxu1 %v8006_v11 }
 0x2cf   : > { %4743 = vmatpush1.bf16.msra.mxu1 %v4742_v2 }
 0x2d0   : > { %4744 = vmatprep.subr.bf16.mxu1 %v8006_v11 }
 0x2f2   : > { %v6814_v52 = vpop.f32.mrb[30].mxu1 }
 0x2f3   : > { %v6816_v57 = vpop.f32.mrb[31].mxu1 }
 0x300   : > { %v1746_v59 = vpop.f32.mrb[0].mxu0 }
 0x301   : > { %v1972_v26 = vadd.f32 %v6694_v42, %v1746_v59  ;;  %v1748_v28 = vpop.f32.mrb[1].mxu0  ;;  %v2693_v42 = vld [vmem:[#allocation9 + $0x1e0] sm:$0xff] }
 0x302   : > { %v4745_v25 = vpack.c.bf16 %v2694_v20, %v2693_v42 }
 0x303   : > { %v2137_v29 = vmul.f32 %v6822_v48, %v1972_v26 }
 0x304   : > { %v1751_v6 = vpop.f32.mrb[2].mxu0  ;;  %4746 = vmatpush1.bf16.msra.mxu1 %v4745_v25 }
 0x305   : > { %v2176_v40 = vadd.f32 %v6828_v31, %v2137_v29  ;;  %v1977_v14 = vadd.f32 %v6692_v61, %v1751_v6  ;;  %v1753_v3 = vpop.f32.mrb[3].mxu0  ;;  %4747 = vmatprep.subr.bf16.mxu1 %v8006_v11  ;;  %v2695_v61 = vld [vmem:[#allocation9 + $0x1f0] sm:$0xff] }
 0x306   : > { %v4748_v26 = vpack.c.bf16 %v2696_v47, %v2695_v61 }
 0x307   : > { %v2208_v50 = vmax.f32 %v2176_v40, 0.0  ;;  %v2138_v24 = vmul.f32 %v6822_v48, %v1977_v14 }
 0x308   : > { %v1756_v38 = vpop.f32.mrb[4].mxu0  ;;  %4749 = vmatpush1.bf16.msra.mxu1 %v4748_v26 }
 0x309   : > { %2241 = vst [vmem:[#allocation3 + $0x19] sm:$0xff] %v2208_v50  ;;  %v2177_v54 = vadd.f32 %v6828_v31, %v2138_v24  ;;  %v1982_v62 = vadd.f32 %v6710_v45, %v1756_v38  ;;  %v1758_v12 = vpop.f32.mrb[5].mxu0  ;;  %4750 = vmatprep.subr.bf16.mxu1 %v8006_v11 }
 0x30b   : > { %v2209_v44 = vmax.f32 %v2177_v54, 0.0  ;;  %v2139_v59 = vmul.f32 %v6822_v48, %v1982_v62 }
 0x30c   : > { %v1761_v28 = vpop.f32.mrb[6].mxu0 }
 0x30d   : > { %2242 = vst [vmem:[#allocation3 + $0x21] sm:$0xff] %v2209_v44  ;;  %v2178_v13 = vadd.f32 %v6828_v31, %v2139_v59  ;;  %v1987_v22 = vadd.f32 %v6705_v5, %v1761_v28  ;;  %v1763_v2 = vpop.f32.mrb[7].mxu0 }
 0x30f   : > { %v2210_v45 = vmax.f32 %v2178_v13, 0.0  ;;  %v2140_v29 = vmul.f32 %v6822_v48, %v1987_v22 }
 0x310   : > { %v1766_v6 = vpop.f32.mrb[8].mxu0  ;;  %v6845_v42 = vld [vmem:[#allocation3 + $0x18] sm:$0xff] }
 0x311   : > { %2243 = vst [vmem:[#allocation3 + $0x31] sm:$0xff] %v2210_v45  ;;  %v2179_v40 = vadd.f32 %v6828_v31, %v2140_v29  ;;  %v1992_v14 = vadd.f32 %v6726_v60, %v1766_v6  ;;  %v1768_v3 = vpop.f32.mrb[9].mxu0  ;;  %v2380_v24 = vrot.slane %v6845_v42, 1 }
 0x313   : > { %v2211_v20 = vmax.f32 %v2179_v40, 0.0  ;;  %v2141_v25 = vmul.f32 %v6822_v48, %v1992_v14 }
 0x314   : > { %v1771_v5 = vpop.f32.mrb[10].mxu0  ;;  %v6848_v50 = vld [vmem:[#allocation3 + $0x20] sm:$0xff]  ;;  %v6851_v38 = vld [vmem:[#allocation3 + $0x28] sm:$0x3] }
 0x315   : > { %2244 = vst [vmem:[#allocation3 + $0x39] sm:$0xff] %v2211_v20  ;;  %v2180_v54 = vadd.f32 %v6828_v31, %v2141_v25  ;;  %v1997_v62 = vadd.f32 %v6721_v15, %v1771_v5  ;;  %v1773_v12 = vpop.f32.mrb[11].mxu0  ;;  %v2381_v60 = vrot.slane %v6848_v50, 1  ;;  %v2383_v61 = vrot.slane %v6851_v38, 1 }
 0x317   : > { %v2212_v47 = vmax.f32 %v2180_v54, 0.0  ;;  %v2142_v44 = vmul.f32 %v6822_v48, %v1997_v62  ;;  %v6859_v59 = vsel %vm601_vm0, %v2380_v24, %v2381_v60  ;;  %v6866_v22 = vsel %vm601_vm0, %v2381_v60, %v2383_v61 }
 0x318   : > { %8042 = vst [vmem:[#allocation22_spill] sm:$0xff] %v6859_v59  ;;  %v1776_v26 = vpop.f32.mrb[12].mxu0  ;;  %2851 = vmatprep.mubr.f32.mxu1 %v6859_v59  ;;  %8043 = vst [vmem:[#allocation23_spill] sm:$0xff] %v6866_v22  ;;  %v6868_v2 = vld [vmem:[#allocation3 + $0x30] sm:$0xff] }
 0x319   : > { %2245 = vst [vmem:[#allocation3 + $0x49] sm:$0xff] %v2212_v47  ;;  %v2181_v28 = vadd.f32 %v6828_v31, %v2142_v44  ;;  %v2002_v13 = vadd.f32 %v6742_v9, %v1776_v26  ;;  %v1778_v15 = vpop.f32.mrb[13].mxu0  ;;  %2852 = vmatmul.mubr.f32.gmra.mrb[36].mxu1 %v6845_v42  ;;  %v2385_v14 = vrot.slane %v6868_v2, 1  ;;  %v2497_v9 = vrot.slane %v6868_v2, 2 }
 0x31a   : > { %2856 = vmatprep.mubr.f32.mxu1 %v6866_v22 }
 0x31b   : > { %v2213_v45 = vmax.f32 %v2181_v28, 0.0  ;;  %v2143_v29 = vmul.f32 %v6822_v48, %v2002_v13 }
 0x31c   : > { %v1781_v6 = vpop.f32.mrb[14].mxu0  ;;  %v6872_v40 = vld [vmem:[#allocation3 + $0x38] sm:$0xff]  ;;  %v2281_v3 = vld [vmem:[#allocation3 + $0x40] sm:$0x3] }
 0x31d   : > { %2246 = vst [vmem:[#allocation3 + $0x51] sm:$0xff] %v2213_v45  ;;  %v2182_v20 = vadd.f32 %v6828_v31, %v2143_v29  ;;  %v2007_v25 = vadd.f32 %v6738_v19, %v1781_v6  ;;  %v1783_v5 = vpop.f32.mrb[15].mxu0  ;;  %2857 = vmatmul.mubr.f32.gmra.mrb[38].mxu1 %v6848_v50  ;;  %v2386_v24 = vrot.slane %v6872_v40, 1  ;;  %v2498_v54 = vrot.slane %v6872_v40, 2 }
 0x31e   : > { %v2500_v62 = vrot.slane %v2281_v3, 2  ;;  %v2388_v12 = vrot.slane %v2281_v3, 1 }
 0x31f   : > { %v2214_v60 = vmax.f32 %v2182_v20, 0.0  ;;  %v2144_v61 = vmul.f32 %v6822_v48, %v2007_v25  ;;  %v6883_v47 = vsel %vm601_vm0, %v2385_v14, %v2386_v24  ;;  %v6886_v44 = vsel %vm714_vm1, %v2497_v9, %v2498_v54 }
 0x320   : > { %8044 = vst [vmem:[#allocation24_spill] sm:$0xff] %v6883_v47  ;;  %v1786_v26 = vpop.f32.mrb[16].mxu0  ;;  %2861 = vmatprep.mubr.f32.mxu1 %v6883_v47  ;;  %4382 = vmatprep.mubr.f32.mxu0 %v6886_v44  ;;  %v6891_v19 = vsel %vm714_vm1, %v2498_v54, %v2500_v62  ;;  %v6898_v45 = vsel %vm601_vm0, %v2386_v24, %v2388_v12  ;;  %v6900_v29 = vld [vmem:[#allocation3 + $0x48] sm:$0xff] }
 0x321   : > { %2247 = vst [vmem:[#allocation3 + $0x61] sm:$0xff] %v2214_v60  ;;  %v2183_v28 = vadd.f32 %v6828_v31, %v2144_v61  ;;  %v2012_v13 = vadd.f32 %v6757_v27, %v1786_v26  ;;  %v1788_v15 = vpop.f32.mrb[17].mxu0  ;;  %2862 = vmatmul.mubr.f32.gmra.mrb[40].mxu1 %v6868_v2  ;;  %4383 = vmatmul.mubr.f32.vlgmr.msra.gmra.mrb[64].mxu0 %v6891_v19  ;;  %8045 = vst [vmem:[#allocation25_spill] sm:$0xff] %v6898_v45  ;;  %v2390_v27 = vrot.slane %v6900_v29, 1 }
 0x322   : > { %2866 = vmatprep.mubr.f32.mxu1 %v6898_v45  ;;  %v2502_v20 = vrot.slane %v6900_v29, 2 }
 0x323   : > { %v2215_v6 = vmax.f32 %v2183_v28, 0.0  ;;  %v2145_v14 = vmul.f32 %v6822_v48, %v2012_v13 }
 0x324   : > { %v1791_v9 = vpop.f32.mrb[18].mxu0  ;;  %v6904_v3 = vld [vmem:[#allocation3 + $0x50] sm:$0xff]  ;;  %v2284_v25 = vld [vmem:[#allocation3 + $0x58] sm:$0x3] }
 0x325   : > { %2248 = vst [vmem:[#allocation3 + $0x69] sm:$0xff] %v2215_v6  ;;  %v2184_v5 = vadd.f32 %v6828_v31, %v2145_v14  ;;  %v2017_v24 = vadd.f32 %v6755_v16, %v1791_v9  ;;  %v1793_v54 = vpop.f32.mrb[19].mxu0  ;;  %2867 = vmatmul.mubr.f32.gmra.mrb[42].mxu1 %v6872_v40  ;;  %v2391_v62 = vrot.slane %v6904_v3, 1  ;;  %v2503_v12 = vrot.slane %v6904_v3, 2 }
 0x326   : > { %v2505_v60 = vrot.slane %v2284_v25, 2  ;;  %v2393_v61 = vrot.slane %v2284_v25, 1 }
 0x327   : > { %v2216_v26 = vmax.f32 %v2184_v5, 0.0  ;;  %v2146_v28 = vmul.f32 %v6822_v48, %v2017_v24  ;;  %v6915_v13 = vsel %vm601_vm0, %v2390_v27, %v2391_v62  ;;  %v6918_v15 = vsel %vm714_vm1, %v2502_v20, %v2503_v12 }
 0x328   : > { %8046 = vst [vmem:[#allocation26_spill] sm:$0xff] %v6915_v13  ;;  %v1796_v6 = vpop.f32.mrb[20].mxu0  ;;  %2871 = vmatprep.mubr.f32.mxu1 %v6915_v13  ;;  %4385 = vmatprep.mubr.f32.mxu0 %v6918_v15  ;;  %v6923_v16 = vsel %vm714_vm1, %v2503_v12, %v2505_v60  ;;  %v6930_v27 = vsel %vm601_vm0, %v2391_v62, %v2393_v61  ;;  %v6932_v20 = vld [vmem:[#allocation3 + $0x60] sm:$0xff] }
 0x329   : > { %2249 = vst [vmem:[#allocation3 + $0x79] sm:$0xff] %v2216_v26  ;;  %v2185_v14 = vadd.f32 %v6828_v31, %v2146_v28  ;;  %v2022_v9 = vadd.f32 %v6766_v7, %v1796_v6  ;;  %v1798_v25 = vpop.f32.mrb[21].mxu0  ;;  %2872 = vmatmul.mubr.f32.gmra.mrb[44].mxu1 %v6900_v29  ;;  %4386 = vmatmul.mubr.f32.gmra.mrb[66].mxu0 %v6923_v16  ;;  %8047 = vst [vmem:[#allocation27_spill] sm:$0xff] %v6930_v27  ;;  %v2395_v7 = vrot.slane %v6932_v20, 1 }
 0x32a   : > { %2876 = vmatprep.mubr.f32.mxu1 %v6930_v27  ;;  %v2507_v60 = vrot.slane %v6932_v20, 2 }
 0x32b   : > { %v2217_v5 = vmax.f32 %v2185_v14, 0.0  ;;  %v2147_v24 = vmul.f32 %v6822_v48, %v2022_v9 }
 0x32c   : > { %v1801_v54 = vpop.f32.mrb[22].mxu0  ;;  %v6936_v12 = vld [vmem:[#allocation3 + $0x68] sm:$0xff]  ;;  %v2287_v26 = vld [vmem:[#allocation3 + $0x70] sm:$0x3] }
 0x32d   : > { %2250 = vst [vmem:[#allocation3 + $0x81] sm:$0xff] %v2217_v5  ;;  %v2186_v28 = vadd.f32 %v6828_v31, %v2147_v24  ;;  %v2027_v62 = vadd.f32 %v6764_v17, %v1801_v54  ;;  %v1803_v61 = vpop.f32.mrb[23].mxu0  ;;  %2877 = vmatmul.mubr.f32.gmra.mrb[46].mxu1 %v6904_v3  ;;  %v2396_v6 = vrot.slane %v6936_v12, 1  ;;  %v2508_v14 = vrot.slane %v6936_v12, 2 }
 0x32e   : > { %v2510_v9 = vrot.slane %v2287_v26, 2  ;;  %v2398_v25 = vrot.slane %v2287_v26, 1 }
 0x32f   : > { %v2218_v30 = vmax.f32 %v2186_v28, 0.0  ;;  %v2148_v32 = vmul.f32 %v6822_v48, %v2027_v62  ;;  %v6947_v34 = vsel %vm601_vm0, %v2395_v7, %v2396_v6  ;;  %v6950_v5 = vsel %vm714_vm1, %v2507_v60, %v2508_v14 }
 0x330   : > { %8048 = vst [vmem:[#allocation28_spill] sm:$0xff] %v6947_v34  ;;  %v1806_v24 = vpop.f32.mrb[24].mxu0  ;;  %2881 = vmatprep.mubr.f32.mxu1 %v6947_v34  ;;  %4388 = vmatprep.mubr.f32.mxu0 %v6950_v5  ;;  %v6955_v17 = vsel %vm714_vm1, %v2508_v14, %v2510_v9  ;;  %v6962_v7 = vsel %vm601_vm0, %v2396_v6, %v2398_v25  ;;  %v6964_v60 = vld [vmem:[#allocation3 + $0x78] sm:$0xff] }
 0x331   : > { %2251 = vst [vmem:[#allocation3 + $0x91] sm:$0xff] %v2218_v30  ;;  %v2187_v54 = vadd.f32 %v6828_v31, %v2148_v32  ;;  %v2032_v26 = vadd.f32 %v6771_v10, %v1806_v24  ;;  %v1808_v28 = vpop.f32.mrb[25].mxu0  ;;  %2882 = vmatmul.mubr.f32.gmra.mrb[48].mxu1 %v6932_v20  ;;  %4389 = vmatmul.mubr.f32.gmra.mrb[68].mxu0 %v6955_v17  ;;  %8049 = vst [vmem:[#allocation29_spill] sm:$0xff] %v6962_v7  ;;  %v2400_v32 = vrot.slane %v6964_v60, 1 }
 0x332   : > { %2886 = vmatprep.mubr.f32.mxu1 %v6962_v7  ;;  %v2512_v10 = vrot.slane %v6964_v60, 2 }
 0x333   : > { %v2219_v62 = vmax.f32 %v2187_v54, 0.0  ;;  %v2149_v61 = vmul.f32 %v6822_v48, %v2032_v26 }
 0x334   : > { %v1811_v30 = vpop.f32.mrb[26].mxu0  ;;  %v6968_v14 = vld [vmem:[#allocation3 + $0x80] sm:$0xff]  ;;  %v2290_v9 = vld [vmem:[#allocation3 + $0x88] sm:$0x3] }
 0x335   : > { %2252 = vst [vmem:[#allocation3 + $0x99] sm:$0xff] %v2219_v62  ;;  %v2188_v24 = vadd.f32 %v6828_v31, %v2149_v61  ;;  %v2037_v6 = vadd.f32 %v6769_v4, %v1811_v30  ;;  %v1813_v25 = vpop.f32.mrb[27].mxu0  ;;  %2887 = vmatmul.mubr.f32.gmra.mrb[50].mxu1 %v6936_v12  ;;  %v2401_v54 = vrot.slane %v6968_v14, 1  ;;  %v2513_v26 = vrot.slane %v6968_v14, 2 }
 0x336   : > { %v2515_v28 = vrot.slane %v2290_v9, 2  ;;  %v2403_v37 = vrot.slane %v2290_v9, 1 }
 0x337   : > { %v2220_v41 = vmax.f32 %v2188_v24, 0.0  ;;  %v2150_v21 = vmul.f32 %v6822_v48, %v2037_v6  ;;  %v6979_v55 = vsel %vm601_vm0, %v2400_v32, %v2401_v54  ;;  %v6982_v62 = vsel %vm714_vm1, %v2512_v10, %v2513_v26 }
 0x338   : > { %8050 = vst [vmem:[#allocation30_spill] sm:$0xff] %v6979_v55  ;;  %v1816_v61 = vpop.f32.mrb[28].mxu0  ;;  %2891 = vmatprep.mubr.f32.mxu1 %v6979_v55  ;;  %4391 = vmatprep.mubr.f32.mxu0 %v6982_v62  ;;  %v6987_v4 = vsel %vm714_vm1, %v2513_v26, %v2515_v28  ;;  %v6994_v32 = vsel %vm601_vm0, %v2401_v54, %v2403_v37  ;;  %v6996_v10 = vld [vmem:[#allocation3 + $0x90] sm:$0xff] }
 0x339   : > { %2253 = vst [vmem:[#allocation3 + $0xa9] sm:$0xff] %v2220_v41  ;;  %v2189_v30 = vadd.f32 %v6828_v31, %v2150_v21  ;;  %v2042_v9 = vadd.f32 %v6776_v1, %v1816_v61  ;;  %v1818_v24 = vpop.f32.mrb[29].mxu0  ;;  %2892 = vmatmul.mubr.f32.gmra.mrb[52].mxu1 %v6964_v60  ;;  %4392 = vmatmul.mubr.f32.gmra.mrb[70].mxu0 %v6987_v4  ;;  %8051 = vst [vmem:[#allocation31_spill] sm:$0xff] %v6994_v32  ;;  %v2405_v21 = vrot.slane %v6996_v10, 1 }
 0x33a   : > { %2896 = vmatprep.mubr.f32.mxu1 %v6994_v32  ;;  %v2517_v1 = vrot.slane %v6996_v10, 2 }
 0x33b   : > { %v2221_v6 = vmax.f32 %v2189_v30, 0.0  ;;  %v2151_v25 = vmul.f32 %v6822_v48, %v2042_v9 }
 0x33c   : > { %v1821_v41 = vpop.f32.mrb[30].mxu0  ;;  %v7000_v26 = vld [vmem:[#allocation3 + $0x98] sm:$0xff]  ;;  %v2293_v28 = vld [vmem:[#allocation3 + $0xa0] sm:$0x3] }
 0x33d   : > { %2254 = vst [vmem:[#allocation3 + $0xb1] sm:$0xff] %v2221_v6  ;;  %v2190_v61 = vadd.f32 %v6828_v31, %v2151_v25  ;;  %v2047_v37 = vadd.f32 %v6774_v43, %v1821_v41  ;;  %v1823_v54 = vpop.f32.mrb[31].mxu0  ;;  %2897 = vmatmul.mubr.f32.gmra.mrb[54].mxu1 %v6968_v14  ;;  %v2406_v30 = vrot.slane %v7000_v26, 1  ;;  %v2518_v9 = vrot.slane %v7000_v26, 2 }
 0x33e   : > { %v2520_v24 = vrot.slane %v2293_v28, 2  ;;  %v2408_v36 = vrot.slane %v2293_v28, 1 }
 0x33f   : > { %v2222_v32 = vmax.f32 %v2190_v61, 0.0  ;;  %v2152_v55 = vmul.f32 %v6822_v48, %v2047_v37  ;;  %v7011_v7 = vsel %vm601_vm0, %v2405_v21, %v2406_v30  ;;  %v7014_v6 = vsel %vm714_vm1, %v2517_v1, %v2518_v9 }
 0x340   : > { %8052 = vst [vmem:[#allocation32_spill] sm:$0xff] %v7011_v7  ;;  %v1826_v25 = vpop.f32.mrb[32].mxu0  ;;  %2901 = vmatprep.mubr.f32.mxu1 %v7011_v7  ;;  %4394 = vmatprep.mubr.f32.mxu0 %v7014_v6  ;;  %v7019_v43 = vsel %vm714_vm1, %v2518_v9, %v2520_v24  ;;  %v7026_v21 = vsel %vm601_vm0, %v2406_v30, %v2408_v36  ;;  %v7028_v1 = vld [vmem:[#allocation3 + $0xa8] sm:$0xff] }
 0x341   : > { %2255 = vst [vmem:[#allocation3 + $0xc1] sm:$0xff] %v2222_v32  ;;  %v2191_v41 = vadd.f32 %v6828_v31, %v2152_v55  ;;  %v2052_v28 = vadd.f32 %v6781_v63, %v1826_v25  ;;  %v1828_v61 = vpop.f32.mrb[33].mxu0  ;;  %2902 = vmatmul.mubr.f32.gmra.mrb[56].mxu1 %v6996_v10  ;;  %4395 = vmatmul.mubr.f32.gmra.mrb[72].mxu0 %v7019_v43  ;;  %8053 = vst [vmem:[#allocation33_spill] sm:$0xff] %v7026_v21  ;;  %v2410_v55 = vrot.slane %v7028_v1, 1 }
 0x342   : > { %2906 = vmatprep.mubr.f32.mxu1 %v7026_v21  ;;  %v2522_v63 = vrot.slane %v7028_v1, 2 }
 0x343   : > { %v2223_v37 = vmax.f32 %v2191_v41, 0.0  ;;  %v2153_v54 = vmul.f32 %v6822_v48, %v2052_v28 }
 0x344   : > { %v1831_v32 = vpop.f32.mrb[34].mxu0  ;;  %v7032_v9 = vld [vmem:[#allocation3 + $0xb0] sm:$0xff]  ;;  %v2296_v24 = vld [vmem:[#allocation3 + $0xb8] sm:$0x3] }
 0x345   : > { %2256 = vst [vmem:[#allocation3 + $0xc9] sm:$0xff] %v2223_v37  ;;  %v2192_v25 = vadd.f32 %v6828_v31, %v2153_v54  ;;  %v2057_v36 = vadd.f32 %v6779_v35, %v1831_v32  ;;  %v1833_v30 = vpop.f32.mrb[35].mxu0  ;;  %2907 = vmatmul.mubr.f32.gmra.mrb[58].mxu1 %v7000_v26  ;;  %v2411_v41 = vrot.slane %v7032_v9, 1  ;;  %v2523_v28 = vrot.slane %v7032_v9, 2 }
 0x346   : > { %v2525_v61 = vrot.slane %v2296_v24, 2  ;;  %v2413_v21 = vrot.slane %v2296_v24, 1 }
 0x347   : > { %v2224_v7 = vmax.f32 %v2192_v25, 0.0  ;;  %v2154_v34 = vmul.f32 %v6822_v48, %v2057_v36  ;;  %v7043_v27 = vsel %vm601_vm0, %v2410_v55, %v2411_v41  ;;  %v7046_v37 = vsel %vm714_vm1, %v2522_v63, %v2523_v28 }
 0x348   : > { %8054 = vst [vmem:[#allocation34_spill] sm:$0xff] %v7043_v27  ;;  %v1836_v54 = vpop.f32.mrb[36].mxu0  ;;  %2911 = vmatprep.mubr.f32.mxu1 %v7043_v27  ;;  %4397 = vmatprep.mubr.f32.mxu0 %v7046_v37  ;;  %v7051_v35 = vsel %vm714_vm1, %v2523_v28, %v2525_v61  ;;  %v7058_v55 = vsel %vm601_vm0, %v2411_v41, %v2413_v21  ;;  %v7060_v63 = vld [vmem:[#allocation3 + $0xc0] sm:$0xff] }
 0x349   : > { %2257 = vst [vmem:[#allocation3 + $0xd9] sm:$0xff] %v2224_v7  ;;  %v2193_v32 = vadd.f32 %v6828_v31, %v2154_v34  ;;  %v2062_v24 = vadd.f32 %v6786_v56, %v1836_v54  ;;  %v1838_v25 = vpop.f32.mrb[37].mxu0  ;;  %2912 = vmatmul.mubr.f32.gmra.mrb[60].mxu1 %v7028_v1  ;;  %4398 = vmatmul.mubr.f32.gmra.mrb[74].mxu0 %v7051_v35  ;;  %8055 = vst [vmem:[#allocation35_spill] sm:$0xff] %v7058_v55  ;;  %v2415_v34 = vrot.slane %v7060_v63, 1 }
 0x34a   : > { %2916 = vmatprep.mubr.f32.mxu1 %v7058_v55  ;;  %v2527_v56 = vrot.slane %v7060_v63, 2 }
 0x34b   : > { %v2225_v36 = vmax.f32 %v2193_v32, 0.0  ;;  %v2155_v30 = vmul.f32 %v6822_v48, %v2062_v24 }
 0x34c   : > { %v1841_v7 = vpop.f32.mrb[38].mxu0  ;;  %v7064_v28 = vld [vmem:[#allocation3 + $0xc8] sm:$0xff]  ;;  %v2299_v61 = vld [vmem:[#allocation3 + $0xd0] sm:$0x3] }
 0x34d   : > { %2258 = vst [vmem:[#allocation3 + $0xe1] sm:$0xff] %v2225_v36  ;;  %v2194_v54 = vadd.f32 %v6828_v31, %v2155_v30  ;;  %v2067_v21 = vadd.f32 %v6784_v51, %v1841_v7  ;;  %v1843_v41 = vpop.f32.mrb[39].mxu0  ;;  %2917 = vmatmul.mubr.f32.gmra.mrb[62].mxu1 %v7032_v9  ;;  %v2416_v32 = vrot.slane %v7064_v28, 1  ;;  %v2528_v24 = vrot.slane %v7064_v28, 2 }
 0x34e   : > { %v2530_v25 = vrot.slane %v2299_v61, 2  ;;  %v2418_v55 = vrot.slane %v2299_v61, 1 }
 0x34f   : > { %v2226_v27 = vmax.f32 %v2194_v54, 0.0  ;;  %v2156_v13 = vmul.f32 %v6822_v48, %v2067_v21  ;;  %v7075_v45 = vsel %vm601_vm0, %v2415_v34, %v2416_v32  ;;  %v7078_v36 = vsel %vm714_vm1, %v2527_v56, %v2528_v24 }
 0x350   : > { %8056 = vst [vmem:[#allocation36_spill] sm:$0xff] %v7075_v45  ;;  %v1846_v30 = vpop.f32.mrb[40].mxu0  ;;  %2921 = vmatprep.mubr.f32.mxu1 %v7075_v45  ;;  %4400 = vmatprep.mubr.f32.mxu0 %v7078_v36  ;;  %v7083_v51 = vsel %vm714_vm1, %v2528_v24, %v2530_v25  ;;  %v7090_v34 = vsel %vm601_vm0, %v2416_v32, %v2418_v55  ;;  %v7092_v56 = vld [vmem:[#allocation3 + $0xd8] sm:$0xff] }
 0x351   : > { %2259 = vst [vmem:[#allocation3 + $0xf1] sm:$0xff] %v2226_v27  ;;  %v2195_v7 = vadd.f32 %v6828_v31, %v2156_v13  ;;  %v2072_v61 = vadd.f32 %v6791_v53, %v1846_v30  ;;  %v1848_v54 = vpop.f32.mrb[41].mxu0  ;;  %2922 = vmatmul.mubr.f32.gmra.mrb[64].mxu1 %v7060_v63  ;;  %4401 = vmatmul.mubr.f32.gmra.mrb[76].mxu0 %v7083_v51  ;;  %8057 = vst [vmem:[#allocation37_spill] sm:$0xff] %v7090_v34  ;;  %v2420_v53 = vrot.slane %v7092_v56, 1 }
 0x352   : > { %2926 = vmatprep.mubr.f32.mxu1 %v7090_v34  ;;  %v2532_v13 = vrot.slane %v7092_v56, 2 }
 0x353   : > { %v2227_v21 = vmax.f32 %v2195_v7, 0.0  ;;  %v2157_v41 = vmul.f32 %v6822_v48, %v2072_v61 }
 0x354   : > { %v1851_v27 = vpop.f32.mrb[42].mxu0  ;;  %v7096_v24 = vld [vmem:[#allocation3 + $0xe0] sm:$0xff]  ;;  %v2302_v25 = vld [vmem:[#allocation3 + $0xe8] sm:$0x3] }
 0x355   : > { %2260 = vst [vmem:[#allocation3 + $0xf9] sm:$0xff] %v2227_v21  ;;  %v2196_v30 = vadd.f32 %v6828_v31, %v2157_v41  ;;  %v2077_v55 = vadd.f32 %v6789_v39, %v1851_v27  ;;  %v1853_v32 = vpop.f32.mrb[43].mxu0  ;;  %2927 = vmatmul.mubr.f32.gmra.mrb[66].mxu1 %v7064_v28  ;;  %v2421_v7 = vrot.slane %v7096_v24, 1  ;;  %v2533_v61 = vrot.slane %v7096_v24, 2 }
 0x356   : > { %v2535_v54 = vrot.slane %v2302_v25, 2  ;;  %v2423_v34 = vrot.slane %v2302_v25, 1 }
 0x357   : > { %v2228_v45 = vmax.f32 %v2196_v30, 0.0  ;;  %v2158_v47 = vmul.f32 %v6822_v48, %v2077_v55  ;;  %v7107_v22 = vsel %vm601_vm0, %v2420_v53, %v2421_v7  ;;  %v7110_v21 = vsel %vm714_vm1, %v2532_v13, %v2533_v61 }
 0x358   : > { %8058 = vst [vmem:[#allocation38_spill] sm:$0xff] %v7107_v22  ;;  %v1856_v41 = vpop.f32.mrb[44].mxu0  ;;  %2931 = vmatprep.mubr.f32.mxu1 %v7107_v22  ;;  %4403 = vmatprep.mubr.f32.mxu0 %v7110_v21  ;;  %v7115_v39 = vsel %vm714_vm1, %v2533_v61, %v2535_v54  ;;  %v7122_v53 = vsel %vm601_vm0, %v2421_v7, %v2423_v34  ;;  %v7124_v13 = vld [vmem:[#allocation3 + $0xf0] sm:$0xff] }
 0x359   : > { %8059 = vst [vmem:[#allocation39_spill] sm:$0xff] %v7115_v39  ;;  %2261 = vst [vmem:[#allocation3 + $0x109] sm:$0xff] %v2228_v45  ;;  %v2197_v27 = vadd.f32 %v6828_v31, %v2158_v47  ;;  %v2082_v25 = vadd.f32 %v6796_v8, %v1856_v41  ;;  %v1858_v30 = vpop.f32.mrb[45].mxu0  ;;  %2932 = vmatmul.mubr.f32.gmra.mrb[68].mxu1 %v7092_v56  ;;  %4404 = vmatmul.mubr.f32.gmra.mrb[78].mxu0 %v7115_v39  ;;  %v2425_v8 = vrot.slane %v7124_v13, 1 }
 0x35a   : > { %8060 = vst [vmem:[#allocation40_spill] sm:$0xff] %v7122_v53  ;;  %2936 = vmatprep.mubr.f32.mxu1 %v7122_v53  ;;  %v2537_v47 = vrot.slane %v7124_v13, 2 }
 0x35b   : > { %v2229_v55 = vmax.f32 %v2197_v27, 0.0  ;;  %v2159_v32 = vmul.f32 %v6822_v48, %v2082_v25 }
 0x35c   : > { %v1861_v45 = vpop.f32.mrb[46].mxu0  ;;  %v7128_v61 = vld [vmem:[#allocation3 + $0xf8] sm:$0xff]  ;;  %v2305_v54 = vld [vmem:[#allocation3 + $0x100] sm:$0x3] }
 0x35d   : > { %2262 = vst [vmem:[#allocation3 + $0x111] sm:$0xff] %v2229_v55  ;;  %v2198_v41 = vadd.f32 %v6828_v31, %v2159_v32  ;;  %v2087_v34 = vadd.f32 %v6794_v18, %v1861_v45  ;;  %v1863_v7 = vpop.f32.mrb[47].mxu0  ;;  %2937 = vmatmul.mubr.f32.gmra.mrb[70].mxu1 %v7096_v24  ;;  %v2426_v27 = vrot.slane %v7128_v61, 1  ;;  %v2538_v25 = vrot.slane %v7128_v61, 2 }
 0x35e   : > { %v2540_v30 = vrot.slane %v2305_v54, 2  ;;  %v2428_v53 = vrot.slane %v2305_v54, 1 }
 0x35f   : > { %v2230_v22 = vmax.f32 %v2198_v41, 0.0  ;;  %v2160_v59 = vmul.f32 %v6822_v48, %v2087_v34  ;;  %v7139_v39 = vsel %vm601_vm0, %v2425_v8, %v2426_v27  ;;  %v7142_v55 = vsel %vm714_vm1, %v2537_v47, %v2538_v25 }
 0x360   : > { %8061 = vst [vmem:[#allocation41_spill] sm:$0xff] %v7139_v39  ;;  %8062 = vst [vmem:[#allocation42_spill] sm:$0xff] %v7142_v55  ;;  %v1866_v32 = vpop.f32.mrb[48].mxu0  ;;  %2941 = vmatprep.mubr.f32.mxu1 %v7139_v39  ;;  %4406 = vmatprep.mubr.f32.mxu0 %v7142_v55  ;;  %v7147_v18 = vsel %vm714_vm1, %v2538_v25, %v2540_v30  ;;  %v7154_v8 = vsel %vm601_vm0, %v2426_v27, %v2428_v53  ;;  %v7156_v47 = vld [vmem:[#allocation3 + $0x108] sm:$0xff] }
 0x361   : > { %8063 = vst [vmem:[#allocation43_spill] sm:$0xff] %v7147_v18  ;;  %2263 = vst [vmem:[#allocation3 + $0x121] sm:$0xff] %v2230_v22  ;;  %v2199_v45 = vadd.f32 %v6828_v31, %v2160_v59  ;;  %v2092_v54 = vadd.f32 %v6801_v58, %v1866_v32  ;;  %v1868_v41 = vpop.f32.mrb[49].mxu0  ;;  %2942 = vmatmul.mubr.f32.gmra.mrb[72].mxu1 %v7124_v13  ;;  %4407 = vmatmul.mubr.f32.gmra.mrb[80].mxu0 %v7147_v18  ;;  %v2430_v58 = vrot.slane %v7156_v47, 1 }
 0x362   : > { %8064 = vst [vmem:[#allocation44_spill] sm:$0xff] %v7154_v8  ;;  %2946 = vmatprep.mubr.f32.mxu1 %v7154_v8  ;;  %v2542_v59 = vrot.slane %v7156_v47, 2 }
 0x363   : > { %v2231_v34 = vmax.f32 %v2199_v45, 0.0  ;;  %v2161_v7 = vmul.f32 %v6822_v48, %v2092_v54 }
 0x364   : > { %v1871_v22 = vpop.f32.mrb[50].mxu0  ;;  %v7160_v25 = vld [vmem:[#allocation3 + $0x110] sm:$0xff]  ;;  %v2308_v30 = vld [vmem:[#allocation3 + $0x118] sm:$0x3] }
 0x365   : > { %2264 = vst [vmem:[#allocation3 + $0x129] sm:$0xff] %v2231_v34  ;;  %v2200_v32 = vadd.f32 %v6828_v31, %v2161_v7  ;;  %v2097_v53 = vadd.f32 %v6799_v33, %v1871_v22  ;;  %v1873_v27 = vpop.f32.mrb[51].mxu0  ;;  %2947 = vmatmul.mubr.f32.gmra.mrb[74].mxu1 %v7128_v61  ;;  %v2431_v45 = vrot.slane %v7160_v25, 1  ;;  %v2543_v54 = vrot.slane %v7160_v25, 2 }
 0x366   : > { %v2545_v41 = vrot.slane %v2308_v30, 2  ;;  %v2433_v8 = vrot.slane %v2308_v30, 1 }
 0x367   : > { %v2232_v39 = vmax.f32 %v2200_v32, 0.0  ;;  %v2162_v18 = vmul.f32 %v6822_v48, %v2097_v53  ;;  %v7171_v55 = vsel %vm601_vm0, %v2430_v58, %v2431_v45  ;;  %v7174_v34 = vsel %vm714_vm1, %v2542_v59, %v2543_v54 }
 0x368   : > { %8065 = vst [vmem:[#allocation45_spill] sm:$0xff] %v7171_v55  ;;  %8066 = vst [vmem:[#allocation46_spill] sm:$0xff] %v7174_v34  ;;  %v1876_v7 = vpop.f32.mrb[52].mxu0  ;;  %2951 = vmatprep.mubr.f32.mxu1 %v7171_v55  ;;  %4409 = vmatprep.mubr.f32.mxu0 %v7174_v34  ;;  %v7179_v33 = vsel %vm714_vm1, %v2543_v54, %v2545_v41  ;;  %v7186_v58 = vsel %vm601_vm0, %v2431_v45, %v2433_v8  ;;  %v7188_v59 = vld [vmem:[#allocation3 + $0x120] sm:$0xff] }
 0x369   : > { %8067 = vst [vmem:[#allocation47_spill] sm:$0xff] %v7179_v33  ;;  %2265 = vst [vmem:[#allocation3 + $0x139] sm:$0xff] %v2232_v39  ;;  %v2201_v22 = vadd.f32 %v6828_v31, %v2162_v18  ;;  %v2102_v30 = vadd.f32 %v6806_v0, %v1876_v7  ;;  %v1878_v32 = vpop.f32.mrb[53].mxu0  ;;  %2952 = vmatmul.mubr.f32.gmra.mrb[76].mxu1 %v7156_v47  ;;  %4410 = vmatmul.mubr.f32.gmra.mrb[82].mxu0 %v7179_v33  ;;  %v2435_v0 = vrot.slane %v7188_v59, 1 }
 0x36a   : > { %8068 = vst [vmem:[#allocation48_spill] sm:$0xff] %v7186_v58  ;;  %2956 = vmatprep.mubr.f32.mxu1 %v7186_v58  ;;  %v2547_v18 = vrot.slane %v7188_v59, 2 }
 0x36b   : > { %v2233_v53 = vmax.f32 %v2201_v22, 0.0  ;;  %v2163_v27 = vmul.f32 %v6822_v48, %v2102_v30 }
 0x36c   : > { %v1881_v39 = vpop.f32.mrb[54].mxu0  ;;  %v7192_v54 = vld [vmem:[#allocation3 + $0x128] sm:$0xff]  ;;  %v2311_v41 = vld [vmem:[#allocation3 + $0x130] sm:$0x3] }
 0x36d   : > { %2266 = vst [vmem:[#allocation3 + $0x141] sm:$0xff] %v2233_v53  ;;  %v2202_v7 = vadd.f32 %v6828_v31, %v2163_v27  ;;  %v2107_v8 = vadd.f32 %v6804_v46, %v1881_v39  ;;  %v1883_v45 = vpop.f32.mrb[55].mxu0  ;;  %2957 = vmatmul.mubr.f32.gmra.mrb[78].mxu1 %v7160_v25  ;;  %v2436_v22 = vrot.slane %v7192_v54, 1  ;;  %v2548_v30 = vrot.slane %v7192_v54, 2 }
 0x36e   : > { %v2550_v32 = vrot.slane %v2311_v41, 2  ;;  %v2438_v58 = vrot.slane %v2311_v41, 1 }
 0x36f   : > { %v2234_v55 = vmax.f32 %v2202_v7, 0.0  ;;  %v2164_v33 = vmul.f32 %v6822_v48, %v2107_v8  ;;  %v7203_v34 = vsel %vm601_vm0, %v2435_v0, %v2436_v22  ;;  %v7206_v53 = vsel %vm714_vm1, %v2547_v18, %v2548_v30 }
 0x370   : > { %8069 = vst [vmem:[#allocation49_spill] sm:$0xff] %v7203_v34  ;;  %8070 = vst [vmem:[#allocation50_spill] sm:$0xff] %v7206_v53  ;;  %v1886_v27 = vpop.f32.mrb[56].mxu0  ;;  %2961 = vmatprep.mubr.f32.mxu1 %v7203_v34  ;;  %4412 = vmatprep.mubr.f32.mxu0 %v7206_v53  ;;  %v7211_v46 = vsel %vm714_vm1, %v2548_v30, %v2550_v32  ;;  %v7218_v0 = vsel %vm601_vm0, %v2436_v22, %v2438_v58  ;;  %v7220_v18 = vld [vmem:[#allocation3 + $0x138] sm:$0xff] }
 0x371   : > { %8071 = vst [vmem:[#allocation51_spill] sm:$0xff] %v7211_v46  ;;  %2267 = vst [vmem:[#allocation3 + $0x151] sm:$0xff] %v2234_v55  ;;  %v2203_v39 = vadd.f32 %v6828_v31, %v2164_v33  ;;  %v2112_v41 = vadd.f32 %v6811_v23, %v1886_v27  ;;  %v1888_v7 = vpop.f32.mrb[57].mxu0  ;;  %2962 = vmatmul.mubr.f32.gmra.mrb[80].mxu1 %v7188_v59  ;;  %4413 = vmatmul.mubr.f32.gmra.mrb[84].mxu0 %v7211_v46  ;;  %v2440_v23 = vrot.slane %v7220_v18, 1 }
 0x372   : > { %8072 = vst [vmem:[#allocation52_spill] sm:$0xff] %v7218_v0  ;;  %2966 = vmatprep.mubr.f32.mxu1 %v7218_v0  ;;  %v2552_v33 = vrot.slane %v7220_v18, 2 }
 0x373   : > { %v2235_v8 = vmax.f32 %v2203_v39, 0.0  ;;  %v2165_v45 = vmul.f32 %v6822_v48, %v2112_v41 }
 0x374   : > { %v1891_v55 = vpop.f32.mrb[58].mxu0  ;;  %v7224_v30 = vld [vmem:[#allocation3 + $0x140] sm:$0xff]  ;;  %v2314_v32 = vld [vmem:[#allocation3 + $0x148] sm:$0x3] }
 0x375   : > { %2268 = vst [vmem:[#allocation3 + $0x159] sm:$0xff] %v2235_v8  ;;  %v2204_v27 = vadd.f32 %v6828_v31, %v2165_v45  ;;  %v2117_v58 = vadd.f32 %v6809_v49, %v1891_v55  ;;  %v1893_v22 = vpop.f32.mrb[59].mxu0  ;;  %2967 = vmatmul.mubr.f32.gmra.mrb[82].mxu1 %v7192_v54  ;;  %v2441_v39 = vrot.slane %v7224_v30, 1  ;;  %v2553_v41 = vrot.slane %v7224_v30, 2 }
 0x376   : > { %v2555_v7 = vrot.slane %v2314_v32, 2  ;;  %v2443_v0 = vrot.slane %v2314_v32, 1 }
 0x377   : > { %v2236_v34 = vmax.f32 %v2204_v27, 0.0  ;;  %v2166_v46 = vmul.f32 %v6822_v48, %v2117_v58  ;;  %v7235_v53 = vsel %vm601_vm0, %v2440_v23, %v2441_v39  ;;  %v7238_v8 = vsel %vm714_vm1, %v2552_v33, %v2553_v41 }
 0x378   : > { %8073 = vst [vmem:[#allocation53_spill] sm:$0xff] %v7235_v53  ;;  %v1896_v45 = vpop.f32.mrb[60].mxu0  ;;  %2971 = vmatprep.mubr.f32.mxu1 %v7235_v53  ;;  %4415 = vmatprep.mubr.f32.mxu0 %v7238_v8  ;;  %v7243_v49 = vsel %vm714_vm1, %v2553_v41, %v2555_v7  ;;  %v7250_v23 = vsel %vm601_vm0, %v2441_v39, %v2443_v0  ;;  %v7252_v33 = vld [vmem:[#allocation3 + $0x150] sm:$0xff]  ;;  %v2493_v53 = vrot.slane %v6848_v50, 2 }
 0x379   : > { %2269 = vst [vmem:[#allocation3 + $0x169] sm:$0xff] %v2236_v34  ;;  %v2205_v55 = vadd.f32 %v6828_v31, %v2166_v46  ;;  %v2122_v32 = vadd.f32 %v6816_v57, %v1896_v45  ;;  %v1898_v27 = vpop.f32.mrb[61].mxu0  ;;  %2972 = vmatmul.mubr.f32.gmra.mrb[84].mxu1 %v7220_v18  ;;  %4416 = vmatmul.mubr.f32.gmra.mrb[86].mxu0 %v7243_v49  ;;  %8074 = vst [vmem:[#allocation54_spill] sm:$0xff] %v7250_v23  ;;  %v2445_v57 = vrot.slane %v7252_v33, 1 }
 0x37a   : > { %2976 = vmatprep.mubr.f32.mxu1 %v7250_v23 }
 0x37b   : > { %v2237_v58 = vmax.f32 %v2205_v55, 0.0  ;;  %v2167_v22 = vmul.f32 %v6822_v48, %v2122_v32 }
 0x37c   : > { %v1901_v34 = vpop.f32.mrb[62].mxu0  ;;  %v7256_v41 = vld [vmem:[#allocation3 + $0x158] sm:$0xff]  ;;  %v7259_v46 = vld [vmem:[#allocation3 + $0x160] sm:$0x3] }
 0x37d   : > { %2270 = vst [vmem:[#allocation3 + $0x171] sm:$0xff] %v2237_v58  ;;  %v2206_v7 = vadd.f32 %v6828_v31, %v2167_v22  ;;  %v2127_v0 = vadd.f32 %v6814_v52, %v1901_v34  ;;  %v1903_v39 = vpop.f32.mrb[63].mxu0  ;;  %2977 = vmatmul.mubr.f32.gmra.mrb[86].mxu1 %v7224_v30  ;;  %v2446_v45 = vrot.slane %v7256_v41, 1  ;;  %v2448_v55 = vrot.slane %v7259_v46, 1 }
 0x37f   : > { %v2238_v32 = vmax.f32 %v2206_v7, 0.0  ;;  %v2168_v27 = vmul.f32 %v6822_v48, %v2127_v0  ;;  %v7268_v23 = vsel %vm601_vm0, %v2445_v57, %v2446_v45  ;;  %v7274_v52 = vsel %vm601_vm0, %v2446_v45, %v2448_v55  ;;  %v7296_v55 = vld [vmem:[#allocation2] sm:$0xff] }
 0x380   : > { %8075 = vst [vmem:[#allocation55_spill] sm:$0xff] %v7268_v23  ;;  %2981 = vmatprep.mubr.f32.mxu1 %v7268_v23  ;;  %8076 = vst [vmem:[#allocation56_spill] sm:$0xff] %v7274_v52  ;;  %v7277_v22 = vld [vmem:[#allocation3 + $0x168] sm:$0xff] }
 0x381   : > { %2271 = vst [vmem:[#allocation3 + $0x181] sm:$0xff] %v2238_v32  ;;  %v2207_v58 = vadd.f32 %v6828_v31, %v2168_v27  ;;  %2982 = vmatmul.mubr.f32.gmra.mrb[88].mxu1 %v7252_v33  ;;  %v2450_v57 = vrot.slane %v7277_v22, 1  ;;  %8079 = vst [vmem:[#allocation59_spill] sm:$0xff] %v7296_v55  ;;  %v7299_v32 = vrot.slane %v7296_v55, 2  ;;  %v2697_v27 = vld [vmem:[#allocation9 + $0x200] sm:$0xff]  ;;  %v2700_v23 = vld [vmem:[#allocation9 + $0x218] sm:$0xff] }
 0x382   : > { %2986 = vmatprep.mubr.f32.mxu1 %v7274_v52  ;;  %v2699_v52 = vld [vmem:[#allocation9 + $0x210] sm:$0xff]  ;;  %v2701_v55 = vld [vmem:[#allocation9 + $0x220] sm:$0xff] }
 0x383   : > { %v2239_v34 = vmax.f32 %v2207_v58, 0.0  ;;  %v2698_v58 = vld [vmem:[#allocation9 + $0x208] sm:$0xff] }
 0x384   : > { %v7279_v7 = vld [vmem:[#allocation3 + $0x170] sm:$0xff]  ;;  %v7281_v48 = vld [vmem:[#allocation3 + $0x178] sm:$0x3] }
 0x385   : > { %2272 = vst [vmem:[#allocation3 + $0x189] sm:$0xff] %v2239_v34  ;;  %2987 = vmatmul.mubr.f32.gmra.mrb[90].mxu1 %v7256_v41  ;;  %v2451_v31 = vrot.slane %v7279_v7, 1  ;;  %v2453_v0 = vrot.slane %v7281_v48, 1  ;;  %v4751_v34 = vpack.c.bf16 %v2698_v58, %v2697_v27  ;;  %v2492_v27 = vrot.slane %v6845_v42, 2 }
 0x387   : > { %v7288_v39 = vsel %vm601_vm0, %v2450_v57, %v2451_v31  ;;  %v7293_v45 = vsel %vm601_vm0, %v2451_v31, %v2453_v0  ;;  %v5382_v57 = vld [vmem:[#allocation3 + $0x10] sm:$0x3]  ;;  %v4754_v0 = vpack.c.bf16 %v2700_v23, %v2699_v52  ;;  %v2495_v23 = vrot.slane %v6851_v38, 2  ;;  %v2707_v38 = vld [vmem:[#allocation9 + $0x250] sm:$0xff] }
 0x388   : > { %8077 = vst [vmem:[#allocation57_spill] sm:$0xff] %v7288_v39  ;;  %2991 = vmatprep.mubr.f32.mxu1 %v7288_v39  ;;  %8078 = vst [vmem:[#allocation58_spill] sm:$0xff] %v7293_v45  ;;  %v2490_v39 = vrot.slane %v5382_v57, 2  ;;  %v2704_v57 = vld [vmem:[#allocation9 + $0x238] sm:$0xff] }
 0x389   : > { %2992 = vmatmul.mubr.f32.gmra.mrb[92].mxu1 %v7277_v22  ;;  %v7320_v52 = vsel %vm714_vm1, %v2493_v53, %v2495_v23  ;;  %v2716_v23 = vld [vmem:[#allocation9 + $0x298] sm:$0xff] }
 0x38a   : > { %2996 = vmatprep.mubr.f32.mxu1 %v7293_v45  ;;  %v2491_v31 = vsel %vm714_vm1, %v7299_v32, %v2490_v39  ;;  %v2702_v45 = vld [vmem:[#allocation9 + $0x228] sm:$0xff]  ;;  %v7313_v39 = vsel %vm714_vm1, %v2492_v27, %v2493_v53  ;;  %v2709_v53 = vld [vmem:[#allocation9 + $0x260] sm:$0xff]  ;;  %v2712_v27 = vld [vmem:[#allocation9 + $0x278] sm:$0xff] }
 0x38b   : > { %v4757_v58 = vpack.c.bf16 %v2702_v45, %v2701_v55  ;;  %v2708_v55 = vld [vmem:[#allocation9 + $0x258] sm:$0xff] }
 0x38d   : > { %2997 = vmatmul.mubr.f32.gmra.mrb[94].mxu1 %v7279_v7 }
 0x38e   : > { %3066 = vmatprep.mubr.f32.mxu1 %v6845_v42  ;;  %v2705_v42 = vld [vmem:[#allocation9 + $0x240] sm:$0xff] }
 0x391   : > { %3067 = vmatmul.mubr.f32.vlgmr.msra.gmra.mrb[32].mxu1 %v7299_v32 }
 0x392   : > { %3071 = vmatprep.mubr.f32.mxu1 %v6848_v50  ;;  %4752 = vmatpush1.bf16.msra.mxu1 %v4751_v34  ;;  %v2703_v34 = vld [vmem:[#allocation9 + $0x230] sm:$0xff] }
 0x393   : > { %4753 = vmatprep.subr.bf16.mxu1 %v8006_v11  ;;  %v4760_v50 = vpack.c.bf16 %v2704_v57, %v2703_v34  ;;  %v2714_v34 = vld [vmem:[#allocation9 + $0x288] sm:$0xff]  ;;  %v2715_v57 = vld [vmem:[#allocation9 + $0x290] sm:$0xff] }
 0x395   : > { %3072 = vmatmul.mubr.f32.gmra.mrb[34].mxu1 %v2491_v31  ;;  %v2710_v31 = vld [vmem:[#allocation9 + $0x268] sm:$0xff] }
 0x396   : > { %3076 = vmatprep.mubr.f32.mxu1 %v6868_v2  ;;  %4755 = vmatpush1.bf16.msra.mxu1 %v4754_v0  ;;  %v2706_v2 = vld [vmem:[#allocation9 + $0x248] sm:$0xff]  ;;  %v2711_v0 = vld [vmem:[#allocation9 + $0x270] sm:$0xff] }
 0x397   : > { %4756 = vmatprep.subr.bf16.mxu1 %v8006_v11  ;;  %v4763_v45 = vpack.c.bf16 %v2706_v2, %v2705_v42  ;;  %v2718_v42 = vld [vmem:[#allocation9 + $0x2a8] sm:$0xff]  ;;  %v2719_v2 = vld [vmem:[#allocation9 + $0x2b0] sm:$0xff] }
 0x399   : > { %3077 = vmatmul.mubr.f32.gmra.mrb[36].mxu1 %v7313_v39 }
 0x39a   : > { %3081 = vmatprep.mubr.f32.mxu1 %v6872_v40  ;;  %4758 = vmatpush1.bf16.msra.mxu1 %v4757_v58  ;;  %v4766_v40 = vpack.c.bf16 %v2708_v55, %v2707_v38  ;;  %v2713_v58 = vld [vmem:[#allocation9 + $0x280] sm:$0xff]  ;;  %v2722_v55 = vld [vmem:[#allocation9 + $0x2c8] sm:$0xff] }
 0x39b   : > { %4759 = vmatprep.subr.bf16.mxu1 %v8006_v11  ;;  %v2721_v38 = vld [vmem:[#allocation9 + $0x2c0] sm:$0xff] }
 0x39d   : > { %3082 = vmatmul.mubr.f32.gmra.mrb[38].mxu1 %v7320_v52 }
 0x39e   : > { %3086 = vmatprep.mubr.f32.mxu1 %v6900_v29  ;;  %4761 = vmatpush1.bf16.msra.mxu1 %v4760_v50  ;;  %v4769_v29 = vpack.c.bf16 %v2710_v31, %v2709_v53  ;;  %v2717_v50 = vld [vmem:[#allocation9 + $0x2a0] sm:$0xff]  ;;  %v2724_v53 = vld [vmem:[#allocation9 + $0x2d8] sm:$0xff] }
 0x39f   : > { %4762 = vmatprep.subr.bf16.mxu1 %v8006_v11  ;;  %v2725_v31 = vld [vmem:[#allocation9 + $0x2e0] sm:$0xff] }
 0x3a1   : > { %3087 = vmatmul.mubr.f32.gmra.mrb[40].mxu1 %v6886_v44 }
 0x3a2   : > { %3091 = vmatprep.mubr.f32.mxu1 %v6904_v3  ;;  %4764 = vmatpush1.bf16.msra.mxu1 %v4763_v45  ;;  %v4772_v3 = vpack.c.bf16 %v2712_v27, %v2711_v0  ;;  %v2720_v45 = vld [vmem:[#allocation9 + $0x2b8] sm:$0xff]  ;;  %v2727_v0 = vld [vmem:[#allocation9 + $0x2f0] sm:$0xff] }
 0x3a3   : > { %4765 = vmatprep.subr.bf16.mxu1 %v8006_v11  ;;  %v2728_v27 = vld [vmem:[#allocation9 + $0x2f8] sm:$0xff] }
 0x3a5   : > { %3092 = vmatmul.mubr.f32.gmra.mrb[42].mxu1 %v6891_v19 }
 0x3a6   : > { %3096 = vmatprep.mubr.f32.mxu1 %v6932_v20  ;;  %4767 = vmatpush1.bf16.msra.mxu1 %v4766_v40  ;;  %v4775_v20 = vpack.c.bf16 %v2714_v34, %v2713_v58  ;;  %v2723_v40 = vld [vmem:[#allocation9 + $0x2d0] sm:$0xff]  ;;  %v2558_v34 = vrot.slane %v7256_v41, 2 }
 0x3a7   : > { %4768 = vmatprep.subr.bf16.mxu1 %v8006_v11 }
 0x3a9   : > { %3097 = vmatmul.mubr.f32.gmra.mrb[44].mxu1 %v6918_v15 }
 0x3aa   : > { %3101 = vmatprep.mubr.f32.mxu1 %v6936_v12  ;;  %4770 = vmatpush1.bf16.msra.mxu1 %v4769_v29  ;;  %v4778_v12 = vpack.c.bf16 %v2716_v23, %v2715_v57  ;;  %v2726_v29 = vld [vmem:[#allocation9 + $0x2e8] sm:$0xff]  ;;  %v2557_v57 = vrot.slane %v7252_v33, 2 }
 0x3ab   : > { %4771 = vmatprep.subr.bf16.mxu1 %v8006_v11 }
 0x3ac   : > { %v7396_v23 = vsel %vm714_vm1, %v2557_v57, %v2558_v34 }
 0x3ad   : > { %3102 = vmatmul.mubr.f32.gmra.mrb[46].mxu1 %v6923_v16 }
 0x3ae   : > { %3106 = vmatprep.mubr.f32.mxu1 %v6964_v60  ;;  %4773 = vmatpush1.bf16.msra.mxu1 %v4772_v3  ;;  %v4781_v60 = vpack.c.bf16 %v2718_v42, %v2717_v50  ;;  %v8086_v3 = vld [vmem:[#allocation51_spill] sm:$0xff] }
 0x3af   : > { %4774 = vmatprep.subr.bf16.mxu1 %v8006_v11 }
 0x3b1   : > { %3107 = vmatmul.mubr.f32.gmra.mrb[48].mxu1 %v6950_v5 }
 0x3b2   : > { %3111 = vmatprep.mubr.f32.mxu1 %v6968_v14  ;;  %4776 = vmatpush1.bf16.msra.mxu1 %v4775_v20  ;;  %v4784_v14 = vpack.c.bf16 %v2720_v45, %v2719_v2  ;;  %v7410_v45 = vld [vmem:[#allocation3 + $0x180] sm:$0xff] }
 0x3b3   : > { %4777 = vmatprep.subr.bf16.mxu1 %v8006_v11 }
 0x3b5   : > { %3112 = vmatmul.mubr.f32.gmra.mrb[50].mxu1 %v6955_v17 }
 0x3b6   : > { %3116 = vmatprep.mubr.f32.mxu1 %v6996_v10  ;;  %4779 = vmatpush1.bf16.msra.mxu1 %v4778_v12  ;;  %v4787_v10 = vpack.c.bf16 %v2722_v55, %v2721_v38  ;;  %v2560_v12 = vrot.slane %v7259_v46, 2  ;;  %v2562_v46 = vrot.slane %v7277_v22, 2  ;;  %v2565_v38 = vrot.slane %v7281_v48, 2  ;;  %v7419_v55 = vld [vmem:[#allocation3 + $0x188] sm:$0xff] }
 0x3b7   : > { %4780 = vmatprep.subr.bf16.mxu1 %v8006_v11 }
 0x3b8   : > { %v7404_v42 = vsel %vm714_vm1, %v2558_v34, %v2560_v12  ;;  %v2734_v34 = vld [vmem:[#allocation9 + $0x328] sm:$0xff] }
 0x3b9   : > { %3117 = vmatmul.mubr.f32.gmra.mrb[52].mxu1 %v6982_v62  ;;  %v8089_v12 = vld [vmem:[#allocation23_spill] sm:$0xff] }
 0x3ba   : > { %3121 = vmatprep.mubr.f32.mxu1 %v7000_v26  ;;  %4782 = vmatpush1.bf16.msra.mxu1 %v4781_v60  ;;  %v4790_v26 = vpack.c.bf16 %v2724_v53, %v2723_v40  ;;  %v2563_v60 = vrot.slane %v7279_v7, 2  ;;  %v2730_v40 = vld [vmem:[#allocation9 + $0x308] sm:$0xff] }
 0x3bb   : > { %4783 = vmatprep.subr.bf16.mxu1 %v8006_v11 }
 0x3bd   : > { %3122 = vmatmul.mubr.f32.gmra.mrb[54].mxu1 %v6987_v4 }
 0x3be   : > { %3126 = vmatprep.mubr.f32.mxu1 %v7028_v1  ;;  %4785 = vmatpush1.bf16.msra.mxu1 %v4784_v14  ;;  %v4793_v1 = vpack.c.bf16 %v2726_v29, %v2725_v31  ;;  %v7415_v14 = vsel %vm714_vm1, %v2562_v46, %v2563_v60  ;;  %v2731_v29 = vld [vmem:[#allocation9 + $0x310] sm:$0xff] }
 0x3bf   : > { %4786 = vmatprep.subr.bf16.mxu1 %v8006_v11  ;;  %v2735_v46 = vld [vmem:[#allocation9 + $0x330] sm:$0xff] }
 0x3c1   : > { %3127 = vmatmul.mubr.f32.gmra.mrb[56].mxu1 %v7014_v6 }
 0x3c2   : > { %3131 = vmatprep.mubr.f32.mxu1 %v7032_v9  ;;  %4788 = vmatpush1.bf16.msra.mxu1 %v4787_v10  ;;  %v4796_v9 = vpack.c.bf16 %v2728_v27, %v2727_v0  ;;  %v2729_v10 = vld [vmem:[#allocation9 + $0x300] sm:$0xff] }
 0x3c3   : > { %4789 = vmatprep.subr.bf16.mxu1 %v8006_v11  ;;  %v4799_v48 = vpack.c.bf16 %v2730_v40, %v2729_v10  ;;  %v8087_v0 = vld [vmem:[#allocation22_spill] sm:$0xff] }
 0x3c4   : > { %v2737_v40 = vld [vmem:[#allocation9 + $0x340] sm:$0xff] }
 0x3c5   : > { %3132 = vmatmul.mubr.f32.gmra.mrb[58].mxu1 %v7019_v43 }
 0x3c6   : > { %3136 = vmatprep.mubr.f32.mxu1 %v7060_v63  ;;  %4791 = vmatpush1.bf16.msra.mxu1 %v4790_v26  ;;  %v8080_v63 = vld [vmem:[#allocation39_spill] sm:$0xff]  ;;  %v7425_v26 = vsel %vm714_vm1, %v2563_v60, %v2565_v38  ;;  %v8090_v38 = vld [vmem:[#allocation24_spill] sm:$0xff] }
 0x3c7   : > { %4792 = vmatprep.subr.bf16.mxu1 %v8006_v11 }
 0x3c9   : > { %3137 = vmatmul.mubr.f32.gmra.mrb[60].mxu1 %v7046_v37 }
 0x3ca   : > { %3141 = vmatprep.mubr.f32.mxu1 %v7064_v28  ;;  %4794 = vmatpush1.bf16.msra.mxu1 %v4793_v1  ;;  %v8081_v28 = vld [vmem:[#allocation42_spill] sm:$0xff]  ;;  %v2732_v1 = vld [vmem:[#allocation9 + $0x318] sm:$0xff] }
 0x3cb   : > { %4795 = vmatprep.subr.bf16.mxu1 %v8006_v11  ;;  %v4802_v27 = vpack.c.bf16 %v2732_v1, %v2731_v29  ;;  %v8092_v1 = vld [vmem:[#allocation25_spill] sm:$0xff] }
 0x3cd   : > { %3142 = vmatmul.mubr.f32.gmra.mrb[62].mxu1 %v7051_v35 }
 0x3ce   : > { %3146 = vmatprep.mubr.f32.mxu1 %v7092_v56  ;;  %4797 = vmatpush1.bf16.msra.mxu1 %v4796_v9  ;;  %v8082_v56 = vld [vmem:[#allocation43_spill] sm:$0xff]  ;;  %v2733_v9 = vld [vmem:[#allocation9 + $0x320] sm:$0xff] }
 0x3cf   : > { %4798 = vmatprep.subr.bf16.mxu1 %v8006_v11 }
 0x3d1   : > { %3147 = vmatmul.mubr.f32.gmra.mrb[64].mxu1 %v7078_v36 }
 0x3d2   : > { %3151 = vmatprep.mubr.f32.mxu1 %v7096_v24  ;;  %v8083_v24 = vld [vmem:[#allocation46_spill] sm:$0xff] }
 0x3d5   : > { %3152 = vmatmul.mubr.f32.gmra.mrb[66].mxu1 %v7083_v51 }
 0x3d6   : > { %3156 = vmatprep.mubr.f32.mxu1 %v7124_v13  ;;  %v8084_v13 = vld [vmem:[#allocation47_spill] sm:$0xff] }
 0x3d9   : > { %3157 = vmatmul.mubr.f32.gmra.mrb[68].mxu1 %v7110_v21 }
 0x3da   : > { %3161 = vmatprep.mubr.f32.mxu1 %v7128_v61  ;;  %v8085_v61 = vld [vmem:[#allocation50_spill] sm:$0xff] }
 0x3dd   : > { %3162 = vmatmul.mubr.f32.gmra.mrb[70].mxu1 %v8080_v63 }
 0x3de   : > { %3166 = vmatprep.mubr.f32.mxu1 %v7156_v47 }
 0x3e1   : > { %3167 = vmatmul.mubr.f32.gmra.mrb[72].mxu1 %v8081_v28 }
 0x3e2   : > { %3171 = vmatprep.mubr.f32.mxu1 %v7160_v25 }
 0x3e5   : > { %3172 = vmatmul.mubr.f32.gmra.mrb[74].mxu1 %v8082_v56 }
 0x3e6   : > { %3176 = vmatprep.mubr.f32.mxu1 %v7188_v59 }
 0x3e9   : > { %3177 = vmatmul.mubr.f32.gmra.mrb[76].mxu1 %v8083_v24 }
 0x3ea   : > { %3181 = vmatprep.mubr.f32.mxu1 %v7192_v54 }
 0x3ed   : > { %3182 = vmatmul.mubr.f32.gmra.mrb[78].mxu1 %v8084_v13 }
 0x3ee   : > { %3186 = vmatprep.mubr.f32.mxu1 %v7220_v18 }
 0x3f1   : > { %3187 = vmatmul.mubr.f32.gmra.mrb[80].mxu1 %v8085_v61 }
 0x3f2   : > { %3191 = vmatprep.mubr.f32.mxu1 %v7224_v30 }
 0x3f4   : > { %v7379_v47 = vpop.f32.mrb[64].mxu0 }
 0x3f5   : > { %3192 = vmatmul.mubr.f32.gmra.mrb[82].mxu1 %v8086_v3  ;;  %v7382_v25 = vpop.f32.mrb[65].mxu0 }
 0x3f6   : > { %3196 = vmatprep.mubr.f32.mxu1 %v7252_v33 }
 0x3f9   : > { %3197 = vmatmul.mubr.f32.gmra.mrb[84].mxu1 %v7238_v8 }
 0x3fa   : > { %3201 = vmatprep.mubr.f32.mxu1 %v7256_v41 }
 0x3fc   : > { %v7387_v58 = vpop.f32.mrb[66].mxu0 }
 0x3fd   : > { %3202 = vmatmul.mubr.f32.gmra.mrb[86].mxu1 %v7243_v49  ;;  %v7391_v20 = vpop.f32.mrb[67].mxu0 }
 0x3fe   : > { %3206 = vmatprep.mubr.f32.mxu1 %v7277_v22 }
 0x401   : > { %3207 = vmatmul.mubr.f32.gmra.mrb[88].mxu1 %v7396_v23 }
 0x402   : > { %3211 = vmatprep.mubr.f32.mxu1 %v7279_v7 }
 0x404   : > { %v7401_v50 = vpop.f32.mrb[68].mxu0 }
 0x405   : > { %3212 = vmatmul.mubr.f32.gmra.mrb[90].mxu1 %v7404_v42  ;;  %v7408_v2 = vpop.f32.mrb[69].mxu0 }
 0x406   : > { %3216 = vmatprep.mubr.f32.mxu1 %v7410_v45 }
 0x409   : > { %3217 = vmatmul.mubr.f32.gmra.mrb[92].mxu1 %v7415_v14 }
 0x40a   : > { %3221 = vmatprep.mubr.f32.mxu1 %v7419_v55 }
 0x40c   : > { %v7422_v53 = vpop.f32.mrb[70].mxu0 }
 0x40d   : > { %3222 = vmatmul.mubr.f32.gmra.mrb[94].mxu1 %v7425_v26  ;;  %v7428_v31 = vpop.f32.mrb[71].mxu0 }
 0x40e   : > { %3291 = vmatprep.mubr.f32.mxu1 %v7313_v39  ;;  %v4805_v39 = vpack.c.bf16 %v2734_v34, %v2733_v9  ;;  %v8094_v9 = vld [vmem:[#allocation26_spill] sm:$0xff] }
 0x411   : > { %3292 = vmatmul.mubr.f32.vlgmr.msra.gmra.mrb[32].mxu1 %v8087_v0 }
 0x412   : > { %3296 = vmatprep.mubr.f32.mxu1 %v7320_v52  ;;  %4800 = vmatpush1.bf16.msra.mxu1 %v4799_v48  ;;  %v2736_v52 = vld [vmem:[#allocation9 + $0x338] sm:$0xff]  ;;  %v2738_v48 = vld [vmem:[#allocation9 + $0x348] sm:$0xff] }
 0x413   : > { %4801 = vmatprep.subr.bf16.mxu1 %v8006_v11  ;;  %v4808_v10 = vpack.c.bf16 %v2736_v52, %v2735_v46  ;;  %v4811_v0 = vpack.c.bf16 %v2738_v48, %v2737_v40  ;;  %v8096_v52 = vld [vmem:[#allocation27_spill] sm:$0xff]  ;;  %v2743_v40 = vld [vmem:[#allocation9 + $0x370] sm:$0xff] }
 0x414   : > { %v7434_v57 = vpop.f32.mrb[72].mxu0  ;;  %v8098_v48 = vld [vmem:[#allocation28_spill] sm:$0xff] }
 0x415   : > { %8088 = vst [vmem:[#allocation39_spill] sm:$0xff] %v7434_v57  ;;  %3297 = vmatmul.mubr.f32.gmra.mrb[34].mxu1 %v8089_v12  ;;  %v7437_v60 = vpop.f32.mrb[73].mxu0  ;;  %v2741_v12 = vld [vmem:[#allocation9 + $0x360] sm:$0xff] }
 0x416   : > { %3301 = vmatprep.mubr.f32.mxu1 %v6886_v44  ;;  %4803 = vmatpush1.bf16.msra.mxu1 %v4802_v27  ;;  %v2739_v27 = vld [vmem:[#allocation9 + $0x350] sm:$0xff] }
 0x417   : > { %4804 = vmatprep.subr.bf16.mxu1 %v8006_v11 }
 0x419   : > { %3302 = vmatmul.mubr.f32.gmra.mrb[36].mxu1 %v8090_v38 }
 0x41a   : > { %3306 = vmatprep.mubr.f32.mxu1 %v6891_v19  ;;  %4806 = vmatpush1.bf16.msra.mxu1 %v4805_v39  ;;  %v2740_v19 = vld [vmem:[#allocation9 + $0x358] sm:$0xff]  ;;  %v2742_v39 = vld [vmem:[#allocation9 + $0x368] sm:$0xff] }
 0x41b   : > { %4807 = vmatprep.subr.bf16.mxu1 %v8006_v11  ;;  %v4814_v34 = vpack.c.bf16 %v2740_v19, %v2739_v27  ;;  %v2745_v27 = vld [vmem:[#allocation9 + $0x380] sm:$0xff]  ;;  %v2746_v19 = vld [vmem:[#allocation9 + $0x388] sm:$0xff] }
 0x41c   : > { %v7444_v29 = vpop.f32.mrb[74].mxu0 }
 0x41d   : > { %8091 = vst [vmem:[#allocation42_spill] sm:$0xff] %v7444_v29  ;;  %3307 = vmatmul.mubr.f32.gmra.mrb[38].mxu1 %v8092_v1  ;;  %v7447_v44 = vpop.f32.mrb[75].mxu0 }
 0x41e   : > { %8093 = vst [vmem:[#allocation43_spill] sm:$0xff] %v7447_v44  ;;  %3311 = vmatprep.mubr.f32.mxu1 %v6918_v15  ;;  %4809 = vmatpush1.bf16.msra.mxu1 %v4808_v10  ;;  %v4817_v10 = vpack.c.bf16 %v2742_v39, %v2741_v12  ;;  %v2747_v12 = vld [vmem:[#allocation9 + $0x390] sm:$0xff]  ;;  %v8102_v39 = vld [vmem:[#allocation30_spill] sm:$0xff] }
 0x41f   : > { %4810 = vmatprep.subr.bf16.mxu1 %v8006_v11 }
 0x421   : > { %3312 = vmatmul.mubr.f32.gmra.mrb[40].mxu1 %v8094_v9 }
 0x422   : > { %3316 = vmatprep.mubr.f32.mxu1 %v6923_v16  ;;  %4812 = vmatpush1.bf16.msra.mxu1 %v4811_v0  ;;  %v2744_v16 = vld [vmem:[#allocation9 + $0x378] sm:$0xff] }
 0x423   : > { %4813 = vmatprep.subr.bf16.mxu1 %v8006_v11  ;;  %v4820_v0 = vpack.c.bf16 %v2744_v16, %v2743_v40  ;;  %v2749_v40 = vld [vmem:[#allocation9 + $0x3a0] sm:$0xff]  ;;  %v2750_v16 = vld [vmem:[#allocation9 + $0x3a8] sm:$0xff] }
 0x424   : > { %v7454_v46 = vpop.f32.mrb[76].mxu0 }
 0x425   : > { %8095 = vst [vmem:[#allocation46_spill] sm:$0xff] %v7454_v46  ;;  %3317 = vmatmul.mubr.f32.gmra.mrb[42].mxu1 %v8096_v52  ;;  %v7457_v15 = vpop.f32.mrb[77].mxu0 }
 0x426   : > { %8097 = vst [vmem:[#allocation47_spill] sm:$0xff] %v7457_v15  ;;  %3321 = vmatprep.mubr.f32.mxu1 %v6950_v5  ;;  %4815 = vmatpush1.bf16.msra.mxu1 %v4814_v34  ;;  %v8100_v15 = vld [vmem:[#allocation29_spill] sm:$0xff]  ;;  %v4823_v34 = vpack.c.bf16 %v2746_v19, %v2745_v27  ;;  %v2751_v27 = vld [vmem:[#allocation9 + $0x3b0] sm:$0xff] }
 0x427   : > { %4816 = vmatprep.subr.bf16.mxu1 %v8006_v11  ;;  %v8106_v19 = vld [vmem:[#allocation32_spill] sm:$0xff] }
 0x429   : > { %3322 = vmatmul.mubr.f32.gmra.mrb[44].mxu1 %v8098_v48 }
 0x42a   : > { %3326 = vmatprep.mubr.f32.mxu1 %v6955_v17  ;;  %4818 = vmatpush1.bf16.msra.mxu1 %v4817_v10  ;;  %v2748_v17 = vld [vmem:[#allocation9 + $0x398] sm:$0xff] }
 0x42b   : > { %4819 = vmatprep.subr.bf16.mxu1 %v8006_v11  ;;  %v4826_v10 = vpack.c.bf16 %v2748_v17, %v2747_v12  ;;  %v2753_v12 = vld [vmem:[#allocation9 + $0x3c0] sm:$0xff]  ;;  %v2754_v17 = vld [vmem:[#allocation9 + $0x3c8] sm:$0xff] }
 0x42c   : > { %v7464_v46 = vpop.f32.mrb[78].mxu0 }
 0x42d   : > { %8099 = vst [vmem:[#allocation50_spill] sm:$0xff] %v7464_v46  ;;  %3327 = vmatmul.mubr.f32.gmra.mrb[46].mxu1 %v8100_v15  ;;  %v7467_v5 = vpop.f32.mrb[79].mxu0 }
 0x42e   : > { %8101 = vst [vmem:[#allocation51_spill] sm:$0xff] %v7467_v5  ;;  %3331 = vmatprep.mubr.f32.mxu1 %v6982_v62  ;;  %4821 = vmatpush1.bf16.msra.mxu1 %v4820_v0  ;;  %v8104_v5 = vld [vmem:[#allocation31_spill] sm:$0xff]  ;;  %v4829_v0 = vpack.c.bf16 %v2750_v16, %v2749_v40  ;;  %v2755_v40 = vld [vmem:[#allocation9 + $0x3d0] sm:$0xff]  ;;  %v8110_v16 = vld [vmem:[#allocation34_spill] sm:$0xff] }
 0x42f   : > { %4822 = vmatprep.subr.bf16.mxu1 %v8006_v11 }
 0x431   : > { %3332 = vmatmul.mubr.f32.gmra.mrb[48].mxu1 %v8102_v39 }
 0x432   : > { %3336 = vmatprep.mubr.f32.mxu1 %v6987_v4  ;;  %4824 = vmatpush1.bf16.msra.mxu1 %v4823_v34  ;;  %v2752_v4 = vld [vmem:[#allocation9 + $0x3b8] sm:$0xff] }
 0x433   : > { %4825 = vmatprep.subr.bf16.mxu1 %v8006_v11  ;;  %v4832_v34 = vpack.c.bf16 %v2752_v4, %v2751_v27  ;;  %v2757_v27 = vld [vmem:[#allocation9 + $0x3e0] sm:$0xff]  ;;  %v2758_v4 = vld [vmem:[#allocation9 + $0x3e8] sm:$0xff] }
 0x434   : > { %v7474_v46 = vpop.f32.mrb[80].mxu0 }
 0x435   : > { %8103 = vst [vmem:[#allocation22_spill] sm:$0xff] %v7474_v46  ;;  %3337 = vmatmul.mubr.f32.gmra.mrb[50].mxu1 %v8104_v5  ;;  %v7477_v62 = vpop.f32.mrb[81].mxu0 }
 0x436   : > { %8105 = vst [vmem:[#allocation23_spill] sm:$0xff] %v7477_v62  ;;  %3341 = vmatprep.mubr.f32.mxu1 %v7014_v6  ;;  %4827 = vmatpush1.bf16.msra.mxu1 %v4826_v10  ;;  %v8108_v62 = vld [vmem:[#allocation33_spill] sm:$0xff]  ;;  %v4835_v10 = vpack.c.bf16 %v2754_v17, %v2753_v12  ;;  %v2759_v12 = vld [vmem:[#allocation9 + $0x3f0] sm:$0xff] }
 0x437   : > { %4828 = vmatprep.subr.bf16.mxu1 %v8006_v11  ;;  %v8114_v17 = vld [vmem:[#allocation36_spill] sm:$0xff] }
 0x439   : > { %3342 = vmatmul.mubr.f32.gmra.mrb[52].mxu1 %v8106_v19 }
 0x43a   : > { %3346 = vmatprep.mubr.f32.mxu1 %v7019_v43  ;;  %4830 = vmatpush1.bf16.msra.mxu1 %v4829_v0  ;;  %v2756_v43 = vld [vmem:[#allocation9 + $0x3d8] sm:$0xff] }
 0x43b   : > { %4831 = vmatprep.subr.bf16.mxu1 %v8006_v11  ;;  %v4838_v0 = vpack.c.bf16 %v2756_v43, %v2755_v40  ;;  %v8116_v43 = vld [vmem:[#allocation37_spill] sm:$0xff] }
 0x43c   : > { %v7484_v46 = vpop.f32.mrb[82].mxu0 }
 0x43d   : > { %8107 = vst [vmem:[#allocation24_spill] sm:$0xff] %v7484_v46  ;;  %3347 = vmatmul.mubr.f32.gmra.mrb[54].mxu1 %v8108_v62  ;;  %v7487_v6 = vpop.f32.mrb[83].mxu0 }
 0x43e   : > { %8109 = vst [vmem:[#allocation25_spill] sm:$0xff] %v7487_v6  ;;  %3351 = vmatprep.mubr.f32.mxu1 %v7046_v37  ;;  %4833 = vmatpush1.bf16.msra.mxu1 %v4832_v34  ;;  %v8112_v6 = vld [vmem:[#allocation35_spill] sm:$0xff]  ;;  %v4841_v34 = vpack.c.bf16 %v2758_v4, %v2757_v27  ;;  %v8122_v27 = vld [vmem:[#allocation44_spill] sm:$0xff] }
 0x43f   : > { %4834 = vmatprep.subr.bf16.mxu1 %v8006_v11  ;;  %v8124_v4 = vld [vmem:[#allocation48_spill] sm:$0xff] }
 0x441   : > { %3352 = vmatmul.mubr.f32.gmra.mrb[56].mxu1 %v8110_v16 }
 0x442   : > { %3356 = vmatprep.mubr.f32.mxu1 %v7051_v35  ;;  %4836 = vmatpush1.bf16.msra.mxu1 %v4835_v10  ;;  %v2760_v35 = vld [vmem:[#allocation9 + $0x3f8] sm:$0xff] }
 0x443   : > { %4837 = vmatprep.subr.bf16.mxu1 %v8006_v11  ;;  %v4844_v10 = vpack.c.bf16 %v2760_v35, %v2759_v12  ;;  %v2603_v12 = vrot.slane %v7419_v55, 1  ;;  %v8132_v35 = vld [vmem:[#allocation58_spill] sm:$0xff] }
 0x444   : > { %v7494_v46 = vpop.f32.mrb[84].mxu0 }
 0x445   : > { %8111 = vst [vmem:[#allocation26_spill] sm:$0xff] %v7494_v46  ;;  %3357 = vmatmul.mubr.f32.gmra.mrb[58].mxu1 %v8112_v6  ;;  %v7497_v37 = vpop.f32.mrb[85].mxu0 }
 0x446   : > { %8113 = vst [vmem:[#allocation27_spill] sm:$0xff] %v7497_v37  ;;  %3361 = vmatprep.mubr.f32.mxu1 %v7078_v36  ;;  %4839 = vmatpush1.bf16.msra.mxu1 %v4838_v0  ;;  %v8118_v36 = vld [vmem:[#allocation14_spill] sm:$0xff] }
 0x447   : > { %4840 = vmatprep.subr.bf16.mxu1 %v8006_v11  ;;  %v8119_v0 = vld [vmem:[#allocation38_spill] sm:$0xff] }
 0x449   : > { %3362 = vmatmul.mubr.f32.gmra.mrb[60].mxu1 %v8114_v17 }
 0x44a   : > { %3366 = vmatprep.mubr.f32.mxu1 %v7083_v51  ;;  %4842 = vmatpush1.bf16.msra.mxu1 %v4841_v34  ;;  %v8120_v51 = vld [vmem:[#allocation40_spill] sm:$0xff]  ;;  %v2323_v34 = vld [vmem:[#allocation3 + $0x190] sm:$0x3] }
 0x44b   : > { %4843 = vmatprep.subr.bf16.mxu1 %v8006_v11  ;;  %v8121_v11 = vld [vmem:[#allocation41_spill] sm:$0xff]  ;;  %v2605_v29 = vrot.slane %v2323_v34, 1 }
 0x44c   : > { %v7504_v40 = vpop.f32.mrb[86].mxu0 }
 0x44d   : > { %8115 = vst [vmem:[#allocation28_spill] sm:$0xff] %v7504_v40  ;;  %3367 = vmatmul.mubr.f32.gmra.mrb[62].mxu1 %v8116_v43  ;;  %v7507_v46 = vpop.f32.mrb[87].mxu0  ;;  %v2612_v40 = vrot.slane %v2323_v34, 2  ;;  %v7555_v57 = vsel %vm601_vm0, %v2603_v12, %v2605_v29  ;;  %v5384_v34 = vld [vmem:[#allocation3 + $0x38] sm:$0xff]  ;;  %v8134_v29 = vld [vmem:[#allocation16_spill] sm:$0xff] }
 0x44e   : > { %8117 = vst [vmem:[#allocation29_spill] sm:$0xff] %v7507_v46  ;;  %3371 = vmatprep.mubr.f32.mxu1 %v7110_v21  ;;  %4845 = vmatpush1.bf16.msra.mxu1 %v4844_v10  ;;  %v8123_v21 = vld [vmem:[#allocation45_spill] sm:$0xff]  ;;  %v2602_v46 = vrot.slane %v7410_v45, 1 }
 0x44f   : > { %4878 = vmatprep.subr.bf16.mxu1 %v8118_v36 }
 0x450   : > { %v7547_v37 = vsel %vm601_vm0, %v2602_v46, %v2603_v12  ;;  %v8133_v46 = vld [vmem:[#allocation15_spill] sm:$0xff]  ;;  %v8138_v12 = vld [vmem:[#allocation20_spill] sm:$0xff] }
 0x451   : > { %3372 = vmatmul.mubr.f32.gmra.mrb[64].mxu1 %v8119_v0 }
 0x452   : > { %3376 = vmatprep.mubr.f32.mxu1 %v8080_v63  ;;  %v8125_v63 = vld [vmem:[#allocation49_spill] sm:$0xff] }
 0x455   : > { %3377 = vmatmul.mubr.f32.gmra.mrb[66].mxu1 %v8120_v51 }
 0x456   : > { %3381 = vmatprep.mubr.f32.mxu1 %v8081_v28  ;;  %v8126_v28 = vld [vmem:[#allocation52_spill] sm:$0xff] }
 0x459   : > { %3382 = vmatmul.mubr.f32.gmra.mrb[68].mxu1 %v8121_v11 }
 0x45a   : > { %3386 = vmatprep.mubr.f32.mxu1 %v8082_v56  ;;  %v8127_v56 = vld [vmem:[#allocation53_spill] sm:$0xff] }
 0x45d   : > { %3387 = vmatmul.mubr.f32.gmra.mrb[70].mxu1 %v8122_v27 }
 0x45e   : > { %3391 = vmatprep.mubr.f32.mxu1 %v8083_v24  ;;  %v8128_v24 = vld [vmem:[#allocation54_spill] sm:$0xff] }
 0x461   : > { %3392 = vmatmul.mubr.f32.gmra.mrb[72].mxu1 %v8123_v21 }
 0x462   : > { %3396 = vmatprep.mubr.f32.mxu1 %v8084_v13  ;;  %v8129_v13 = vld [vmem:[#allocation55_spill] sm:$0xff] }
 0x465   : > { %3397 = vmatmul.mubr.f32.gmra.mrb[74].mxu1 %v8124_v4 }
 0x466   : > { %3401 = vmatprep.mubr.f32.mxu1 %v8085_v61  ;;  %v8130_v61 = vld [vmem:[#allocation56_spill] sm:$0xff] }
 0x469   : > { %3402 = vmatmul.mubr.f32.gmra.mrb[76].mxu1 %v8125_v63 }
 0x46a   : > { %3406 = vmatprep.mubr.f32.mxu1 %v8086_v3  ;;  %v8131_v3 = vld [vmem:[#allocation57_spill] sm:$0xff] }
 0x46d   : > { %3407 = vmatmul.mubr.f32.gmra.mrb[78].mxu1 %v8126_v28 }
 0x46e   : > { %3411 = vmatprep.mubr.f32.mxu1 %v7238_v8  ;;  %v2610_v8 = vrot.slane %v7419_v55, 2 }
 0x470   : > { %v7551_v44 = vsel %vm714_vm1, %v2610_v8, %v2612_v40  ;;  %v5385_v40 = vld [vmem:[#allocation3 + $0x48] sm:$0xff] }
 0x471   : > { %3412 = vmatmul.mubr.f32.gmra.mrb[80].mxu1 %v8127_v56 }
 0x472   : > { %3416 = vmatprep.mubr.f32.mxu1 %v7243_v49  ;;  %v2609_v49 = vrot.slane %v7410_v45, 2 }
 0x474   : > { %v7542_v10 = vsel %vm714_vm1, %v2609_v49, %v2610_v8  ;;  %v5383_v49 = vld [vmem:[#allocation3 + $0x30] sm:$0xff]  ;;  %v8137_v8 = vld [vmem:[#allocation19_spill] sm:$0xff] }
 0x475   : > { %3417 = vmatmul.mubr.f32.gmra.mrb[82].mxu1 %v8128_v24 }
 0x476   : > { %3421 = vmatprep.mubr.f32.mxu1 %v7396_v23 }
 0x479   : > { %3422 = vmatmul.mubr.f32.gmra.mrb[84].mxu1 %v8129_v13 }
 0x47a   : > { %3426 = vmatprep.mubr.f32.mxu1 %v7404_v42 }
 0x47d   : > { %3427 = vmatmul.mubr.f32.gmra.mrb[86].mxu1 %v8130_v61 }
 0x47e   : > { %3431 = vmatprep.mubr.f32.mxu1 %v7415_v14 }
 0x481   : > { %3432 = vmatmul.mubr.f32.gmra.mrb[88].mxu1 %v8131_v3 }
 0x482   : > { %3436 = vmatprep.mubr.f32.mxu1 %v7425_v26 }
 0x485   : > { %3437 = vmatmul.mubr.f32.gmra.mrb[90].mxu1 %v8132_v35 }
 0x486   : > { %3441 = vmatprep.mubr.f32.mxu1 %v7542_v10 }
 0x489   : > { %3442 = vmatmul.mubr.f32.gmra.mrb[92].mxu1 %v7547_v37 }
 0x48a   : > { %3446 = vmatprep.mubr.f32.mxu1 %v7551_v44 }
 0x48d   : > { %3447 = vmatmul.mubr.f32.gmra.mrb[94].mxu1 %v7555_v57 }
 0x48e   : > { %3516 = vmatprep.mubr.f32.mxu1 %v8090_v38  ;;  %v8135_v38 = vld [vmem:[#allocation17_spill] sm:$0xff] }
 0x491   : > { %3517 = vmatmul.mubr.f32.vlgmr.msra.gmra.mrb[32].mxu1 %v5383_v49  ;;  %v8139_v49 = vld [vmem:[#allocation21_spill] sm:$0xff] }
 0x492   : > { %3521 = vmatprep.mubr.f32.mxu1 %v8092_v1  ;;  %4886 = vmatpush3.bf16.msra.mxu1 %v8118_v36  ;;  %v5386_v1 = vld [vmem:[#allocation3 + $0x50] sm:$0xff] }
 0x493   : > { %4879 = vmatprep.subr.bf16.mxu1 %v8133_v46  ;;  %v8136_v36 = vld [vmem:[#allocation18_spill] sm:$0xff] }
 0x495   : > { %3522 = vmatmul.mubr.f32.gmra.mrb[34].mxu1 %v5384_v34  ;;  %v5393_v34 = vld [vmem:[#allocation3 + $0xa8] sm:$0xff] }
 0x496   : > { %3526 = vmatprep.mubr.f32.mxu1 %v8094_v9  ;;  %4887 = vmatpush3.bf16.msra.mxu1 %v8133_v46  ;;  %v5387_v9 = vld [vmem:[#allocation3 + $0x60] sm:$0xff]  ;;  %v5391_v46 = vld [vmem:[#allocation3 + $0x90] sm:$0xff] }
 0x497   : > { %4880 = vmatprep.subr.bf16.mxu1 %v8134_v29 }
 0x499   : > { %3527 = vmatmul.mubr.f32.gmra.mrb[36].mxu1 %v5385_v40 }
 0x49a   : > { %3531 = vmatprep.mubr.f32.mxu1 %v8096_v52  ;;  %4888 = vmatpush3.bf16.msra.mxu1 %v8134_v29  ;;  %v5388_v52 = vld [vmem:[#allocation3 + $0x68] sm:$0xff]  ;;  %v5395_v29 = vld [vmem:[#allocation3 + $0xc0] sm:$0xff] }
 0x49b   : > { %4881 = vmatprep.subr.bf16.mxu1 %v8135_v38 }
 0x49d   : > { %3532 = vmatmul.mubr.f32.gmra.mrb[38].mxu1 %v5386_v1 }
 0x49e   : > { %3536 = vmatprep.mubr.f32.mxu1 %v8098_v48  ;;  %4889 = vmatpush3.bf16.msra.mxu1 %v8135_v38  ;;  %v5389_v48 = vld [vmem:[#allocation3 + $0x78] sm:$0xff] }
 0x49f   : > { %4882 = vmatprep.subr.bf16.mxu1 %v8136_v36 }
 0x4a1   : > { %3537 = vmatmul.mubr.f32.gmra.mrb[40].mxu1 %v5387_v9 }
 0x4a2   : > { %3541 = vmatprep.mubr.f32.mxu1 %v8100_v15  ;;  %4890 = vmatpush3.bf16.msra.mxu1 %v8136_v36  ;;  %v5390_v15 = vld [vmem:[#allocation3 + $0x80] sm:$0xff]  ;;  %v5406_v36 = vld [vmem:[#allocation2 + $0x39] sm:$0xff] }
 0x4a3   : > { %4883 = vmatprep.subr.bf16.mxu1 %v8137_v8 }
 0x4a5   : > { %3542 = vmatmul.mubr.f32.gmra.mrb[42].mxu1 %v5388_v52 }
 0x4a6   : > { %3546 = vmatprep.mubr.f32.mxu1 %v8102_v39  ;;  %4891 = vmatpush3.bf16.msra.mxu1 %v8137_v8  ;;  %v5392_v39 = vld [vmem:[#allocation3 + $0x98] sm:$0xff] }
 0x4a7   : > { %4884 = vmatprep.subr.bf16.mxu1 %v8138_v12 }
 0x4a9   : > { %3547 = vmatmul.mubr.f32.gmra.mrb[44].mxu1 %v5389_v48 }
 0x4aa   : > { %3551 = vmatprep.mubr.f32.mxu1 %v8104_v5  ;;  %4892 = vmatpush3.bf16.msra.mxu1 %v8138_v12  ;;  %v5394_v5 = vld [vmem:[#allocation3 + $0xb0] sm:$0xff] }
 0x4ab   : > { %4885 = vmatprep.subr.bf16.mxu1 %v8139_v49 }
 0x4ad   : > { %3552 = vmatmul.mubr.f32.gmra.mrb[46].mxu1 %v5390_v15 }
 0x4ae   : > { %3556 = vmatprep.mubr.f32.mxu1 %v8106_v19  ;;  %4893 = vmatpush3.bf16.msra.mxu1 %v8139_v49  ;;  %v5396_v19 = vld [vmem:[#allocation3 + $0xc8] sm:$0xff]  ;;  %v5407_v49 = vld [vmem:[#allocation2 + $0x49] sm:$0xff] }
 0x4b1   : > { %3557 = vmatmul.mubr.f32.gmra.mrb[48].mxu1 %v5391_v46 }
 0x4b2   : > { %3561 = vmatprep.mubr.f32.mxu1 %v8108_v62  ;;  %v5397_v62 = vld [vmem:[#allocation3 + $0xd8] sm:$0xff] }
 0x4b5   : > { %3562 = vmatmul.mubr.f32.gmra.mrb[50].mxu1 %v5392_v39 }
 0x4b6   : > { %3566 = vmatprep.mubr.f32.mxu1 %v8110_v16  ;;  %v5398_v16 = vld [vmem:[#allocation3 + $0xe0] sm:$0xff] }
 0x4b9   : > { %3567 = vmatmul.mubr.f32.gmra.mrb[52].mxu1 %v5393_v34 }
 0x4ba   : > { %3571 = vmatprep.mubr.f32.mxu1 %v8112_v6  ;;  %v5399_v6 = vld [vmem:[#allocation3 + $0xf0] sm:$0xff] }
 0x4bd   : > { %3572 = vmatmul.mubr.f32.gmra.mrb[54].mxu1 %v5394_v5 }
 0x4be   : > { %3576 = vmatprep.mubr.f32.mxu1 %v8114_v17  ;;  %v5400_v17 = vld [vmem:[#allocation3 + $0xf8] sm:$0xff] }
 0x4c1   : > { %3577 = vmatmul.mubr.f32.gmra.mrb[56].mxu1 %v5395_v29  ;;  %v5408_v29 = vld [vmem:[#allocation2 + $0x51] sm:$0xff] }
 0x4c2   : > { %3581 = vmatprep.mubr.f32.mxu1 %v8116_v43  ;;  %v5401_v43 = vld [vmem:[#allocation3 + $0x108] sm:$0xff] }
 0x4c5   : > { %3582 = vmatmul.mubr.f32.gmra.mrb[58].mxu1 %v5396_v19 }
 0x4c6   : > { %3586 = vmatprep.mubr.f32.mxu1 %v8119_v0  ;;  %v5402_v0 = vld [vmem:[#allocation3 + $0x110] sm:$0xff] }
 0x4c9   : > { %3587 = vmatmul.mubr.f32.gmra.mrb[60].mxu1 %v5397_v62 }
 0x4ca   : > { %3591 = vmatprep.mubr.f32.mxu1 %v8120_v51 }
 0x4cd   : > { %3592 = vmatmul.mubr.f32.gmra.mrb[62].mxu1 %v5398_v16 }
 0x4ce   : > { %3596 = vmatprep.mubr.f32.mxu1 %v8121_v11 }
 0x4d1   : > { %3597 = vmatmul.mubr.f32.gmra.mrb[64].mxu1 %v5399_v6 }
 0x4d2   : > { %3601 = vmatprep.mubr.f32.mxu1 %v8122_v27 }
 0x4d5   : > { %3602 = vmatmul.mubr.f32.gmra.mrb[66].mxu1 %v5400_v17 }
 0x4d6   : > { %3606 = vmatprep.mubr.f32.mxu1 %v8123_v21 }
 0x4d9   : > { %3607 = vmatmul.mubr.f32.gmra.mrb[68].mxu1 %v5401_v43  ;;  %v5409_v43 = vld [vmem:[#allocation2 + $0x61] sm:$0xff] }
 0x4da   : > { %3611 = vmatprep.mubr.f32.mxu1 %v8124_v4 }
 0x4dd   : > { %3612 = vmatmul.mubr.f32.gmra.mrb[70].mxu1 %v5402_v0 }
 0x4de   : > { %3616 = vmatprep.mubr.f32.mxu1 %v8125_v63  ;;  %v5404_v63 = vld [vmem:[#allocation2 + $0x21] sm:$0xff] }
 0x4e1   : > { %3617 = vmatmul.mubr.f32.gmra.mrb[72].mxu1 %v7188_v59  ;;  %v8140_v59 = vld [vmem:[#allocation59_spill] sm:$0xff] }
 0x4e2   : > { %3621 = vmatprep.mubr.f32.mxu1 %v8126_v28 }
 0x4e5   : > { %3622 = vmatmul.mubr.f32.gmra.mrb[74].mxu1 %v7192_v54  ;;  %v2619_v54 = vrot.slane %v8140_v59, 1 }
 0x4e6   : > { %3626 = vmatprep.mubr.f32.mxu1 %v8127_v56 }
 0x4e9   : > { %3627 = vmatmul.mubr.f32.gmra.mrb[76].mxu1 %v7220_v18  ;;  %v2326_v18 = vld [vmem:[#allocation3 + $0x1a8] sm:$0x3] }
 0x4ea   : > { %3631 = vmatprep.mubr.f32.mxu1 %v8128_v24 }
 0x4ed   : > { %3632 = vmatmul.mubr.f32.gmra.mrb[78].mxu1 %v7224_v30  ;;  %v2622_v30 = vrot.slane %v2326_v18, 1 }
 0x4ee   : > { %3636 = vmatprep.mubr.f32.mxu1 %v8129_v13 }
 0x4f1   : > { %3637 = vmatmul.mubr.f32.gmra.mrb[80].mxu1 %v7252_v33  ;;  %v2623_v33 = vsel %vm601_vm0, %v2619_v54, %v2622_v30 }
 0x4f2   : > { %3641 = vmatprep.mubr.f32.mxu1 %v8130_v61 }
 0x4f5   : > { %3642 = vmatmul.mubr.f32.gmra.mrb[82].mxu1 %v7256_v41  ;;  %v2629_v41 = vrot.slane %v2326_v18, 2 }
 0x4f6   : > { %3646 = vmatprep.mubr.f32.mxu1 %v8131_v3  ;;  %v5405_v3 = vld [vmem:[#allocation2 + $0x31] sm:$0xff] }
 0x4f9   : > { %3647 = vmatmul.mubr.f32.gmra.mrb[84].mxu1 %v7277_v22  ;;  %v2630_v22 = vsel %vm714_vm1, %v7299_v32, %v2629_v41 }
 0x4fa   : > { %3651 = vmatprep.mubr.f32.mxu1 %v8132_v35 }
 0x4fd   : > { %3652 = vmatmul.mubr.f32.gmra.mrb[86].mxu1 %v7279_v7 }
 0x4fe   : > { %3656 = vmatprep.mubr.f32.mxu1 %v7547_v37  ;;  %v5403_v37 = vld [vmem:[#allocation2 + $0x19] sm:$0xff] }
 0x501   : > { %3657 = vmatmul.mubr.f32.gmra.mrb[88].mxu1 %v7410_v45 }
 0x502   : > { %3661 = vmatprep.mubr.f32.mxu1 %v7555_v57 }
 0x505   : > { %3662 = vmatmul.mubr.f32.gmra.mrb[90].mxu1 %v7419_v55 }
 0x506   : > { %3666 = vmatprep.mubr.f32.mxu1 %v2619_v54 }
 0x509   : > { %3667 = vmatmul.mubr.f32.gmra.mrb[92].mxu1 %v8140_v59 }
 0x50a   : > { %3671 = vmatprep.mubr.f32.mxu1 %v2623_v33  ;;  %v5410_v33 = vld [vmem:[#allocation2 + $0x69] sm:$0xff] }
 0x50d   : > { %3672 = vmatmul.mubr.f32.gmra.mrb[94].mxu1 %v8140_v59 }
 0x50e   : > { %4418 = vmatprep.mubr.f32.mxu1 %v7396_v23  ;;  %v7629_v23 = vld [vmem:[%s7816_s5] ss:$0 sm:$0xff] }
 0x511   : > { %4419 = vmatmul.mubr.f32.vlgmr.msra.gmra.mrb[96].mxu1 %v7404_v42 }
 0x512   : > { %4421 = vmatprep.mubr.f32.mxu1 %v7415_v14  ;;  %v7635_v14 = vld [vmem:[%s7817_s6] ss:$0 sm:$0xff] }
 0x515   : > { %4422 = vmatmul.mubr.f32.gmra.mrb[98].mxu1 %v7425_v26 }
 0x516   : > { %4424 = vmatprep.mubr.f32.mxu1 %v7542_v10 }
 0x519   : > { %4425 = vmatmul.mubr.f32.gmra.mrb[100].mxu1 %v7551_v44 }
 0x51a   : > { %4427 = vmatprep.mubr.f32.mxu1 %v7299_v32 }
 0x51d   : > { %4428 = vmatmul.mubr.f32.gmra.mrb[102].mxu1 %v2630_v22 }
 0x564   : > { %v3518_v7 = vpop.f32.mrb[32].mxu1 }
 0x565   : > { %v3744_v42 = vadd.f32 %v7382_v25, %v3518_v7  ;;  %v3520_v45 = vpop.f32.mrb[33].mxu1 }
 0x567   : > { %v3909_v55 = vmul.f32 %v7629_v23, %v3744_v42  ;;  %v8141_v42 = vld [vmem:[#allocation39_spill] sm:$0xff] }
 0x568   : > { %v3523_v26 = vpop.f32.mrb[34].mxu1 }
 0x569   : > { %v3948_v32 = vadd.f32 %v7635_v14, %v3909_v55  ;;  %v3749_v57 = vadd.f32 %v7379_v47, %v3523_v26  ;;  %v3525_v44 = vpop.f32.mrb[35].mxu1  ;;  %v5411_v26 = vld [vmem:[#allocation2 + $0x79] sm:$0xff] }
 0x56b   : > { %v3980_v51 = vadd.f32 %v5403_v37, %v3948_v32  ;;  %v3910_v11 = vmul.f32 %v7629_v23, %v3749_v57  ;;  %v8142_v37 = vld [vmem:[#allocation43_spill] sm:$0xff] }
 0x56c   : > { %v3528_v27 = vpop.f32.mrb[36].mxu1 }
 0x56d   : > { %4012 = vst [vmem:[%s7643_s21] sm:$0xff] %v3980_v51  ;;  %v3949_v25 = vadd.f32 %v7635_v14, %v3910_v11  ;;  %v3754_v21 = vadd.f32 %v7391_v20, %v3528_v27  ;;  %v3530_v4 = vpop.f32.mrb[37].mxu1  ;;  %v5412_v27 = vld [vmem:[#allocation2 + $0x81] sm:$0xff] }
 0x56f   : > { %v3981_v47 = vadd.f32 %v5404_v63, %v3949_v25  ;;  %v3911_v28 = vmul.f32 %v7629_v23, %v3754_v21 }
 0x570   : > { %v3533_v56 = vpop.f32.mrb[38].mxu1 }
 0x571   : > { %4013 = vst [vmem:[%s7643_s21 + $0x8] sm:$0xff] %v3981_v47  ;;  %v3950_v24 = vadd.f32 %v7635_v14, %v3911_v28  ;;  %v3759_v13 = vadd.f32 %v7387_v58, %v3533_v56  ;;  %v3535_v61 = vpop.f32.mrb[39].mxu1  ;;  %v8143_v47 = vld [vmem:[#allocation42_spill] sm:$0xff] }
 0x573   : > { %v3982_v35 = vadd.f32 %v5405_v3, %v3950_v24  ;;  %v3912_v10 = vmul.f32 %v7629_v23, %v3759_v13  ;;  %v5413_v24 = vld [vmem:[#allocation2 + $0x91] sm:$0xff] }
 0x574   : > { %v3538_v40 = vpop.f32.mrb[40].mxu1 }
 0x575   : > { %4014 = vst [vmem:[%s7643_s21 + $0x10] sm:$0xff] %v3982_v35  ;;  %v3951_v20 = vadd.f32 %v7635_v14, %v3912_v10  ;;  %v3764_v38 = vadd.f32 %v7408_v2, %v3538_v40  ;;  %v3540_v1 = vpop.f32.mrb[41].mxu1  ;;  %v8144_v10 = vld [vmem:[#allocation47_spill] sm:$0xff] }
 0x577   : > { %v3983_v9 = vadd.f32 %v5406_v36, %v3951_v20  ;;  %v3913_v8 = vmul.f32 %v7629_v23, %v3764_v38  ;;  %v5414_v38 = vld [vmem:[#allocation2 + $0x99] sm:$0xff] }
 0x578   : > { %v3543_v52 = vpop.f32.mrb[42].mxu1 }
 0x579   : > { %4015 = vst [vmem:[%s7643_s21 + $0x18] sm:$0xff] %v3983_v9  ;;  %v3952_v58 = vadd.f32 %v7635_v14, %v3913_v8  ;;  %v3769_v12 = vadd.f32 %v7401_v50, %v3543_v52  ;;  %v3545_v48 = vpop.f32.mrb[43].mxu1  ;;  %v8145_v52 = vld [vmem:[#allocation46_spill] sm:$0xff] }
 0x57a   : > { %v5415_v48 = vld [vmem:[#allocation2 + $0xa9] sm:$0xff] }
 0x57b   : > { %v3984_v15 = vadd.f32 %v5407_v49, %v3952_v58  ;;  %v3914_v46 = vmul.f32 %v7629_v23, %v3769_v12 }
 0x57c   : > { %v3548_v39 = vpop.f32.mrb[44].mxu1 }
 0x57d   : > { %4016 = vst [vmem:[%s7643_s21 + $0x20] sm:$0xff] %v3984_v15  ;;  %v3953_v2 = vadd.f32 %v7635_v14, %v3914_v46  ;;  %v3774_v34 = vadd.f32 %v7428_v31, %v3548_v39  ;;  %v3550_v5 = vpop.f32.mrb[45].mxu1 }
 0x57f   : > { %v3985_v19 = vadd.f32 %v5408_v29, %v3953_v2  ;;  %v3915_v62 = vmul.f32 %v7629_v23, %v3774_v34  ;;  %v8146_v2 = vld [vmem:[#allocation51_spill] sm:$0xff]  ;;  %v5416_v29 = vld [vmem:[#allocation2 + $0xb1] sm:$0xff] }
 0x580   : > { %v3553_v16 = vpop.f32.mrb[46].mxu1 }
 0x581   : > { %4017 = vst [vmem:[%s7643_s21 + $0x28] sm:$0xff] %v3985_v19  ;;  %v3954_v50 = vadd.f32 %v7635_v14, %v3915_v62  ;;  %v3779_v6 = vadd.f32 %v7422_v53, %v3553_v16  ;;  %v3555_v17 = vpop.f32.mrb[47].mxu1 }
 0x583   : > { %v3986_v0 = vadd.f32 %v5409_v43, %v3954_v50  ;;  %v3916_v59 = vmul.f32 %v7629_v23, %v3779_v6  ;;  %v8147_v6 = vld [vmem:[#allocation50_spill] sm:$0xff] }
 0x584   : > { %v3558_v54 = vpop.f32.mrb[48].mxu1 }
 0x585   : > { %4018 = vst [vmem:[%s7643_s21 + $0x30] sm:$0xff] %v3986_v0  ;;  %v3955_v31 = vadd.f32 %v7635_v14, %v3916_v59  ;;  %v3784_v18 = vadd.f32 %v7437_v60, %v3558_v54  ;;  %v3560_v30 = vpop.f32.mrb[49].mxu1  ;;  %v5417_v0 = vld [vmem:[#allocation2 + $0xc1] sm:$0xff] }
 0x586   : > { %v8148_v30 = vld [vmem:[#allocation23_spill] sm:$0xff] }
 0x587   : > { %v3987_v41 = vadd.f32 %v5410_v33, %v3955_v31  ;;  %v3917_v22 = vmul.f32 %v7629_v23, %v3784_v18 }
 0x588   : > { %v3563_v7 = vpop.f32.mrb[50].mxu1 }
 0x589   : > { %4019 = vst [vmem:[%s7643_s21 + $0x38] sm:$0xff] %v3987_v41  ;;  %v3956_v53 = vadd.f32 %v7635_v14, %v3917_v22  ;;  %v3789_v45 = vadd.f32 %v8141_v42, %v3563_v7  ;;  %v3565_v55 = vpop.f32.mrb[51].mxu1  ;;  %v5418_v22 = vld [vmem:[#allocation2 + $0xc9] sm:$0xff] }
 0x58a   : > { %v8149_v55 = vld [vmem:[#allocation22_spill] sm:$0xff] }
 0x58b   : > { %v3988_v32 = vadd.f32 %v5411_v26, %v3956_v53  ;;  %v3918_v57 = vmul.f32 %v7629_v23, %v3789_v45 }
 0x58c   : > { %v3568_v44 = vpop.f32.mrb[52].mxu1 }
 0x58d   : > { %4020 = vst [vmem:[%s7643_s21 + $0x40] sm:$0xff] %v3988_v32  ;;  %v3957_v60 = vadd.f32 %v7635_v14, %v3918_v57  ;;  %v3794_v51 = vadd.f32 %v8142_v37, %v3568_v44  ;;  %v3570_v11 = vpop.f32.mrb[53].mxu1  ;;  %v5419_v57 = vld [vmem:[#allocation2 + $0xd9] sm:$0xff] }
 0x58e   : > { %v8150_v11 = vld [vmem:[#allocation25_spill] sm:$0xff] }
 0x58f   : > { %v3989_v25 = vadd.f32 %v5412_v27, %v3957_v60  ;;  %v3919_v21 = vmul.f32 %v7629_v23, %v3794_v51 }
 0x590   : > { %v3573_v4 = vpop.f32.mrb[54].mxu1 }
 0x591   : > { %4021 = vst [vmem:[%s7643_s21 + $0x48] sm:$0xff] %v3989_v25  ;;  %v3958_v63 = vadd.f32 %v7635_v14, %v3919_v21  ;;  %v3799_v28 = vadd.f32 %v8143_v47, %v3573_v4  ;;  %v3575_v56 = vpop.f32.mrb[55].mxu1  ;;  %v5420_v21 = vld [vmem:[#allocation2 + $0xe1] sm:$0xff] }
 0x592   : > { %v8151_v56 = vld [vmem:[#allocation24_spill] sm:$0xff] }
 0x593   : > { %v3990_v13 = vadd.f32 %v5413_v24, %v3958_v63  ;;  %v3920_v61 = vmul.f32 %v7629_v23, %v3799_v28 }
 0x594   : > { %v3578_v3 = vpop.f32.mrb[56].mxu1 }
 0x595   : > { %4022 = vst [vmem:[%s7643_s21 + $0x50] sm:$0xff] %v3990_v13  ;;  %v3959_v35 = vadd.f32 %v7635_v14, %v3920_v61  ;;  %v3804_v40 = vadd.f32 %v8144_v10, %v3578_v3  ;;  %v3580_v20 = vpop.f32.mrb[57].mxu1  ;;  %v5421_v61 = vld [vmem:[#allocation2 + $0xf1] sm:$0xff] }
 0x596   : > { %v8152_v20 = vld [vmem:[#allocation27_spill] sm:$0xff] }
 0x597   : > { %v3991_v1 = vadd.f32 %v5414_v38, %v3959_v35  ;;  %v3921_v36 = vmul.f32 %v7629_v23, %v3804_v40 }
 0x598   : > { %v3583_v9 = vpop.f32.mrb[58].mxu1 }
 0x599   : > { %4023 = vst [vmem:[%s7643_s21 + $0x58] sm:$0xff] %v3991_v1  ;;  %v3960_v8 = vadd.f32 %v7635_v14, %v3921_v36  ;;  %v3809_v58 = vadd.f32 %v8145_v52, %v3583_v9  ;;  %v3585_v12 = vpop.f32.mrb[59].mxu1  ;;  %v5422_v36 = vld [vmem:[#allocation2 + $0xf9] sm:$0xff] }
 0x59a   : > { %v8153_v12 = vld [vmem:[#allocation26_spill] sm:$0xff] }
 0x59b   : > { %v3992_v49 = vadd.f32 %v5415_v48, %v3960_v8  ;;  %v3922_v15 = vmul.f32 %v7629_v23, %v3809_v58 }
 0x59c   : > { %v3588_v46 = vpop.f32.mrb[60].mxu1 }
 0x59d   : > { %4024 = vst [vmem:[%s7643_s21 + $0x60] sm:$0xff] %v3992_v49  ;;  %v3961_v39 = vadd.f32 %v7635_v14, %v3922_v15  ;;  %v3814_v34 = vadd.f32 %v8146_v2, %v3588_v46  ;;  %v3590_v5 = vpop.f32.mrb[61].mxu1  ;;  %v5423_v15 = vld [vmem:[#allocation2 + $0x109] sm:$0xff] }
 0x59e   : > { %v8154_v5 = vld [vmem:[#allocation29_spill] sm:$0xff] }
 0x59f   : > { %v3993_v19 = vadd.f32 %v5416_v29, %v3961_v39  ;;  %v3923_v62 = vmul.f32 %v7629_v23, %v3814_v34 }
 0x5a0   : > { %v3593_v16 = vpop.f32.mrb[62].mxu1 }
 0x5a1   : > { %4025 = vst [vmem:[%s7643_s21 + $0x68] sm:$0xff] %v3993_v19  ;;  %v3962_v50 = vadd.f32 %v7635_v14, %v3923_v62  ;;  %v3819_v17 = vadd.f32 %v8147_v6, %v3593_v16  ;;  %v3595_v43 = vpop.f32.mrb[63].mxu1  ;;  %v5424_v62 = vld [vmem:[#allocation2 + $0x111] sm:$0xff] }
 0x5a2   : > { %v8155_v43 = vld [vmem:[#allocation28_spill] sm:$0xff] }
 0x5a3   : > { %v3994_v59 = vadd.f32 %v5417_v0, %v3962_v50  ;;  %v3924_v54 = vmul.f32 %v7629_v23, %v3819_v17 }
 0x5a4   : > { %v3598_v31 = vpop.f32.mrb[64].mxu1 }
 0x5a5   : > { %4026 = vst [vmem:[%s7643_s21 + $0x70] sm:$0xff] %v3994_v59  ;;  %v3963_v18 = vadd.f32 %v7635_v14, %v3924_v54  ;;  %v3824_v33 = vadd.f32 %v8148_v30, %v3598_v31  ;;  %v3600_v41 = vpop.f32.mrb[65].mxu1  ;;  %v5425_v54 = vld [vmem:[#allocation2 + $0x121] sm:$0xff] }
 0x5a7   : > { %v3995_v7 = vadd.f32 %v5418_v22, %v3963_v18  ;;  %v3925_v53 = vmul.f32 %v7629_v23, %v3824_v33  ;;  %v5426_v22 = vld [vmem:[#allocation2 + $0x129] sm:$0xff] }
 0x5a8   : > { %v3603_v42 = vpop.f32.mrb[66].mxu1 }
 0x5a9   : > { %4027 = vst [vmem:[%s7643_s21 + $0x78] sm:$0xff] %v3995_v7  ;;  %v3964_v45 = vadd.f32 %v7635_v14, %v3925_v53  ;;  %v3829_v26 = vadd.f32 %v8149_v55, %v3603_v42  ;;  %v3605_v32 = vpop.f32.mrb[67].mxu1 }
 0x5ab   : > { %v3996_v44 = vadd.f32 %v5419_v57, %v3964_v45  ;;  %v3926_v60 = vmul.f32 %v7629_v23, %v3829_v26 }
 0x5ac   : > { %v3608_v37 = vpop.f32.mrb[68].mxu1 }
 0x5ad   : > { %4028 = vst [vmem:[%s7643_s21 + $0x80] sm:$0xff] %v3996_v44  ;;  %v3965_v51 = vadd.f32 %v7635_v14, %v3926_v60  ;;  %v3834_v27 = vadd.f32 %v8150_v11, %v3608_v37  ;;  %v3610_v25 = vpop.f32.mrb[69].mxu1 }
 0x5af   : > { %v3997_v4 = vadd.f32 %v5420_v21, %v3965_v51  ;;  %v3927_v63 = vmul.f32 %v7629_v23, %v3834_v27 }
 0x5b0   : > { %v3613_v47 = vpop.f32.mrb[70].mxu1 }
 0x5b1   : > { %4029 = vst [vmem:[%s7643_s21 + $0x88] sm:$0xff] %v3997_v4  ;;  %v3966_v28 = vadd.f32 %v7635_v14, %v3927_v63  ;;  %v3839_v24 = vadd.f32 %v8151_v56, %v3613_v47  ;;  %v3615_v13 = vpop.f32.mrb[71].mxu1 }
 0x5b3   : > { %v3998_v3 = vadd.f32 %v5421_v61, %v3966_v28  ;;  %v3928_v35 = vmul.f32 %v7629_v23, %v3839_v24 }
 0x5b4   : > { %v3618_v10 = vpop.f32.mrb[72].mxu1 }
 0x5b5   : > { %4030 = vst [vmem:[%s7643_s21 + $0x90] sm:$0xff] %v3998_v3  ;;  %v3967_v40 = vadd.f32 %v7635_v14, %v3928_v35  ;;  %v3844_v38 = vadd.f32 %v8152_v20, %v3618_v10  ;;  %v3620_v1 = vpop.f32.mrb[73].mxu1 }
 0x5b6   : > { %v5428_v1 = vld [vmem:[#allocation2 + $0x139] sm:$0xff] }
 0x5b7   : > { %v3999_v9 = vadd.f32 %v5422_v36, %v3967_v40  ;;  %v3929_v8 = vmul.f32 %v7629_v23, %v3844_v38  ;;  %v5427_v40 = vld [vmem:[#allocation2 + $0x141] sm:$0xff] }
 0x5b8   : > { %v3623_v52 = vpop.f32.mrb[74].mxu1 }
 0x5b9   : > { %4031 = vst [vmem:[%s7643_s21 + $0x98] sm:$0xff] %v3999_v9  ;;  %v3968_v58 = vadd.f32 %v7635_v14, %v3929_v8  ;;  %v3849_v48 = vadd.f32 %v8153_v12, %v3623_v52  ;;  %v3625_v49 = vpop.f32.mrb[75].mxu1 }
 0x5bb   : > { %v4000_v46 = vadd.f32 %v5423_v15, %v3968_v58  ;;  %v3930_v39 = vmul.f32 %v7629_v23, %v3849_v48  ;;  %v5429_v15 = vld [vmem:[#allocation2 + $0x159] sm:$0xff] }
 0x5bc   : > { %v3628_v2 = vpop.f32.mrb[76].mxu1 }
 0x5bd   : > { %4032 = vst [vmem:[%s7643_s21 + $0xa0] sm:$0xff] %v4000_v46  ;;  %v3969_v34 = vadd.f32 %v7635_v14, %v3930_v39  ;;  %v3854_v29 = vadd.f32 %v8154_v5, %v3628_v2  ;;  %v3630_v19 = vpop.f32.mrb[77].mxu1  ;;  %v5430_v2 = vld [vmem:[#allocation2 + $0x151] sm:$0xff] }
 0x5bf   : > { %v4001_v16 = vadd.f32 %v5424_v62, %v3969_v34  ;;  %v3931_v50 = vmul.f32 %v7629_v23, %v3854_v29 }
 0x5c0   : > { %v3633_v6 = vpop.f32.mrb[78].mxu1 }
 0x5c1   : > { %4033 = vst [vmem:[%s7643_s21 + $0xa8] sm:$0xff] %v4001_v16  ;;  %v3970_v17 = vadd.f32 %v7635_v14, %v3931_v50  ;;  %v3859_v0 = vadd.f32 %v8155_v43, %v3633_v6  ;;  %v3635_v59 = vpop.f32.mrb[79].mxu1 }
 0x5c2   : > { %v5432_v59 = vld [vmem:[#allocation2 + $0x169] sm:$0xff] }
 0x5c3   : > { %v4002_v31 = vadd.f32 %v5425_v54, %v3970_v17  ;;  %v3932_v18 = vmul.f32 %v7629_v23, %v3859_v0  ;;  %v5431_v17 = vld [vmem:[#allocation2 + $0x171] sm:$0xff] }
 0x5c4   : > { %v3638_v30 = vpop.f32.mrb[80].mxu1 }
 0x5c5   : > { %4034 = vst [vmem:[%s7643_s21 + $0xb0] sm:$0xff] %v4002_v31  ;;  %v3971_v33 = vadd.f32 %v7635_v14, %v3932_v18  ;;  %v3640_v41 = vpop.f32.mrb[81].mxu1 }
 0x5c7   : > { %v4003_v7 = vadd.f32 %v5426_v22, %v3971_v33  ;;  %v5433_v33 = vld [vmem:[#allocation2 + $0x189] sm:$0xff] }
 0x5c8   : > { %v3643_v53 = vpop.f32.mrb[82].mxu1 }
 0x5c9   : > { %4035 = vst [vmem:[%s7643_s21 + $0xb8] sm:$0xff] %v4003_v7  ;;  %v3645_v42 = vpop.f32.mrb[83].mxu1 }
 0x5cc   : > { %v3648_v45 = vpop.f32.mrb[84].mxu1 }
 0x5cd   : > { %v3650_v55 = vpop.f32.mrb[85].mxu1 }
 0x5d0   : > { %v3653_v26 = vpop.f32.mrb[86].mxu1 }
 0x5d1   : > { %v3655_v32 = vpop.f32.mrb[87].mxu1 }
 0x5d4   : > { %v3658_v57 = vpop.f32.mrb[88].mxu1 }
 0x5d5   : > { %v3660_v44 = vpop.f32.mrb[89].mxu1 }
 0x5d8   : > { %v3663_v60 = vpop.f32.mrb[90].mxu1 }
 0x5d9   : > { %v3665_v37 = vpop.f32.mrb[91].mxu1 }
 0x5dc   : > { %v3668_v51 = vpop.f32.mrb[92].mxu1 }
 0x5dd   : > { %v3670_v11 = vpop.f32.mrb[93].mxu1 }
 0x5e0   : > { %v3673_v27 = vpop.f32.mrb[94].mxu1 }
 0x5e1   : > { %v3675_v25 = vpop.f32.mrb[95].mxu1 }
 0x5e4   : > { %v4420_v21 = vpop.f32.mrb[96].mxu1 }
 0x5e5   : > { %v3869_v4 = vadd.f32 %v4420_v21, %v3643_v53  ;;  %v3863_v63 = vpop.f32.mrb[97].mxu1 }
 0x5e6   : > { %v3864_v47 = vadd.f32 %v3863_v63, %v3638_v30 }
 0x5e7   : > { %v3934_v28 = vmul.f32 %v7629_v23, %v3869_v4 }
 0x5e8   : > { %v3933_v56 = vmul.f32 %v7629_v23, %v3864_v47  ;;  %v4423_v24 = vpop.f32.mrb[98].mxu1 }
 0x5e9   : > { %v3973_v13 = vadd.f32 %v7635_v14, %v3934_v28  ;;  %v3879_v61 = vadd.f32 %v4423_v24, %v3653_v26  ;;  %v3873_v3 = vpop.f32.mrb[99].mxu1 }
 0x5ea   : > { %v3972_v35 = vadd.f32 %v7635_v14, %v3933_v56  ;;  %v3874_v10 = vadd.f32 %v3873_v3, %v3648_v45 }
 0x5eb   : > { %v4005_v20 = vadd.f32 %v5427_v40, %v3973_v13  ;;  %v3936_v38 = vmul.f32 %v7629_v23, %v3879_v61 }
 0x5ec   : > { %v4004_v36 = vadd.f32 %v5428_v1, %v3972_v35  ;;  %v3935_v9 = vmul.f32 %v7629_v23, %v3874_v10  ;;  %v4426_v8 = vpop.f32.mrb[100].mxu1 }
 0x5ed   : > { %4037 = vst [vmem:[%s7643_s21 + $0xc8] sm:$0xff] %v4005_v20  ;;  %v3975_v52 = vadd.f32 %v7635_v14, %v3936_v38  ;;  %v3889_v58 = vadd.f32 %v4426_v8, %v3663_v60  ;;  %v3883_v12 = vpop.f32.mrb[101].mxu1 }
 0x5ee   : > { %4036 = vst [vmem:[%s7643_s21 + $0xc0] sm:$0xff] %v4004_v36  ;;  %v3974_v48 = vadd.f32 %v7635_v14, %v3935_v9  ;;  %v3884_v49 = vadd.f32 %v3883_v12, %v3658_v57 }
 0x5ef   : > { %v4007_v46 = vadd.f32 %v5429_v15, %v3975_v52  ;;  %v3938_v39 = vmul.f32 %v7629_v23, %v3889_v58 }
 0x5f0   : > { %v4006_v34 = vadd.f32 %v5430_v2, %v3974_v48  ;;  %v3937_v5 = vmul.f32 %v7629_v23, %v3884_v49  ;;  %v4429_v29 = vpop.f32.mrb[102].mxu1 }
 0x5f1   : > { %4039 = vst [vmem:[%s7643_s21 + $0xd8] sm:$0xff] %v4007_v46  ;;  %v3977_v19 = vadd.f32 %v7635_v14, %v3938_v39  ;;  %v3899_v62 = vadd.f32 %v4429_v29, %v3673_v27  ;;  %v3893_v16 = vpop.f32.mrb[103].mxu1 }
 0x5f2   : > { %4038 = vst [vmem:[%s7643_s21 + $0xd0] sm:$0xff] %v4006_v34  ;;  %v3976_v50 = vadd.f32 %v7635_v14, %v3937_v5  ;;  %v3894_v6 = vadd.f32 %v3893_v16, %v3668_v51 }
 0x5f3   : > { %v4009_v43 = vadd.f32 %v5431_v17, %v3977_v19  ;;  %v3940_v0 = vmul.f32 %v7629_v23, %v3899_v62 }
 0x5f4   : > { %v4008_v54 = vadd.f32 %v5432_v59, %v3976_v50  ;;  %v3939_v31 = vmul.f32 %v7629_v23, %v3894_v6  ;;  %v5434_v23 = vld [vmem:[#allocation2 + $0x181] sm:$0xff] }
 0x5f5   : > { %4041 = vst [vmem:[%s7643_s21 + $0xe8] sm:$0xff] %v4009_v43  ;;  %v3979_v18 = vadd.f32 %v7635_v14, %v3940_v0 }
 0x5f6   : > { %4040 = vst [vmem:[%s7643_s21 + $0xe0] sm:$0xff] %v4008_v54  ;;  %v3978_v30 = vadd.f32 %v7635_v14, %v3939_v31 }
 0x5f7   : > { %v4011_v41 = vadd.f32 %v5433_v33, %v3979_v18 }
 0x5f8   : > { %v4010_v22 = vadd.f32 %v5434_v23, %v3978_v30 }
 0x5f9   : > { %4043 = vst [vmem:[%s7643_s21 + $0xf8] sm:$0xff] %v4011_v41 }
 0x5fa   : > { %4042 = vst [vmem:[%s7643_s21 + $0xf0] sm:$0xff] %v4010_v22 }
 0x5fb   : > { %5534 = shalt.err (!%p5531_p1)
}
 0x5fc   : > { %s5535_s15 = scalar_lea.hbm %s7763_s30, 4096  ;;  %s5539_s21 = scalar_lea.hbm %s7818_s7, 8192 }
 0x5fd   : > { %p5536_p13 = scmp.ne.s32.totalorder %s7763_s30, %s5535_s15  ;;  %p5540_p4 = scmp.lt.u32.totalorder %s7763_s30, %s7818_s7 }
 0x5fe   : > { %p5541_p5 = scmp.lt.u32.totalorder %s5539_s21, %s5535_s15  ;;  %p5543_p11 = scmp.lt.u32.totalorder %s5535_s15, %s7763_s30 }
 0x5ff   : > { %p5537_p6 = pnand %p5536_p13, %p8156_p0 }
 0x600   : > { %p5542_p8 = por %p5541_p5, %p5540_p4 }
 0x601   : > { %p5538_p10 = pneg %p5537_p6 }
 0x602   : > { %p5544_p2 = por %p5543_p11, %p5542_p8 }
 0x604   : > { %p5545_p3 = pnand %p5544_p2, %p5538_p10 }
 0x606   : > { %5548 = shalt.err (!%p5545_p3)
}
 0x607   : > { %s5601_s13 = smov 128   ;;  %s5602_s9 = smov 8  }
 0x608   : > { %5288 = dma.vmem_to_hbm [thread:$0]  (%p8156_p0), %s7765_s22, 4096, %s7763_s30, %s4045_s28, %s5601_s13, %s5601_s13, %s5602_s9  }
 0x609 PF: > { %s4073_s29 = sand.u32 1, %s5579_s24   ;;  %p8157_p7 = scmp.ne.s32.totalorder %s7969_s8, 0 }
 0x60a   : > { %p8158_p9 = scmp.ge.s32.totalorder %s5591_s27, 2  ;;  %s4074_s11 = scalar_lea.sflag [#allocation6], %s4073_s29 }
 0x60c   : > { %p5302_p12 = pnand %p8158_p9, %p8157_p7 }
 0x60e   : > { %5574 = dma.done.wait (!%p5302_p12), %s4074_s11, 4096  }
 0x60f   : > { %5576 = vsyncadd (!%p5302_p12), %s4074_s11, 4294963200  ;;  %p21_p1 = scmp.ge.s32.totalorder %s5759_s12, 4   ;;  %s8159_s24 = smov %s5583_s25 }
 0x610   : > { %s8160_s25 = smov %s5587_s26  ;;  %s8161_s26 = smov %s5775_s17 }
 0x611   : > { %s8162_s27 = smov %s5759_s12  ;;  %23 = sbr.rel (!%p21_p1) target bundleno = 6 (0x6), region = 103 }
 0x618   :  { %4079 = vsyncpa [#allocation5], 1 }
 0x619   :  { %4081 = vsyncpa [#allocation5 + $0x1], 1 }
 0x61a   :  { %4082 = vsyncpa [#allocation8], 1 }
 0x61b   :  { %4083 = vsyncpa [#allocation6], 1 }
 0x61c   :  { %4085 = vsyncpa [#allocation6 + $0x1], 1 }

</bundles_post_ra>
